<compile_context>
chip_gen: v7x
topology: tpu7x:2x2x1
jax: 0.10.0
libtpu: 0.0.40
codegen_flags: <defaults>
</compile_context>

<pallas_src>
import functools

import jax
import jax.numpy as jnp
from jax.experimental import pallas as pl
from jax.experimental.pallas import tpu as pltpu

CHANNELS = [16, 64, 384, 512]
FEATURE_DIM = CHANNELS[3]        # 512
ATTR_FEAT_DIM = CHANNELS[1]      # 64
ATTR_DIM = 46
OUT_PAD = 128                    # lane-dense padded classifier width
BN_EPS = 1e-5


def cd_builder_kernel(x_ref, w1_ref, b1_ref, w2_ref, b2_ref, out_ref, acc_ref, *, inv_hw):
    # x_ref: (Bt, 512, HWt) tile of the (B, C, HW) feature map.
    k = pl.program_id(1)

    @pl.when(k == 0)
    def _():
        acc_ref[...] = jnp.zeros_like(acc_ref)

    # Running global-sum pool over this HW tile (lane-axis reduce; hidden under DMA).
    acc_ref[...] += jnp.sum(x_ref[...], axis=-1)                       # (Bt, 512)

    @pl.when(k == pl.num_programs(1) - 1)
    def _():
        # Finalize: mean, fused (Linear+BN), ReLU, classifier.  Dropout = identity (eval).
        pooled = acc_ref[...] * inv_hw                                 # (Bt, 512)
        h = jnp.dot(pooled, w1_ref[...],
                    preferred_element_type=jnp.float32) + b1_ref[...]  # (Bt, 64), BN folded
        h = jnp.maximum(h, 0.0)
        out = jnp.dot(h, w2_ref[...],
                      preferred_element_type=jnp.float32) + b2_ref[...]  # (Bt, 128) padded
        out_ref[...] = out.astype(out_ref.dtype)


def _pick_batch_tile(B):
    # Output block's second-to-last dim must be a multiple of 8 or the full extent.
    if B <= 8 or B % 8 != 0:
        return B
    return 8


def _pick_hw_tile(HW, bt):
    # Last block dim must be a multiple of 128 or the full extent.
    if HW % 128 != 0:
        return HW
    # Keep the (bt, 512, hwt) f32 input tile around <= ~4 MiB (x2 for double-buffering).
    budget = max(128, (4 * 1024 * 1024) // (bt * FEATURE_DIM * 4))
    hwt = 128
    while hwt * 2 <= budget and HW % (hwt * 2) == 0:
        hwt *= 2
    return hwt


def cd_builder_forward(x_nchw, params):
    """x_nchw: (B, C=512, H, W) float32 feature map (NCHW, PyTorch convention)."""
    B, C, H, W = x_nchw.shape
    assert C == FEATURE_DIM
    HW = H * W
    # Free reshape of NCHW -> (B, C, HW): no transpose, no extra HBM pass.
    x = x_nchw.reshape(B, C, HW)

    # Fold BatchNorm1d (eval mode) into the first Linear: tiny one-off prep outside the kernel.
    scale = params["bn_gamma"] * jax.lax.rsqrt(params["bn_var"] + BN_EPS)       # (1, 64)
    w1f = params["w1"] * scale                                                  # (512, 64)
    b1f = (params["b1"] - params["bn_mean"]) * scale + params["bn_beta"]        # (1, 64)

    # Lane-dense padded classifier (46 -> 128 lanes); sliced back after the kernel.
    w2p = jnp.zeros((ATTR_FEAT_DIM, OUT_PAD), jnp.float32).at[:, :ATTR_DIM].set(params["w2"])
    b2p = jnp.zeros((1, OUT_PAD), jnp.float32).at[:, :ATTR_DIM].set(params["b2"])

    bt = _pick_batch_tile(B)
    hwt = _pick_hw_tile(HW, bt)
    grid = (B // bt, HW // hwt)

    kernel = functools.partial(cd_builder_kernel, inv_hw=1.0 / float(HW))

    out_padded = pl.pallas_call(
        kernel,
        out_shape=jax.ShapeDtypeStruct((B, OUT_PAD), jnp.float32),
        grid=grid,
        in_specs=[
            pl.BlockSpec((bt, FEATURE_DIM, hwt), lambda i, k: (i, 0, k)),
            pl.BlockSpec((FEATURE_DIM, ATTR_FEAT_DIM), lambda i, k: (0, 0)),
            pl.BlockSpec((1, ATTR_FEAT_DIM), lambda i, k: (0, 0)),
            pl.BlockSpec((ATTR_FEAT_DIM, OUT_PAD), lambda i, k: (0, 0)),
            pl.BlockSpec((1, OUT_PAD), lambda i, k: (0, 0)),
        ],
        out_specs=pl.BlockSpec((bt, OUT_PAD), lambda i, k: (i, 0)),
        scratch_shapes=[pltpu.VMEM((bt, FEATURE_DIM), jnp.float32)],
        compiler_params=pltpu.CompilerParams(
            dimension_semantics=("parallel", "arbitrary"),
            vmem_limit_bytes=32 * 1024 * 1024,
        ),
    )(x, w1f, b1f, w2p, b2p)

    return {"attr": out_padded[:, :ATTR_DIM]}


def init_params(key):
    k1, k2, k3, k4 = jax.random.split(key, 4)
    return {
        # fc: Linear(512 -> 64)
        "w1": jax.random.normal(k1, (FEATURE_DIM, ATTR_FEAT_DIM), jnp.float32) * 0.02,
        "b1": jax.random.normal(k2, (1, ATTR_FEAT_DIM), jnp.float32) * 0.02,
        # BatchNorm1d(64) running stats + affine (PyTorch default init)
        "bn_gamma": jnp.ones((1, ATTR_FEAT_DIM), jnp.float32),
        "bn_beta": jnp.zeros((1, ATTR_FEAT_DIM), jnp.float32),
        "bn_mean": jnp.zeros((1, ATTR_FEAT_DIM), jnp.float32),
        "bn_var": jnp.ones((1, ATTR_FEAT_DIM), jnp.float32),
        # attr_clf: Linear(64 -> 46)
        "w2": jax.random.normal(k3, (ATTR_FEAT_DIM, ATTR_DIM), jnp.float32) * 0.02,
        "b2": jax.random.normal(k4, (1, ATTR_DIM), jnp.float32) * 0.02,
    }


def reference_forward(x_nchw, p):
    pooled = jnp.mean(x_nchw, axis=(2, 3))                     # (B, 512)
    h = pooled @ p["w1"] + p["b1"]
    h = (h - p["bn_mean"]) / jnp.sqrt(p["bn_var"] + BN_EPS) * p["bn_gamma"] + p["bn_beta"]
    h = jnp.maximum(h, 0.0)
    return h @ p["w2"] + p["b2"]


if __name__ == "__main__":
    key = jax.random.PRNGKey(0)
    kx, kp = jax.random.split(key)

    B, H, W = 2, 8, 8
    x = jax.random.normal(kx, (B, FEATURE_DIM, H, W), jnp.float32)  # NCHW
    params = init_params(kp)

    out = cd_builder_forward(x, params)
    attr = jax.block_until_ready(out["attr"])

    ref = reference_forward(x, params)
    assert attr.shape == (B, ATTR_DIM)
    assert jnp.allclose(attr, ref, atol=1e-4, rtol=1e-4)
    print("KERNEL_OK")
</pallas_src>

<mosaic_0001>
module attributes {stable_mosaic.version = 11 : i64} {
  func.func @cd_builder_kernel(%arg0: i32, %arg1: i32, %arg2: memref<2x512x64xf32, #tpu.memory_space<vmem>>, %arg3: memref<512x64xf32, #tpu.memory_space<vmem>>, %arg4: memref<1x64xf32, #tpu.memory_space<vmem>>, %arg5: memref<64x128xf32, #tpu.memory_space<vmem>>, %arg6: memref<1x128xf32, #tpu.memory_space<vmem>>, %arg7: memref<2x128xf32, #tpu.memory_space<vmem>>, %arg8: memref<2x512xf32, #tpu.memory_space<vmem>>) attributes {dimension_semantics = [#tpu.dimension_semantics<parallel>, #tpu.dimension_semantics<arbitrary>], iteration_bounds = array<i64: 1, 1>, scalar_prefetch = 0 : i64, scratch_operands = 1 : i64, tpu.core_type = #tpu.core_type<tc>, window_params = [{transform_indices = @transform_0, window_bounds = array<i64: 2, 512, 64>}, {pipeline_mode = #tpu.pipeline_mode<synchronous>, transform_indices = @transform_1, window_bounds = array<i64: 512, 64>}, {pipeline_mode = #tpu.pipeline_mode<synchronous>, transform_indices = @transform_2, window_bounds = array<i64: 1, 64>}, {pipeline_mode = #tpu.pipeline_mode<synchronous>, transform_indices = @transform_3, window_bounds = array<i64: 64, 128>}, {pipeline_mode = #tpu.pipeline_mode<synchronous>, transform_indices = @transform_4, window_bounds = array<i64: 1, 128>}, {transform_indices = @transform_5, window_bounds = array<i64: 2, 128>}]} {
    %c0_i32 = arith.constant 0 : i32
    %0 = arith.cmpi eq, %arg1, %c0_i32 : i32
    %1 = arith.extui %0 : i1 to i32
    %c0_i32_0 = arith.constant 0 : i32
    %2 = arith.cmpi ne, %1, %c0_i32_0 : i32
    scf.if %2 {
      %cst_9 = arith.constant 0.000000e+00 : f32
      %11 = vector.broadcast %cst_9 : f32 to vector<2x512xf32>
      %c0_10 = arith.constant 0 : index
      %c0_11 = arith.constant 0 : index
      %12 = vector.load %arg8[%c0_10, %c0_11] : memref<2x512xf32, #tpu.memory_space<vmem>>, vector<2x512xf32>
      tpu.vector_store %arg8[%c0_10, %c0_11], %11 {strides = array<i32>} : memref<2x512xf32, #tpu.memory_space<vmem>>, vector<2x512xf32>,
    } else {
    }
    %c0 = arith.constant 0 : index
    %c0_1 = arith.constant 0 : index
    %3 = vector.load %arg8[%c0, %c0_1] : memref<2x512xf32, #tpu.memory_space<vmem>>, vector<2x512xf32>
    %c0_2 = arith.constant 0 : index
    %c0_3 = arith.constant 0 : index
    %c0_4 = arith.constant 0 : index
    %4 = vector.load %arg2[%c0_2, %c0_3, %c0_4] : memref<2x512x64xf32, #tpu.memory_space<vmem>>, vector<2x512x64xf32>
    %cst = arith.constant dense<0.000000e+00> : vector<2x512xf32>
    %5 = vector.multi_reduction <add>, %4, %cst [2] : vector<2x512x64xf32> to vector<2x512xf32>
    %6 = arith.addf %3, %5 : vector<2x512xf32>
    %c0_5 = arith.constant 0 : index
    %c0_6 = arith.constant 0 : index
    %7 = vector.load %arg8[%c0_5, %c0_6] : memref<2x512xf32, #tpu.memory_space<vmem>>, vector<2x512xf32>
    tpu.vector_store %arg8[%c0_5, %c0_6], %6 {strides = array<i32>} : memref<2x512xf32, #tpu.memory_space<vmem>>, vector<2x512xf32>,
    %c0_i32_7 = arith.constant 0 : i32
    %8 = arith.cmpi eq, %arg1, %c0_i32_7 : i32
    %9 = arith.extui %8 : i1 to i32
    %c0_i32_8 = arith.constant 0 : i32
    %10 = arith.cmpi ne, %9, %c0_i32_8 : i32
    scf.if %10 {
      %c0_9 = arith.constant 0 : index
      %c0_10 = arith.constant 0 : index
      %11 = vector.load %arg8[%c0_9, %c0_10] : memref<2x512xf32, #tpu.memory_space<vmem>>, vector<2x512xf32>
      %cst_11 = arith.constant 1.562500e-02 : f32
      %12 = vector.broadcast %cst_11 : f32 to vector<2x512xf32>
      %13 = arith.mulf %11, %12 : vector<2x512xf32>
      %c0_12 = arith.constant 0 : index
      %c0_13 = arith.constant 0 : index
      %14 = vector.load %arg3[%c0_12, %c0_13] : memref<512x64xf32, #tpu.memory_space<vmem>>, vector<512x64xf32>
      %cst_14 = arith.constant dense<0.000000e+00> : vector<2x64xf32>
      %15 = tpu.matmul %13, %14, %cst_14 {dimension_numbers = #tpu.dot_dimension_numbers<[1], [0], [0], [1], [0, 0, 1, 1], [], []>} : vector<2x512xf32>, vector<512x64xf32>, vector<2x64xf32> -> vector<2x64xf32>
      %c0_15 = arith.constant 0 : index
      %c0_16 = arith.constant 0 : index
      %16 = vector.load %arg4[%c0_15, %c0_16] : memref<1x64xf32, #tpu.memory_space<vmem>>, vector<1x64xf32>
      %17 = vector.broadcast %16 : vector<1x64xf32> to vector<2x64xf32>
      %18 = arith.addf %15, %17 : vector<2x64xf32>
      %cst_17 = arith.constant 0.000000e+00 : f32
      %19 = vector.broadcast %cst_17 : f32 to vector<2x64xf32>
      %20 = arith.maximumf %18, %19 : vector<2x64xf32>
      %c0_18 = arith.constant 0 : index
      %c0_19 = arith.constant 0 : index
      %21 = vector.load %arg5[%c0_18, %c0_19] : memref<64x128xf32, #tpu.memory_space<vmem>>, vector<64x128xf32>
      %cst_20 = arith.constant dense<0.000000e+00> : vector<2x128xf32>
      %22 = tpu.matmul %20, %21, %cst_20 {dimension_numbers = #tpu.dot_dimension_numbers<[1], [0], [0], [1], [0, 0, 1, 1], [], []>} : vector<2x64xf32>, vector<64x128xf32>, vector<2x128xf32> -> vector<2x128xf32>
      %c0_21 = arith.constant 0 : index
      %c0_22 = arith.constant 0 : index
      %23 = vector.load %arg6[%c0_21, %c0_22] : memref<1x128xf32, #tpu.memory_space<vmem>>, vector<1x128xf32>
      %24 = vector.broadcast %23 : vector<1x128xf32> to vector<2x128xf32>
      %25 = arith.addf %22, %24 : vector<2x128xf32>
      %c0_23 = arith.constant 0 : index
      %c0_24 = arith.constant 0 : index
      %26 = vector.load %arg7[%c0_23, %c0_24] : memref<2x128xf32, #tpu.memory_space<vmem>>, vector<2x128xf32>
      tpu.vector_store %arg7[%c0_23, %c0_24], %25 {strides = array<i32>} : memref<2x128xf32, #tpu.memory_space<vmem>>, vector<2x128xf32>,
    } else {
    }
    return
  }
  func.func @transform_0(%arg0: i32, %arg1: i32) -> (i32, i32, i32) {
    %c0_i32 = arith.constant 0 : i32
    %c0_i32_0 = arith.constant 0 : i32
    return %arg0, %c0_i32, %arg1 : i32, i32, i32
  }
  func.func @transform_1(%arg0: i32, %arg1: i32) -> (i32, i32) {
    %c0_i32 = arith.constant 0 : i32
    %c0_i32_0 = arith.constant 0 : i32
    %c0_i32_1 = arith.constant 0 : i32
    return %c0_i32, %c0_i32_0 : i32, i32
  }
  func.func @transform_2(%arg0: i32, %arg1: i32) -> (i32, i32) {
    %c0_i32 = arith.constant 0 : i32
    %c0_i32_0 = arith.constant 0 : i32
    %c0_i32_1 = arith.constant 0 : i32
    return %c0_i32, %c0_i32_0 : i32, i32
  }
  func.func @transform_3(%arg0: i32, %arg1: i32) -> (i32, i32) {
    %c0_i32 = arith.constant 0 : i32
    %c0_i32_0 = arith.constant 0 : i32
    %c0_i32_1 = arith.constant 0 : i32
    return %c0_i32, %c0_i32_0 : i32, i32
  }
  func.func @transform_4(%arg0: i32, %arg1: i32) -> (i32, i32) {
    %c0_i32 = arith.constant 0 : i32
    %c0_i32_0 = arith.constant 0 : i32
    %c0_i32_1 = arith.constant 0 : i32
    return %c0_i32, %c0_i32_0 : i32, i32
  }
  func.func @transform_5(%arg0: i32, %arg1: i32) -> (i32, i32) {
    %c0_i32 = arith.constant 0 : i32
    %c0_i32_0 = arith.constant 0 : i32
    return %arg0, %c0_i32 : i32, i32
  }
}

</mosaic_0001>

<bundles_post_ra>
// kernel: tpu_custom_call.1
= control target key start
LH: loop header
LB: loop body
LE: loop exit
PB: predicated region body
PF: predicated region fallthrough
CT: control target
= control target key end

     0   :  { %vm155_vm0 = vcmask 523264   ;;  %s11533_s0 = inlined_call_operand.vmem [shape: f32[2,512,64], index: 0, kind: input, shape index: {}]   ;;  %s11534_s1 = inlined_call_operand.vmem [shape: f32[512,64], index: 1, kind: input, shape index: {}]   ;;  %s11535_s2 = inlined_call_operand.vmem [shape: f32[1,64], index: 2, kind: input, shape index: {}]   ;;  %s11536_s3 = inlined_call_operand.vmem [shape: f32[64,128], index: 3, kind: input, shape index: {}]   ;;  %s11537_s4 = inlined_call_operand.vmem [shape: f32[1,128], index: 4, kind: input, shape index: {}]   ;;  %s11538_s5 = inlined_call_operand.hbm [shape: f32[2,128], index: 5, kind: output, shape index: {}]  }
   0x1   :  { %v29_v0 = vld [vmem:[%s11533_s0 + $0x10] sm:$0xff]  ;;  %v27_v1 = vld [vmem:[%s11533_s0] sm:$0xff]  ;;  %v30_v2 = vld [vmem:[%s11533_s0 + $0x18] sm:$0xff] }
   0x2   :  { %v162_v3 = vsel %vm155_vm0, %v29_v0, 0.0  ;;  %v156_v4 = vsel %vm155_vm0, %v27_v1, 0.0  ;;  %v28_v5 = vld [vmem:[%s11533_s0 + $0x8] sm:$0xff]  ;;  %v165_v6 = vsel %vm155_vm0, %v30_v2, 0.0  ;;  %v31_v9 = vld [vmem:[%s11533_s0 + $0x20] sm:$0xff]  ;;  %v34_v12 = vld [vmem:[%s11533_s0 + $0x38] sm:$0xff] }
   0x3   :  { %163 = vadd.xlane.f32.xlu1 %v162_v3  ;;  %157 = vadd.xlane.f32.xlu0 %v156_v4  ;;  %v159_v7 = vsel %vm155_vm0, %v28_v5, 0.0  ;;  %v32_v8 = vld [vmem:[%s11533_s0 + $0x28] sm:$0xff]  ;;  %v168_v11 = vsel %vm155_vm0, %v31_v9, 0.0  ;;  %v33_v13 = vld [vmem:[%s11533_s0 + $0x30] sm:$0xff]  ;;  %v177_v14 = vsel %vm155_vm0, %v34_v12, 0.0  ;;  %v35_v17 = vld [vmem:[%s11533_s0 + $0x40] sm:$0xff] }
   0x4   :  { %v171_v10 = vsel %vm155_vm0, %v32_v8, 0.0  ;;  %v174_v15 = vsel %vm155_vm0, %v33_v13, 0.0  ;;  %v36_v16 = vld [vmem:[%s11533_s0 + $0x48] sm:$0xff]  ;;  %v180_v19 = vsel %vm155_vm0, %v35_v17, 0.0  ;;  %v38_v20 = vld [vmem:[%s11533_s0 + $0x58] sm:$0xff]  ;;  %v37_v21 = vld [vmem:[%s11533_s0 + $0x50] sm:$0xff] }
   0x5   :  { %v183_v18 = vsel %vm155_vm0, %v36_v16, 0.0  ;;  %v189_v22 = vsel %vm155_vm0, %v38_v20, 0.0  ;;  %v186_v23 = vsel %vm155_vm0, %v37_v21, 0.0  ;;  %v40_v24 = vld [vmem:[%s11533_s0 + $0x68] sm:$0xff]  ;;  %v39_v25 = vld [vmem:[%s11533_s0 + $0x60] sm:$0xff]  ;;  %v42_v28 = vld [vmem:[%s11533_s0 + $0x78] sm:$0xff] }
   0x6   :  { %v195_v26 = vsel %vm155_vm0, %v40_v24, 0.0  ;;  %v192_v27 = vsel %vm155_vm0, %v39_v25, 0.0  ;;  %v41_v29 = vld [vmem:[%s11533_s0 + $0x70] sm:$0xff]  ;;  %v201_v30 = vsel %vm155_vm0, %v42_v28, 0.0 }
   0x7   :  { %166 = vadd.xlane.f32.xlu1 %v165_v6  ;;  %160 = vadd.xlane.f32.xlu0 %v159_v7  ;;  %v198_v31 = vsel %vm155_vm0, %v41_v29, 0.0 }
   0xb   :  { %172 = vadd.xlane.f32.xlu1 %v171_v10  ;;  %169 = vadd.xlane.f32.xlu0 %v168_v11 }
   0xf   :  { %178 = vadd.xlane.f32.xlu1 %v177_v14  ;;  %175 = vadd.xlane.f32.xlu0 %v174_v15 }
  0x13   :  { %184 = vadd.xlane.f32.xlu1 %v183_v18  ;;  %181 = vadd.xlane.f32.xlu0 %v180_v19 }
  0x17   :  { %190 = vadd.xlane.f32.xlu1 %v189_v22  ;;  %187 = vadd.xlane.f32.xlu0 %v186_v23 }
  0x1b   :  { %196 = vadd.xlane.f32.xlu1 %v195_v26  ;;  %193 = vadd.xlane.f32.xlu0 %v192_v27 }
  0x1c   :  { %10 = vsyncpa [#allocation4], 0  ;;  %v44_v32 = vld [vmem:[%s11533_s0 + $0x88] sm:$0xff]  ;;  %v43_v33 = vld [vmem:[%s11533_s0 + $0x80] sm:$0xff]  ;;  %vm6823_vm1 = vcmask 130112   ;;  %vm6830_vm2 = vcmask 195712  }
  0x1d   :  { %v207_v34 = vsel %vm155_vm0, %v44_v32, 0.0  ;;  %v204_v35 = vsel %vm155_vm0, %v43_v33, 0.0  ;;  %v46_v36 = vld [vmem:[%s11533_s0 + $0x98] sm:$0xff]  ;;  %v45_v37 = vld [vmem:[%s11533_s0 + $0x90] sm:$0xff]  ;;  %v48_v40 = vld [vmem:[%s11533_s0 + $0xa8] sm:$0xff]  ;;  %vm6837_vm3 = vcmask 261312  }
  0x1e   :  { %v213_v38 = vsel %vm155_vm0, %v46_v36, 0.0  ;;  %v210_v39 = vsel %vm155_vm0, %v45_v37, 0.0  ;;  %v47_v41 = vld [vmem:[%s11533_s0 + $0xa0] sm:$0xff]  ;;  %v219_v42 = vsel %vm155_vm0, %v48_v40, 0.0  ;;  %v50_v44 = vld [vmem:[%s11533_s0 + $0xb8] sm:$0xff]  ;;  %v49_v45 = vld [vmem:[%s11533_s0 + $0xb0] sm:$0xff] }
  0x1f   :  { %202 = vadd.xlane.f32.xlu1 %v201_v30  ;;  %199 = vadd.xlane.f32.xlu0 %v198_v31  ;;  %v216_v43 = vsel %vm155_vm0, %v47_v41, 0.0  ;;  %v225_v46 = vsel %vm155_vm0, %v50_v44, 0.0  ;;  %v222_v47 = vsel %vm155_vm0, %v49_v45, 0.0  ;;  %v52_v48 = vld [vmem:[%s11533_s0 + $0xc8] sm:$0xff]  ;;  %v51_v49 = vld [vmem:[%s11533_s0 + $0xc0] sm:$0xff]  ;;  %v54_v52 = vld [vmem:[%s11533_s0 + $0xd8] sm:$0xff] }
  0x20   :  { %v231_v50 = vsel %vm155_vm0, %v52_v48, 0.0  ;;  %v228_v51 = vsel %vm155_vm0, %v51_v49, 0.0  ;;  %v53_v53 = vld [vmem:[%s11533_s0 + $0xd0] sm:$0xff]  ;;  %v237_v54 = vsel %vm155_vm0, %v54_v52, 0.0  ;;  %v56_v56 = vld [vmem:[%s11533_s0 + $0xe8] sm:$0xff]  ;;  %v55_v57 = vld [vmem:[%s11533_s0 + $0xe0] sm:$0xff] }
  0x21   :  { %v234_v55 = vsel %vm155_vm0, %v53_v53, 0.0  ;;  %v243_v58 = vsel %vm155_vm0, %v56_v56, 0.0  ;;  %v240_v59 = vsel %vm155_vm0, %v55_v57, 0.0  ;;  %v58_v60 = vld [vmem:[%s11533_s0 + $0xf8] sm:$0xff]  ;;  %v57_v61 = vld [vmem:[%s11533_s0 + $0xf0] sm:$0xff]  ;;  %v60_v0 = vld [vmem:[%s11533_s0 + $0x108] sm:$0xff] }
  0x22   :  { %v249_v62 = vsel %vm155_vm0, %v58_v60, 0.0  ;;  %v246_v63 = vsel %vm155_vm0, %v57_v61, 0.0  ;;  %v59_v1 = vld [vmem:[%s11533_s0 + $0x100] sm:$0xff]  ;;  %v255_v2 = vsel %vm155_vm0, %v60_v0, 0.0  ;;  %v62_v4 = vld [vmem:[%s11533_s0 + $0x118] sm:$0xff]  ;;  %v61_v5 = vld [vmem:[%s11533_s0 + $0x110] sm:$0xff] }
  0x23   :  { %208 = vadd.xlane.f32.xlu1 %v207_v34  ;;  %205 = vadd.xlane.f32.xlu0 %v204_v35  ;;  %v252_v3 = vsel %vm155_vm0, %v59_v1, 0.0  ;;  %v261_v6 = vsel %vm155_vm0, %v62_v4, 0.0  ;;  %v258_v7 = vsel %vm155_vm0, %v61_v5, 0.0  ;;  %v64_v8 = vld [vmem:[%s11533_s0 + $0x128] sm:$0xff]  ;;  %v63_v9 = vld [vmem:[%s11533_s0 + $0x120] sm:$0xff]  ;;  %v66_v12 = vld [vmem:[%s11533_s0 + $0x138] sm:$0xff] }
  0x24   :  { %v267_v10 = vsel %vm155_vm0, %v64_v8, 0.0  ;;  %v264_v11 = vsel %vm155_vm0, %v63_v9, 0.0  ;;  %v65_v13 = vld [vmem:[%s11533_s0 + $0x130] sm:$0xff]  ;;  %v273_v14 = vsel %vm155_vm0, %v66_v12, 0.0  ;;  %v68_v16 = vld [vmem:[%s11533_s0 + $0x148] sm:$0xff]  ;;  %v67_v17 = vld [vmem:[%s11533_s0 + $0x140] sm:$0xff] }
  0x25   :  { %v270_v15 = vsel %vm155_vm0, %v65_v13, 0.0  ;;  %v279_v18 = vsel %vm155_vm0, %v68_v16, 0.0  ;;  %v276_v19 = vsel %vm155_vm0, %v67_v17, 0.0  ;;  %v70_v20 = vld [vmem:[%s11533_s0 + $0x158] sm:$0xff]  ;;  %v69_v21 = vld [vmem:[%s11533_s0 + $0x150] sm:$0xff]  ;;  %v72_v24 = vld [vmem:[%s11533_s0 + $0x168] sm:$0xff] }
  0x26   :  { %v285_v22 = vsel %vm155_vm0, %v70_v20, 0.0  ;;  %v282_v23 = vsel %vm155_vm0, %v69_v21, 0.0  ;;  %v71_v25 = vld [vmem:[%s11533_s0 + $0x160] sm:$0xff]  ;;  %v291_v26 = vsel %vm155_vm0, %v72_v24, 0.0  ;;  %v74_v28 = vld [vmem:[%s11533_s0 + $0x178] sm:$0xff]  ;;  %v73_v29 = vld [vmem:[%s11533_s0 + $0x170] sm:$0xff] }
  0x27   :  { %214 = vadd.xlane.f32.xlu1 %v213_v38  ;;  %211 = vadd.xlane.f32.xlu0 %v210_v39  ;;  %v288_v27 = vsel %vm155_vm0, %v71_v25, 0.0  ;;  %v297_v30 = vsel %vm155_vm0, %v74_v28, 0.0  ;;  %v294_v31 = vsel %vm155_vm0, %v73_v29, 0.0  ;;  %v76_v32 = vld [vmem:[%s11533_s0 + $0x188] sm:$0xff]  ;;  %v75_v33 = vld [vmem:[%s11533_s0 + $0x180] sm:$0xff]  ;;  %v78_v36 = vld [vmem:[%s11533_s0 + $0x198] sm:$0xff] }
  0x28   :  { %v303_v34 = vsel %vm155_vm0, %v76_v32, 0.0  ;;  %v300_v35 = vsel %vm155_vm0, %v75_v33, 0.0  ;;  %v77_v37 = vld [vmem:[%s11533_s0 + $0x190] sm:$0xff]  ;;  %v309_v38 = vsel %vm155_vm0, %v78_v36, 0.0  ;;  %v80_v40 = vld [vmem:[%s11533_s0 + $0x1a8] sm:$0xff]  ;;  %v79_v41 = vld [vmem:[%s11533_s0 + $0x1a0] sm:$0xff] }
  0x29   :  { %v306_v39 = vsel %vm155_vm0, %v77_v37, 0.0  ;;  %v82_v44 = vld [vmem:[%s11533_s0 + $0x1b8] sm:$0xff]  ;;  %v81_v45 = vld [vmem:[%s11533_s0 + $0x1b0] sm:$0xff]  ;;  %v84_v48 = vld [vmem:[%s11533_s0 + $0x1c8] sm:$0xff]  ;;  %vm6844_vm4 = vcmask 326912   ;;  %vm6851_vm5 = vcmask 392512  }
  0x2a   :  { %v83_v49 = vld [vmem:[%s11533_s0 + $0x1c0] sm:$0xff]  ;;  %v86_v52 = vld [vmem:[%s11533_s0 + $0x1d8] sm:$0xff]  ;;  %v85_v53 = vld [vmem:[%s11533_s0 + $0x1d0] sm:$0xff]  ;;  %vm6858_vm6 = vcmask 458112   ;;  %vm6865_vm7 = vcmask 523712   ;;  %vm6872_vm8 = vcmask 589312  }
  0x2b   :  { %220 = vadd.xlane.f32.xlu1 %v219_v42  ;;  %217 = vadd.xlane.f32.xlu0 %v216_v43  ;;  %v315_v42 = vsel %vm155_vm0, %v80_v40, 0.0  ;;  %v312_v43 = vsel %vm155_vm0, %v79_v41, 0.0  ;;  %v88_v56 = vld [vmem:[%s11533_s0 + $0x1e8] sm:$0xff]  ;;  %v87_v57 = vld [vmem:[%s11533_s0 + $0x1e0] sm:$0xff]  ;;  %v90_v60 = vld [vmem:[%s11533_s0 + $0x1f8] sm:$0xff]  ;;  %vm6879_vm9 = vcmask 654912  }
  0x2c   :  { %v89_v61 = vld [vmem:[%s11533_s0 + $0x1f0] sm:$0xff]  ;;  %v92_v0 = vld [vmem:[%s11533_s0 + $0x208] sm:$0xff]  ;;  %v91_v1 = vld [vmem:[%s11533_s0 + $0x200] sm:$0xff]  ;;  %vm6886_vm10 = vcmask 720512   ;;  %vm6893_vm11 = vcmask 786112   ;;  %vm6900_vm12 = vcmask 851712  }
  0x2d   :  { %v94_v4 = vld [vmem:[%s11533_s0 + $0x218] sm:$0xff]  ;;  %v93_v5 = vld [vmem:[%s11533_s0 + $0x210] sm:$0xff]  ;;  %v96_v8 = vld [vmem:[%s11533_s0 + $0x228] sm:$0xff]  ;;  %vm6907_vm13 = vcmask 917312   ;;  %vm6914_vm14 = vcmask 982912   ;;  %vm6921_vm15 = vcmask 1048512  }
  0x2e   :  { %v95_v9 = vld [vmem:[%s11533_s0 + $0x220] sm:$0xff]  ;;  %v98_v12 = vld [vmem:[%s11533_s0 + $0x238] sm:$0xff]  ;;  %v97_v13 = vld [vmem:[%s11533_s0 + $0x230] sm:$0xff]  ;;  %s8065_s14 = smov [#allocation3]  }
  0x2f   :  { %226 = vadd.xlane.f32.xlu1 %v225_v46  ;;  %223 = vadd.xlane.f32.xlu0 %v222_v47  ;;  %v321_v46 = vsel %vm155_vm0, %v82_v44, 0.0  ;;  %v318_v47 = vsel %vm155_vm0, %v81_v45, 0.0  ;;  %v100_v16 = vld [vmem:[%s11533_s0 + $0x248] sm:$0xff]  ;;  %v99_v17 = vld [vmem:[%s11533_s0 + $0x240] sm:$0xff]  ;;  %v101_v24 = vld [vmem:[%s11533_s0 + $0x250] sm:$0xff]  ;;  %s7835_s15 = sshll.u32 %s8065_s14, 4  ;;  %s7836_s15 = int_to_ptr.vmem [resolvable:$true] %s7835_s15 }
  0x30   :  { %v375_v20 = vsel %vm155_vm0, %v100_v16, 0.0  ;;  %v372_v21 = vsel %vm155_vm0, %v99_v17, 0.0  ;;  %v378_v28 = vsel %vm155_vm0, %v101_v24, 0.0  ;;  %v104_v29 = vld [vmem:[%s11533_s0 + $0x268] sm:$0xff]  ;;  %v105_v36 = vld [vmem:[%s11533_s0 + $0x270] sm:$0xff]  ;;  %p8037_p1 = scmp.lt.s32.totalorder %s7836_s15, %s7836_s15 }
  0x31   :  { %v387_v33 = vsel %vm155_vm0, %v104_v29, 0.0  ;;  %v390_v40 = vsel %vm155_vm0, %v105_v36, 0.0  ;;  %v108_v41 = vld [vmem:[%s11533_s0 + $0x288] sm:$0xff] }
  0x32   :  { %v399_v45 = vsel %vm155_vm0, %v108_v41, 0.0  ;;  %v128_v29 = vld [vmem:[%s11533_s0 + $0x328] sm:$0xff] }
  0x33   :  { %232 = vadd.xlane.f32.xlu1 %v231_v50  ;;  %229 = vadd.xlane.f32.xlu0 %v228_v51  ;;  %v327_v50 = vsel %vm155_vm0, %v84_v48, 0.0  ;;  %v324_v51 = vsel %vm155_vm0, %v83_v49, 0.0  ;;  %v109_v48 = vld [vmem:[%s11533_s0 + $0x290] sm:$0xff] }
  0x37   :  { %238 = vadd.xlane.f32.xlu1 %v237_v54  ;;  %235 = vadd.xlane.f32.xlu0 %v234_v55  ;;  %v333_v54 = vsel %vm155_vm0, %v86_v52, 0.0  ;;  %v330_v55 = vsel %vm155_vm0, %v85_v53, 0.0  ;;  %v402_v52 = vsel %vm155_vm0, %v109_v48, 0.0  ;;  %v112_v53 = vld [vmem:[%s11533_s0 + $0x2a8] sm:$0xff]  ;;  %v145_v48 = vld [vmem:[%s11533_s0 + $0x3b0] sm:$0xff] }
  0x3b   :  { %244 = vadd.xlane.f32.xlu1 %v243_v58  ;;  %241 = vadd.xlane.f32.xlu0 %v240_v59  ;;  %v339_v58 = vsel %vm155_vm0, %v88_v56, 0.0  ;;  %v336_v59 = vsel %vm155_vm0, %v87_v57, 0.0  ;;  %v411_v57 = vsel %vm155_vm0, %v112_v53, 0.0 }
  0x3f   :  { %250 = vadd.xlane.f32.xlu1 %v249_v62  ;;  %247 = vadd.xlane.f32.xlu0 %v246_v63  ;;  %v345_v62 = vsel %vm155_vm0, %v90_v60, 0.0  ;;  %v342_v63 = vsel %vm155_vm0, %v89_v61, 0.0  ;;  %v113_v60 = vld [vmem:[%s11533_s0 + $0x2b0] sm:$0xff] }
  0x43   :  { %256 = vadd.xlane.f32.xlu1 %v255_v2  ;;  %253 = vadd.xlane.f32.xlu0 %v252_v3  ;;  %v351_v2 = vsel %vm155_vm0, %v92_v0, 0.0  ;;  %v348_v3 = vsel %vm155_vm0, %v91_v1, 0.0  ;;  %v414_v0 = vsel %vm155_vm0, %v113_v60, 0.0  ;;  %v139_v1 = vld [vmem:[%s11533_s0 + $0x380] sm:$0xff] }
  0x47   :  { %262 = vadd.xlane.f32.xlu1 %v261_v6  ;;  %259 = vadd.xlane.f32.xlu0 %v258_v7  ;;  %v357_v6 = vsel %vm155_vm0, %v94_v4, 0.0  ;;  %v354_v7 = vsel %vm155_vm0, %v93_v5, 0.0  ;;  %v492_v5 = vsel %vm155_vm0, %v139_v1, 0.0  ;;  %v131_v1 = vld [vmem:[%s11533_s0 + $0x340] sm:$0xff] }
  0x4b   :  { %268 = vadd.xlane.f32.xlu1 %v267_v10  ;;  %265 = vadd.xlane.f32.xlu0 %v264_v11  ;;  %v363_v10 = vsel %vm155_vm0, %v96_v8, 0.0  ;;  %v360_v11 = vsel %vm155_vm0, %v95_v9, 0.0  ;;  %v140_v8 = vld [vmem:[%s11533_s0 + $0x388] sm:$0xff] }
  0x4f   :  { %274 = vadd.xlane.f32.xlu1 %v273_v14  ;;  %271 = vadd.xlane.f32.xlu0 %v270_v15  ;;  %v369_v14 = vsel %vm155_vm0, %v98_v12, 0.0  ;;  %v366_v15 = vsel %vm155_vm0, %v97_v13, 0.0  ;;  %v495_v12 = vsel %vm155_vm0, %v140_v8, 0.0  ;;  %v126_v13 = vld [vmem:[%s11533_s0 + $0x318] sm:$0xff] }
  0x50   :  { %v453_v17 = vsel %vm155_vm0, %v126_v13, 0.0 }
  0x53   :  { %280 = vadd.xlane.f32.xlu1 %v279_v18  ;;  %277 = vadd.xlane.f32.xlu0 %v276_v19 }
  0x57   :  { %286 = vadd.xlane.f32.xlu1 %v285_v22  ;;  %283 = vadd.xlane.f32.xlu0 %v282_v23  ;;  %v8056_v22 = vmov 0   ;;  %v102_v23 = vld [vmem:[%s11533_s0 + $0x258] sm:$0xff] }
  0x58   :  { %8031 = vset.pattern.permute.xlu1 %v8056_v22  ;;  %8030 = vset.pattern.permute.xlu0 %v8056_v22  ;;  %v142_v22 = vld [vmem:[%s11533_s0 + $0x398] sm:$0xff] }
  0x5b   :  { %292 = vadd.xlane.f32.xlu1 %v291_v26  ;;  %289 = vadd.xlane.f32.xlu0 %v288_v27  ;;  %v381_v27 = vsel %vm155_vm0, %v102_v23, 0.0 }
  0x5f   :  { %298 = vadd.xlane.f32.xlu1 %v297_v30  ;;  %295 = vadd.xlane.f32.xlu0 %v294_v31  ;;  %v103_v30 = vld [vmem:[%s11533_s0 + $0x260] sm:$0xff] }
  0x63   :  { %304 = vadd.xlane.f32.xlu1 %v303_v34  ;;  %301 = vadd.xlane.f32.xlu0 %v300_v35  ;;  %v384_v34 = vsel %vm155_vm0, %v103_v30, 0.0  ;;  %v106_v35 = vld [vmem:[%s11533_s0 + $0x278] sm:$0xff]  ;;  %v143_v30 = vld [vmem:[%s11533_s0 + $0x3a0] sm:$0xff] }
  0x64   :  { %v504_v36 = vsel %vm155_vm0, %v143_v30, 0.0  ;;  %v8058_v30 = vmov 842150450  }
  0x67   :  { %310 = vadd.xlane.f32.xlu1 %v309_v38  ;;  %307 = vadd.xlane.f32.xlu0 %v306_v39  ;;  %v393_v39 = vsel %vm155_vm0, %v106_v35, 0.0  ;;  %v459_v35 = vsel %vm155_vm0, %v128_v29, 0.0 }
  0x6b   :  { %316 = vadd.xlane.f32.xlu1 %v315_v42  ;;  %313 = vadd.xlane.f32.xlu0 %v312_v43  ;;  %v107_v42 = vld [vmem:[%s11533_s0 + $0x280] sm:$0xff] }
  0x6f   :  { %322 = vadd.xlane.f32.xlu1 %v321_v46  ;;  %319 = vadd.xlane.f32.xlu0 %v318_v47  ;;  %v396_v46 = vsel %vm155_vm0, %v107_v42, 0.0  ;;  %v110_v47 = vld [vmem:[%s11533_s0 + $0x298] sm:$0xff] }
  0x73   :  { %328 = vadd.xlane.f32.xlu1 %v327_v50  ;;  %325 = vadd.xlane.f32.xlu0 %v324_v51  ;;  %v405_v51 = vsel %vm155_vm0, %v110_v47, 0.0  ;;  %v114_v47 = vld [vmem:[%s11533_s0 + $0x2b8] sm:$0xff] }
  0x74   :  { %v417_v53 = vsel %vm155_vm0, %v114_v47, 0.0  ;;  %v117_v47 = vld [vmem:[%s11533_s0 + $0x2d0] sm:$0xff] }
  0x77   :  { %334 = vadd.xlane.f32.xlu1 %v333_v54  ;;  %331 = vadd.xlane.f32.xlu0 %v330_v55  ;;  %v111_v54 = vld [vmem:[%s11533_s0 + $0x2a0] sm:$0xff] }
  0x7b   :  { %340 = vadd.xlane.f32.xlu1 %v339_v58  ;;  %337 = vadd.xlane.f32.xlu0 %v336_v59  ;;  %v408_v58 = vsel %vm155_vm0, %v111_v54, 0.0  ;;  %v123_v59 = vld [vmem:[%s11533_s0 + $0x300] sm:$0xff]  ;;  %v510_v54 = vsel %vm155_vm0, %v145_v48, 0.0  ;;  %v8059_v48 = vmov 1414812756  }
  0x7f   :  { %346 = vadd.xlane.f32.xlu1 %v345_v62  ;;  %343 = vadd.xlane.f32.xlu0 %v342_v63  ;;  %v444_v63 = vsel %vm155_vm0, %v123_v59, 0.0 }
  0x83   :  { %352 = vadd.xlane.f32.xlu1 %v351_v2  ;;  %349 = vadd.xlane.f32.xlu0 %v348_v3  ;;  %v124_v2 = vld [vmem:[%s11533_s0 + $0x308] sm:$0xff] }
  0x87   :  { %358 = vadd.xlane.f32.xlu1 %v357_v6  ;;  %355 = vadd.xlane.f32.xlu0 %v354_v7  ;;  %v447_v6 = vsel %vm155_vm0, %v124_v2, 0.0  ;;  %v125_v7 = vld [vmem:[%s11533_s0 + $0x310] sm:$0xff]  ;;  %v115_v2 = vld [vmem:[%s11533_s0 + $0x2c0] sm:$0xff] }
  0x88   :  { %v420_v8 = vsel %vm155_vm0, %v115_v2, 0.0 }
  0x8b   :  { %364 = vadd.xlane.f32.xlu1 %v363_v10  ;;  %361 = vadd.xlane.f32.xlu0 %v360_v11  ;;  %v450_v11 = vsel %vm155_vm0, %v125_v7, 0.0  ;;  %v468_v7 = vsel %vm155_vm0, %v131_v1, 0.0 }
  0x8f   :  { %370 = vadd.xlane.f32.xlu1 %v369_v14  ;;  %367 = vadd.xlane.f32.xlu0 %v366_v15  ;;  %v141_v14 = vld [vmem:[%s11533_s0 + $0x390] sm:$0xff] }
  0x90   :  { %v8390_v18 = vpop.xlane.xlu1 %163  ;;  %v8392_v19 = vpop.xlane.xlu0 %157 }
  0x93   :  { %376 = vadd.xlane.f32.xlu1 %v375_v20  ;;  %373 = vadd.xlane.f32.xlu0 %v372_v21  ;;  %v498_v20 = vsel %vm155_vm0, %v141_v14, 0.0  ;;  %v127_v21 = vld [vmem:[%s11533_s0 + $0x320] sm:$0xff] }
  0x94   :  { %v8402_v25 = vpop.xlane.xlu1 %166  ;;  %v8404_v26 = vpop.xlane.xlu0 %160 }
  0x97   :  { %382 = vadd.xlane.f32.xlu1 %v381_v27  ;;  %379 = vadd.xlane.f32.xlu0 %v378_v28  ;;  %v456_v27 = vsel %vm155_vm0, %v127_v21, 0.0  ;;  %v501_v28 = vsel %vm155_vm0, %v142_v22, 0.0  ;;  %v148_v21 = vld [vmem:[%s11533_s0 + $0x3c8] sm:$0xff] }
  0x98   :  { %v8414_v31 = vpop.xlane.xlu1 %172  ;;  %v8416_v32 = vpop.xlane.xlu0 %169  ;;  %v132_v22 = vld [vmem:[%s11533_s0 + $0x348] sm:$0xff] }
  0x9b   :  { %388 = vadd.xlane.f32.xlu1 %v387_v33  ;;  %385 = vadd.xlane.f32.xlu0 %v384_v34 }
  0x9c   :  { %v8426_v37 = vpop.xlane.xlu1 %178  ;;  %v8428_v38 = vpop.xlane.xlu0 %175 }
  0x9f   :  { %394 = vadd.xlane.f32.xlu1 %v393_v39  ;;  %391 = vadd.xlane.f32.xlu0 %v390_v40  ;;  %v129_v39 = vld [vmem:[%s11533_s0 + $0x330] sm:$0xff]  ;;  %v144_v40 = vld [vmem:[%s11533_s0 + $0x3a8] sm:$0xff] }
  0xa0   :  { %v8438_v43 = vpop.xlane.xlu1 %184  ;;  %v8440_v44 = vpop.xlane.xlu0 %181 }
  0xa3   :  { %400 = vadd.xlane.f32.xlu1 %v399_v45  ;;  %397 = vadd.xlane.f32.xlu0 %v396_v46  ;;  %v462_v45 = vsel %vm155_vm0, %v129_v39, 0.0  ;;  %v507_v46 = vsel %vm155_vm0, %v144_v40, 0.0  ;;  %v519_v40 = vsel %vm155_vm0, %v148_v21, 0.0 }
  0xa4   :  { %v8450_v49 = vpop.xlane.xlu1 %190  ;;  %v8452_v50 = vpop.xlane.xlu0 %187 }
  0xa7   :  { %406 = vadd.xlane.f32.xlu1 %v405_v51  ;;  %403 = vadd.xlane.f32.xlu0 %v402_v52 }
  0xa8   :  { %v8462_v55 = vpop.xlane.xlu1 %196  ;;  %v8464_v56 = vpop.xlane.xlu0 %193 }
  0xab   :  { %412 = vadd.xlane.f32.xlu1 %v411_v57  ;;  %409 = vadd.xlane.f32.xlu0 %v408_v58  ;;  %v146_v57 = vld [vmem:[%s11533_s0 + $0x3b8] sm:$0xff] }
  0xac   :  { %v8474_v61 = vpop.xlane.xlu1 %202  ;;  %v8476_v62 = vpop.xlane.xlu0 %199  ;;  %v130_v58 = vld [vmem:[%s11533_s0 + $0x338] sm:$0xff] }
  0xaf   :  { %445 = vadd.xlane.f32.xlu1 %v444_v63  ;;  %415 = vadd.xlane.f32.xlu0 %v414_v0  ;;  %v513_v63 = vsel %vm155_vm0, %v146_v57, 0.0  ;;  %v465_v0 = vsel %vm155_vm0, %v130_v58, 0.0 }
  0xb0   :  { %v8486_v3 = vpop.xlane.xlu1 %208  ;;  %v8488_v4 = vpop.xlane.xlu0 %205 }
  0xb3   :  { %493 = vadd.xlane.f32.xlu1 %v492_v5  ;;  %448 = vadd.xlane.f32.xlu0 %v447_v6 }
  0xb4   :  { %v8498_v9 = vpop.xlane.xlu1 %214  ;;  %v8500_v10 = vpop.xlane.xlu0 %211 }
  0xb7   :  { %451 = vadd.xlane.f32.xlu1 %v450_v11  ;;  %496 = vadd.xlane.f32.xlu0 %v495_v12  ;;  %v116_v11 = vld [vmem:[%s11533_s0 + $0x2c8] sm:$0xff]  ;;  %v147_v12 = vld [vmem:[%s11533_s0 + $0x3c0] sm:$0xff] }
  0xb8   :  { %v8510_v15 = vpop.xlane.xlu1 %220  ;;  %v8512_v16 = vpop.xlane.xlu0 %217 }
  0xbb   :  { %454 = vadd.xlane.f32.xlu1 %v453_v17  ;;  %499 = vadd.xlane.f32.xlu0 %v498_v20  ;;  %v423_v17 = vsel %vm155_vm0, %v116_v11, 0.0  ;;  %v516_v20 = vsel %vm155_vm0, %v147_v12, 0.0  ;;  %v118_v11 = vld [vmem:[%s11533_s0 + $0x2d8] sm:$0xff]  ;;  %v149_v12 = vld [vmem:[%s11533_s0 + $0x3d0] sm:$0xff] }
  0xbc   :  { %v8522_v23 = vpop.xlane.xlu1 %226  ;;  %v8524_v24 = vpop.xlane.xlu0 %223 }
  0xbd   :  { %11615 = vst [vmem:[#allocation6_spill] sm:$0xff] %v8522_v23  ;;  %11616 = vst [vmem:[#allocation7_spill] sm:$0xff] %v8524_v24 }
  0xbf   :  { %457 = vadd.xlane.f32.xlu1 %v456_v27  ;;  %502 = vadd.xlane.f32.xlu0 %v501_v28  ;;  %v11539_v27 = vlaneseq  ;;  %v8057_v28 = vmov 269488144  }
  0xc0   :  { %v8534_v33 = vpop.xlane.xlu1 %232  ;;  %v8536_v34 = vpop.xlane.xlu0 %229  ;;  %v669_v29 = vunpack.c.l.s4 %v8057_v28 }
  0xc1   :  { %11617 = vst [vmem:[#allocation8_spill] sm:$0xff] %v8534_v33  ;;  %11618 = vst [vmem:[#allocation9_spill] sm:$0xff] %v8536_v34 }
  0xc2   :  { %v670_v58 = vunpack.c.0.s8 %v669_v29 }
  0xc3   :  { %460 = vadd.xlane.f32.xlu1 %v459_v35  ;;  %505 = vadd.xlane.f32.xlu0 %v504_v36  ;;  %v676_v35 = vunpack.c.l.s4 %v8058_v30 }
  0xc4   :  { %v8546_v41 = vpop.xlane.xlu1 %238  ;;  %v8548_v42 = vpop.xlane.xlu0 %235 }
  0xc5   :  { %11619 = vst [vmem:[#allocation10_spill] sm:$0xff] %v8546_v41  ;;  %11620 = vst [vmem:[#allocation11_spill] sm:$0xff] %v8548_v42 }
  0xc7   :  { %463 = vadd.xlane.f32.xlu1 %v462_v45  ;;  %508 = vadd.xlane.f32.xlu0 %v507_v46  ;;  %v471_v45 = vsel %vm155_vm0, %v132_v22, 0.0  ;;  %v133_v46 = vld [vmem:[%s11533_s0 + $0x350] sm:$0xff] }
  0xc8   :  { %v8558_v51 = vpop.xlane.xlu1 %244  ;;  %v8560_v52 = vpop.xlane.xlu0 %241 }
  0xc9   :  { %11621 = vst [vmem:[#allocation12_spill] sm:$0xff] %v8558_v51  ;;  %11622 = vst [vmem:[#allocation13_spill] sm:$0xff] %v8560_v52 }
  0xcb   :  { %418 = vadd.xlane.f32.xlu1 %v417_v53  ;;  %511 = vadd.xlane.f32.xlu0 %v510_v54  ;;  %v683_v53 = vunpack.c.l.s4 %v8059_v48  ;;  %v8060_v54 = vmov 1987475062  }
  0xcc   :  { %v8570_v59 = vpop.xlane.xlu1 %250  ;;  %v8572_v60 = vpop.xlane.xlu0 %247  ;;  %v690_v57 = vunpack.c.l.s4 %v8060_v54 }
  0xcd   :  { %11623 = vst [vmem:[#allocation14_spill] sm:$0xff] %v8570_v59  ;;  %11624 = vst [vmem:[#allocation15_spill] sm:$0xff] %v8572_v60  ;;  %v684_v21 = vunpack.c.0.s8 %v683_v53 }
  0xce   :  { %v691_v22 = vunpack.c.0.s8 %v690_v57  ;;  %v135_v57 = vld [vmem:[%s11533_s0 + $0x360] sm:$0xff] }
  0xcf   :  { %514 = vadd.xlane.f32.xlu1 %v513_v63  ;;  %466 = vadd.xlane.f32.xlu0 %v465_v0  ;;  %v8619_v63 = vshrl.u32 %v11539_v27, 7  ;;  %v677_v0 = vunpack.c.0.s8 %v676_v35 }
  0xd0   :  { %v8582_v5 = vpop.xlane.xlu1 %256  ;;  %v8584_v6 = vpop.xlane.xlu0 %253 }
  0xd1   :  { %11629 = vst [vmem:[#allocation20_spill] sm:$0xff] %v8619_v63  ;;  %v8634_v28 = vsub.s32 %v670_v58, %v8619_v63  ;;  %v8637_v29 = vsub.s32 %v677_v0, %v8619_v63  ;;  %v8652_v53 = vsub.s32 %v684_v21, %v8619_v63  ;;  %v8655_v54 = vsub.s32 %v691_v22, %v8619_v63 }
  0xd3   :  { %469 = vadd.xlane.f32.xlu1 %v468_v7  ;;  %421 = vadd.xlane.f32.xlu0 %v420_v8  ;;  %v474_v7 = vsel %vm155_vm0, %v133_v46, 0.0  ;;  %v426_v8 = vsel %vm155_vm0, %v117_v47, 0.0  ;;  %11632 = vst [vmem:[#allocation23_spill] sm:$0xff] %v8634_v28  ;;  %11633 = vst [vmem:[#allocation24_spill] sm:$0xff] %v8637_v29  ;;  %v150_v46 = vld [vmem:[%s11533_s0 + $0x3d8] sm:$0xff]  ;;  %v674_v58 = vrot.slane %v8392_v19, %v8634_v28 }
  0xd4   :  { %v8594_v13 = vpop.xlane.xlu1 %262  ;;  %v8596_v14 = vpop.xlane.xlu0 %259  ;;  %v134_v47 = vld [vmem:[%s11533_s0 + $0x358] sm:$0xff]  ;;  %11636 = vst [vmem:[#allocation27_spill] sm:$0xff] %v8652_v53  ;;  %v681_v0 = vrot.slane %v8392_v19, %v8637_v29  ;;  %v730_v22 = vrot.slane %v8390_v18, %v8634_v28  ;;  %v926_v34 = vrot.slane %v8438_v43, %v8634_v28 }
  0xd5   :  { %11625 = vst [vmem:[#allocation16_spill] sm:$0xff] %v8594_v13  ;;  %11626 = vst [vmem:[#allocation17_spill] sm:$0xff] %v8596_v14 }
  0xd7   :  { %424 = vadd.xlane.f32.xlu1 %v423_v17  ;;  %517 = vadd.xlane.f32.xlu0 %v516_v20  ;;  %v8061_v17 = vmov 1983009808  }
  0xd8   :  { %v8606_v36 = vpop.xlane.xlu1 %268  ;;  %v8608_v39 = vpop.xlane.xlu0 %265  ;;  %v4255_v20 = vunpack.c.l.s4 %v8061_v17  ;;  %v119_v17 = vld [vmem:[%s11533_s0 + $0x2e0] sm:$0xff] }
  0xd9   :  { %11627 = vst [vmem:[#allocation18_spill] sm:$0xff] %v8606_v36  ;;  %11628 = vst [vmem:[#allocation19_spill] sm:$0xff] %v8608_v39  ;;  %v432_v27 = vsel %vm155_vm0, %v119_v17, 0.0  ;;  %v152_v17 = vld [vmem:[%s11533_s0 + $0x3e8] sm:$0xff] }
  0xda   :  { %v4256_v48 = vunpack.c.0.s8 %v4255_v20  ;;  %v480_v20 = vsel %vm155_vm0, %v135_v57, 0.0  ;;  %v751_v57 = vrot.slane %v8390_v18, %v8655_v54  ;;  %v531_v14 = vsel %vm155_vm0, %v152_v17, 0.0 }
  0xdb   :  { %520 = vadd.xlane.f32.xlu1 %v519_v40  ;;  %472 = vadd.xlane.f32.xlu0 %v471_v45  ;;  %v429_v40 = vsel %vm155_vm0, %v118_v11, 0.0  ;;  %v522_v45 = vsel %vm155_vm0, %v149_v12, 0.0  ;;  %v525_v11 = vsel %vm155_vm0, %v150_v46, 0.0  ;;  %v477_v12 = vsel %vm155_vm0, %v134_v47, 0.0 }
  0xdc   :  { %v8621_v1 = vpop.xlane.xlu1 %274  ;;  %v8623_v2 = vpop.xlane.xlu0 %271  ;;  %v8675_v21 = vsub.s32 %v4256_v48, %v8619_v63  ;;  %v695_v46 = vrot.slane %v8392_v19, %v8655_v54  ;;  %v744_v47 = vrot.slane %v8390_v18, %v8652_v53  ;;  %v8689_v48 = vcombine.low %v674_v58, %v681_v0  ;;  %v120_v63 = vld [vmem:[%s11533_s0 + $0x2e8] sm:$0xff] }
  0xdd   :  { %11630 = vst [vmem:[#allocation21_spill] sm:$0xff] %v8621_v1  ;;  %11631 = vst [vmem:[#allocation22_spill] sm:$0xff] %v8623_v2  ;;  %v716_v58 = vrot.slane %v8404_v26, %v8652_v53  ;;  %v723_v0 = vrot.slane %v8404_v26, %v8655_v54  ;;  %v121_v2 = vld [vmem:[%s11533_s0 + $0x2f0] sm:$0xff]  ;;  %v435_v39 = vsel %vm155_vm0, %v120_v63, 0.0  ;;  %v849_v17 = vrot.slane %v8428_v38, %v8637_v29 }
  0xde   :  { %v438_v63 = vsel %vm155_vm0, %v121_v2, 0.0  ;;  %v828_v2 = vrot.slane %v8414_v31, %v8652_v53 }
  0xdf   :  { %475 = vadd.xlane.f32.xlu1 %v474_v7  ;;  %427 = vadd.xlane.f32.xlu0 %v426_v8  ;;  %v4270_v52 = vcombine.low %v716_v58, %v723_v0  ;;  %v877_v0 = vrot.slane %v8426_v37, %v8637_v29 }
  0xe0   :  { %v8639_v30 = vpop.xlane.xlu1 %280  ;;  %v8641_v35 = vpop.xlane.xlu0 %277 }
  0xe1   :  { %11634 = vst [vmem:[#allocation25_spill] sm:$0xff] %v8639_v30  ;;  %11635 = vst [vmem:[#allocation26_spill] sm:$0xff] %v8641_v35  ;;  %v137_v35 = vld [vmem:[%s11533_s0 + $0x370] sm:$0xff]  ;;  %v758_v30 = vrot.slane %v8402_v25, %v8634_v28 }
  0xe2   :  { %v486_v60 = vsel %vm155_vm0, %v137_v35, 0.0  ;;  %v4260_v35 = vrot.slane %v8689_v48, %v8675_v21  ;;  %v800_v48 = vrot.slane %v8416_v32, %v8652_v53 }
  0xe3   :  { %430 = vadd.xlane.f32.xlu1 %v429_v40  ;;  %523 = vadd.xlane.f32.xlu0 %v522_v45  ;;  %v737_v40 = vrot.slane %v8390_v18, %v8637_v29  ;;  %v688_v45 = vrot.slane %v8392_v19, %v8652_v53  ;;  %v151_v19 = vld [vmem:[%s11533_s0 + $0x3e0] sm:$0xff]  ;;  %v709_v18 = vrot.slane %v8404_v26, %v8637_v29 }
  0xe4   :  { %v8664_v7 = vpop.xlane.xlu1 %286  ;;  %v8666_v8 = vpop.xlane.xlu0 %283  ;;  %v528_v36 = vsel %vm155_vm0, %v151_v19, 0.0  ;;  %v807_v19 = vrot.slane %v8416_v32, %v8655_v54 }
  0xe5   :  { %11637 = vst [vmem:[#allocation28_spill] sm:$0xff] %v8664_v7  ;;  %11638 = vst [vmem:[#allocation29_spill] sm:$0xff] %v8666_v8  ;;  %v702_v8 = vrot.slane %v8404_v26, %v8634_v28  ;;  %v136_v7 = vld [vmem:[%s11533_s0 + $0x368] sm:$0xff]  ;;  %v765_v26 = vrot.slane %v8402_v25, %v8637_v29  ;;  %v4253_v1 = vcombine.low %v688_v45, %v695_v46 }
  0xe6   :  { %v483_v13 = vsel %vm155_vm0, %v136_v7, 0.0  ;;  %v8735_v59 = vcombine.low %v730_v22, %v737_v40  ;;  %v821_v22 = vrot.slane %v8414_v31, %v8637_v29  ;;  %v786_v46 = vrot.slane %v8416_v32, %v8634_v28 }
  0xe7   :  { %526 = vadd.xlane.f32.xlu1 %v525_v11  ;;  %478 = vadd.xlane.f32.xlu0 %v477_v12  ;;  %v8747_v45 = vcombine.low %v758_v30, %v765_v26  ;;  %v4267_v40 = vrot.slane %v4253_v1, %v8675_v21  ;;  %v835_v30 = vrot.slane %v8414_v31, %v8655_v54 }
  0xe8   :  { %v8706_v11 = vpop.xlane.xlu1 %292  ;;  %v8708_v12 = vpop.xlane.xlu0 %289  ;;  %v863_v26 = vrot.slane %v8428_v38, %v8655_v54  ;;  %v8805_v41 = vcombine.low %v800_v48, %v807_v19 }
  0xe9   :  { %11639 = vst [vmem:[#allocation30_spill] sm:$0xff] %v8706_v11  ;;  %11640 = vst [vmem:[#allocation31_spill] sm:$0xff] %v8708_v12  ;;  %v772_v12 = vrot.slane %v8402_v25, %v8652_v53  ;;  %v779_v11 = vrot.slane %v8402_v25, %v8655_v54  ;;  %v4269_v25 = vcombine.low %v702_v8, %v709_v18 }
  0xea   :  { %v814_v8 = vrot.slane %v8414_v31, %v8634_v28  ;;  %v153_v31 = vld [vmem:[%s11533_s0 + $0x3f0] sm:$0xff]  ;;  %v4311_v19 = vrot.slane %v8747_v45, %v8675_v21  ;;  %v912_v45 = vrot.slane %v8440_v44, %v8652_v53 }
  0xeb   :  { %481 = vadd.xlane.f32.xlu1 %v480_v20  ;;  %433 = vadd.xlane.f32.xlu0 %v432_v27  ;;  %v122_v27 = vld [vmem:[%s11533_s0 + $0x2f8] sm:$0xff]  ;;  %v8745_v20 = vcombine.low %v744_v47, %v751_v57  ;;  %v8749_v7 = vcombine.low %v772_v12, %v779_v11  ;;  %v793_v47 = vrot.slane %v8416_v32, %v8637_v29 }
  0xec   :  { %v8737_v51 = vpop.xlane.xlu1 %298  ;;  %v8739_v42 = vpop.xlane.xlu0 %295  ;;  %v441_v57 = vsel %vm155_vm0, %v122_v27, 0.0  ;;  %v4277_v58 = vrot.slane %v4269_v25, %v8675_v21  ;;  %v884_v32 = vrot.slane %v8426_v37, %v8652_v53  ;;  %v891_v11 = vrot.slane %v8426_v37, %v8655_v54 }
  0xed   :  { %11641 = vst [vmem:[#allocation32_spill] sm:$0xff] %v8737_v51  ;;  %11642 = vst [vmem:[#allocation33_spill] sm:$0xff] %v8739_v42  ;;  %v842_v12 = vrot.slane %v8428_v38, %v8634_v28  ;;  %v8796_v25 = vcombine.low %v814_v8, %v821_v22  ;;  %v8798_v27 = vcombine.low %v828_v2, %v835_v30 }
  0xee   :  { %v4294_v42 = vrot.slane %v8735_v59, %v8675_v21  ;;  %v8803_v51 = vcombine.low %v786_v46, %v793_v47  ;;  %v8820_v59 = vcombine.low %v884_v32, %v891_v11  ;;  %v8824_v30 = vcombine.low %v4260_v35, %v4267_v40 }
  0xef   :  { %436 = vadd.xlane.f32.xlu1 %v435_v39  ;;  %529 = vadd.xlane.f32.xlu0 %v528_v36  ;;  %v4284_v36 = vrot.slane %v4270_v52, %v8675_v21  ;;  %v870_v39 = vrot.slane %v8426_v37, %v8634_v28  ;;  %v856_v52 = vrot.slane %v8428_v38, %v8652_v53  ;;  %v534_v37 = vsel %vm155_vm0, %v153_v31, 0.0 }
  0xf0   :  { %v8771_v1 = vpop.xlane.xlu1 %304  ;;  %v8773_v18 = vpop.xlane.xlu0 %301  ;;  %v933_v38 = vrot.slane %v8438_v43, %v8637_v29  ;;  %v8826_v46 = vcombine.low %v842_v12, %v849_v17  ;;  %v4301_v48 = vrot.slane %v8745_v20, %v8675_v21  ;;  %v940_v31 = vrot.slane %v8438_v43, %v8652_v53 }
  0xf1   :  { %11643 = vst [vmem:[#allocation34_spill] sm:$0xff] %v8771_v1  ;;  %v8822_v2 = vcombine.low %v4277_v58, %v4284_v36  ;;  %v8828_v47 = vcombine.low %v856_v52, %v863_v26  ;;  %v898_v35 = vrot.slane %v8440_v44, %v8634_v28  ;;  %v905_v20 = vrot.slane %v8440_v44, %v8637_v29 }
  0xf2   :  { %v8841_v58 = vcombine.low %v926_v34, %v933_v38  ;;  %v919_v36 = vrot.slane %v8440_v44, %v8655_v54  ;;  %v982_v34 = vrot.slane %v8450_v49, %v8634_v28  ;;  %v4318_v32 = vrot.slane %v8749_v7, %v8675_v21 }
  0xf3   :  { %532 = vadd.xlane.f32.xlu1 %v531_v14  ;;  %484 = vadd.xlane.f32.xlu0 %v483_v13  ;;  %v154_v13 = vld [vmem:[%s11533_s0 + $0x3f8] sm:$0xff]  ;;  %v8818_v14 = vcombine.low %v870_v39, %v877_v0  ;;  %v947_v39 = vrot.slane %v8438_v43, %v8655_v54  ;;  %v4328_v44 = vrot.slane %v8803_v51, %v8675_v21 }
  0xf4   :  { %v8811_v8 = vpop.xlane.xlu1 %310  ;;  %v8813_v22 = vpop.xlane.xlu0 %307  ;;  %v537_v40 = vsel %vm155_vm0, %v154_v13, 0.0  ;;  %11646 = vst [vmem:[#allocation37_spill] sm:$0xff] %v8841_v58  ;;  %v996_v11 = vrot.slane %v8450_v49, %v8652_v53  ;;  %v1003_v12 = vrot.slane %v8450_v49, %v8655_v54  ;;  %v954_v17 = vrot.slane %v8452_v50, %v8634_v28 }
  0xf5   :  { %11644 = vst [vmem:[#allocation35_spill] sm:$0xff] %v8811_v8  ;;  %11645 = vst [vmem:[#allocation36_spill] sm:$0xff] %v8813_v22  ;;  %v961_v52 = vrot.slane %v8452_v50, %v8637_v29  ;;  %v968_v26 = vrot.slane %v8452_v50, %v8652_v53  ;;  %v975_v7 = vrot.slane %v8452_v50, %v8655_v54 }
  0xf6   :  { %v4335_v38 = vrot.slane %v8805_v41, %v8675_v21  ;;  %v1045_v13 = vrot.slane %v8462_v55, %v8637_v29  ;;  %v1052_v58 = vrot.slane %v8462_v55, %v8652_v53  ;;  %v1017_v41 = vrot.slane %v8464_v56, %v8637_v29 }
  0xf7   :  { %487 = vadd.xlane.f32.xlu1 %v486_v60  ;;  %439 = vadd.xlane.f32.xlu0 %v438_v63  ;;  %v138_v60 = vld [vmem:[%s11533_s0 + $0x378] sm:$0xff]  ;;  %v989_v63 = vrot.slane %v8450_v49, %v8637_v29  ;;  %v1038_v49 = vrot.slane %v8462_v55, %v8634_v28  ;;  %v8899_v8 = vcombine.low %v940_v31, %v947_v39 }
  0xf8   :  { %v8849_v0 = vpop.xlane.xlu1 %316  ;;  %v8851_v43 = vpop.xlane.xlu0 %313  ;;  %v489_v51 = vsel %vm155_vm0, %v138_v60, 0.0  ;;  %v1024_v60 = vrot.slane %v8464_v56, %v8652_v53  ;;  %v8901_v22 = vcombine.low %v898_v35, %v905_v20  ;;  %v8909_v33 = vcombine.low %v996_v11, %v1003_v12 }
  0xf9   :  { %11647 = vst [vmem:[#allocation38_spill] sm:$0xff] %v8849_v0  ;;  %11648 = vst [vmem:[#allocation39_spill] sm:$0xff] %v8851_v43  ;;  %v1059_v0 = vrot.slane %v8462_v55, %v8655_v54  ;;  %v1031_v43 = vrot.slane %v8464_v56, %v8655_v54  ;;  %v8903_v55 = vcombine.low %v912_v45, %v919_v36 }
  0xfa   :  { %11651 = vst [vmem:[#allocation42_spill] sm:$0xff] %v8899_v8  ;;  %11652 = vst [vmem:[#allocation43_spill] sm:$0xff] %v8901_v22  ;;  %v8911_v24 = vcombine.low %v4311_v19, %v4318_v32  ;;  %v8913_v23 = vcombine.low %v954_v17, %v961_v52  ;;  %v8915_v1 = vcombine.low %v968_v26, %v975_v7 }
  0xfb   :  { %442 = vadd.xlane.f32.xlu1 %v441_v57  ;;  %535 = vadd.xlane.f32.xlu0 %v534_v37  ;;  %v1010_v37 = vrot.slane %v8464_v56, %v8634_v28  ;;  %11653 = vst [vmem:[#allocation44_spill] sm:$0xff] %v8903_v55  ;;  %11655 = vst [vmem:[#allocation46_spill] sm:$0xff] %v8909_v33  ;;  %v8917_v56 = vcombine.low %v1038_v49, %v1045_v13 }
  0xfc   :  { %v8887_v50 = vpop.xlane.xlu1 %322  ;;  %v8889_v57 = vpop.xlane.xlu0 %319  ;;  %11656 = vst [vmem:[#allocation47_spill] sm:$0xff] %v8913_v23  ;;  %11657 = vst [vmem:[#allocation48_spill] sm:$0xff] %v8915_v1  ;;  %v8931_v19 = vcombine.low %v4328_v44, %v4335_v38  ;;  %v1094_v20 = vrot.slane %v8474_v61, %v8634_v28  ;;  %v1101_v45 = vrot.slane %v8474_v61, %v8637_v29 }
  0xfd   :  { %11649 = vst [vmem:[#allocation40_spill] sm:$0xff] %v8887_v50  ;;  %11650 = vst [vmem:[#allocation41_spill] sm:$0xff] %v8889_v57  ;;  %v8905_v50 = vcombine.low %v4294_v42, %v4301_v48  ;;  %v8907_v57 = vcombine.low %v982_v34, %v989_v63  ;;  %v4345_v42 = vrot.slane %v8796_v25, %v8675_v21 }
  0xfe   :  { %11658 = vst [vmem:[#allocation49_spill] sm:$0xff] %v8917_v56  ;;  %v8925_v48 = vcombine.low %v1052_v58, %v1059_v0  ;;  %v8927_v35 = vcombine.low %v1010_v37, %v1017_v41  ;;  %v4352_v36 = vrot.slane %v8798_v27, %v8675_v21  ;;  %v4362_v25 = vrot.slane %v8826_v46, %v8675_v21 }
  0xff   :  { %11654 = vst [vmem:[#allocation45_spill] sm:$0xff] %v8907_v57  ;;  %538 = vadd.xlane.f32.xlu1 %v537_v40  ;;  %490 = vadd.xlane.f32.xlu0 %v489_v51  ;;  %v8929_v40 = vcombine.low %v1024_v60, %v1031_v43  ;;  %v1108_v58 = vrot.slane %v8474_v61, %v8652_v53 }
 0x100   :  { %v8919_v31 = vpop.xlane.xlu1 %328  ;;  %v8921_v39 = vpop.xlane.xlu0 %325  ;;  %11661 = vst [vmem:[#allocation52_spill] sm:$0xff] %v8925_v48  ;;  %11662 = vst [vmem:[#allocation53_spill] sm:$0xff] %v8927_v35  ;;  %v1115_v0 = vrot.slane %v8474_v61, %v8655_v54  ;;  %v1122_v43 = vrot.slane %v8488_v4, %v8634_v28  ;;  %v1129_v34 = vrot.slane %v8488_v4, %v8637_v29 }
 0x101   :  { %11659 = vst [vmem:[#allocation50_spill] sm:$0xff] %v8919_v31  ;;  %11660 = vst [vmem:[#allocation51_spill] sm:$0xff] %v8921_v39  ;;  %v1066_v63 = vrot.slane %v8476_v62, %v8634_v28  ;;  %v1073_v27 = vrot.slane %v8476_v62, %v8637_v29  ;;  %v1080_v46 = vrot.slane %v8476_v62, %v8652_v53 }
 0x102   :  { %11663 = vst [vmem:[#allocation54_spill] sm:$0xff] %v8929_v40  ;;  %v1087_v32 = vrot.slane %v8476_v62, %v8655_v54  ;;  %v1150_v11 = vrot.slane %v8486_v3, %v8634_v28  ;;  %v1157_v12 = vrot.slane %v8486_v3, %v8637_v29  ;;  %v1136_v17 = vrot.slane %v8488_v4, %v8652_v53 }
 0x103   :  { %v1143_v52 = vrot.slane %v8488_v4, %v8655_v54  ;;  %v8969_v26 = vcombine.low %v1094_v20, %v1101_v45  ;;  %v1164_v62 = vrot.slane %v8486_v3, %v8652_v53  ;;  %v1171_v7 = vrot.slane %v8486_v3, %v8655_v54 }
 0x104   :  { %v8957_v44 = vpop.xlane.xlu1 %334  ;;  %v8959_v61 = vpop.xlane.xlu0 %331  ;;  %v4369_v51 = vrot.slane %v8828_v47, %v8675_v21  ;;  %v8977_v38 = vcombine.low %v1108_v58, %v1115_v0  ;;  %v4524_v49 = vcombine.low %v1122_v43, %v1129_v34  ;;  %v1206_v13 = vrot.slane %v8498_v9, %v8634_v28 }
 0x105   :  { %11664 = vst [vmem:[#allocation55_spill] sm:$0xff] %v8957_v44  ;;  %11665 = vst [vmem:[#allocation56_spill] sm:$0xff] %v8959_v61  ;;  %v1213_v4 = vrot.slane %v8498_v9, %v8637_v29  ;;  %v1220_v37 = vrot.slane %v8498_v9, %v8652_v53  ;;  %v1227_v41 = vrot.slane %v8498_v9, %v8655_v54 }
 0x106   :  { %11666 = vst [vmem:[#allocation57_spill] sm:$0xff] %v8969_v26  ;;  %11667 = vst [vmem:[#allocation58_spill] sm:$0xff] %v8977_v38  ;;  %v1178_v3 = vrot.slane %v8500_v10, %v8634_v28  ;;  %v1185_v47 = vrot.slane %v8500_v10, %v8637_v29  ;;  %v8995_v45 = vcombine.low %v1066_v63, %v1073_v27 }
 0x107   :  { %v4541_v58 = vcombine.low %v1150_v11, %v1157_v12  ;;  %v4525_v0 = vcombine.low %v1136_v17, %v1143_v52  ;;  %v8997_v43 = vcombine.low %v4345_v42, %v4352_v36  ;;  %v8999_v34 = vcombine.low %v1080_v46, %v1087_v32 }
 0x108   :  { %v8991_v60 = vpop.xlane.xlu1 %340  ;;  %v8993_v20 = vpop.xlane.xlu0 %337  ;;  %11670 = vst [vmem:[#allocation61_spill] sm:$0xff] %v8995_v45  ;;  %v4542_v38 = vcombine.low %v1164_v62, %v1171_v7  ;;  %v9001_v9 = vcombine.low %v4362_v25, %v4369_v51  ;;  %v1192_v48 = vrot.slane %v8500_v10, %v8652_v53  ;;  %v1199_v56 = vrot.slane %v8500_v10, %v8655_v54 }
 0x109   :  { %11668 = vst [vmem:[#allocation59_spill] sm:$0xff] %v8991_v60  ;;  %11669 = vst [vmem:[#allocation60_spill] sm:$0xff] %v8993_v20  ;;  %v9013_v36 = vcombine.low %v1206_v13, %v1213_v4  ;;  %v9015_v27 = vcombine.low %v1220_v37, %v1227_v41  ;;  %v9017_v25 = vcombine.low %v1178_v3, %v1185_v47 }
 0x10a   :  { %11671 = vst [vmem:[#allocation62_spill] sm:$0xff] %v8997_v43  ;;  %11672 = vst [vmem:[#allocation63_spill] sm:$0xff] %v8999_v34  ;;  %v4532_v11 = vrot.slane %v4524_v49, %v8675_v21  ;;  %v1262_v10 = vrot.slane %v8510_v15, %v8634_v28  ;;  %v1269_v12 = vrot.slane %v8510_v15, %v8637_v29 }
 0x10b   :  { %11673 = vst [vmem:[#allocation64_spill] sm:$0xff] %v9001_v9  ;;  %v4539_v17 = vrot.slane %v4525_v0, %v8675_v21  ;;  %v4549_v52 = vrot.slane %v4541_v58, %v8675_v21  ;;  %v1570_v62 = vrot.slane %v8584_v6, %v8634_v28  ;;  %v1577_v7 = vrot.slane %v8584_v6, %v8637_v29 }
 0x10c   :  { %v9019_v46 = vpop.xlane.xlu1 %346  ;;  %v9021_v32 = vpop.xlane.xlu0 %343  ;;  %v1584_v51 = vrot.slane %v8584_v6, %v8652_v53  ;;  %v1591_v49 = vrot.slane %v8584_v6, %v8655_v54  ;;  %v1276_v13 = vrot.slane %v8510_v15, %v8652_v53  ;;  %v1283_v4 = vrot.slane %v8510_v15, %v8655_v54 }
 0x10d   :  { %11674 = vst [vmem:[#allocation65_spill] sm:$0xff] %v9019_v46  ;;  %11675 = vst [vmem:[#allocation66_spill] sm:$0xff] %v9021_v32  ;;  %v1234_v37 = vrot.slane %v8512_v16, %v8634_v28  ;;  %v1241_v41 = vrot.slane %v8512_v16, %v8637_v29  ;;  %v1598_v3 = vrot.slane %v8582_v5, %v8634_v28 }
 0x10e   :  { %v1605_v47 = vrot.slane %v8582_v5, %v8637_v29  ;;  %v1612_v6 = vrot.slane %v8582_v5, %v8652_v53  ;;  %v1619_v58 = vrot.slane %v8582_v5, %v8655_v54  ;;  %v4796_v45 = vcombine.low %v1570_v62, %v1577_v7  ;;  %v11676_v62 = vld [vmem:[#allocation34_spill] sm:$0xff] }
 0x10f   :  { %v4797_v40 = vcombine.low %v1584_v51, %v1591_v49  ;;  %v4540_v35 = vcombine.low %v4532_v11, %v4539_v17  ;;  %v4556_v33 = vrot.slane %v4542_v38, %v8675_v21  ;;  %v1248_v5 = vrot.slane %v8512_v16, %v8652_v53  ;;  %v11677_v49 = vld [vmem:[#allocation6_spill] sm:$0xff] }
 0x110   :  { %v353_v0 = vpop.xlane.xlu1 %352  ;;  %6432 = vperm.xlu1 %8031, %v8822_v2   ;;  %v9055_v15 = vpop.xlane.xlu0 %349  ;;  %v1255_v2 = vrot.slane %v8512_v16, %v8655_v54  ;;  %v9066_v23 = vcombine.low %v1192_v48, %v1199_v56  ;;  %v9068_v8 = vcombine.low %v1262_v10, %v1269_v12  ;;  %v4813_v22 = vcombine.low %v1598_v3, %v1605_v47  ;;  %v11678_v3 = vld [vmem:[#allocation7_spill] sm:$0xff] }
 0x111   :  { %v2494_v42 = vrot.slane %v353_v0, %v8634_v28  ;;  %v2501_v26 = vrot.slane %v353_v0, %v8637_v29  ;;  %v2508_v63 = vrot.slane %v353_v0, %v8652_v53  ;;  %v2515_v34 = vrot.slane %v353_v0, %v8655_v54 }
 0x112   :  { %v4814_v55 = vcombine.low %v1612_v6, %v1619_v58  ;;  %v2018_v38 = vrot.slane %v8773_v18, %v8634_v28  ;;  %v2025_v17 = vrot.slane %v8773_v18, %v8637_v29  ;;  %v2032_v16 = vrot.slane %v8773_v18, %v8652_v53 }
 0x113   :  { %v5357_v57 = vcombine.low %v2494_v42, %v2501_v26  ;;  %v5358_v1 = vcombine.low %v2508_v63, %v2515_v34  ;;  %v2039_v56 = vrot.slane %v8773_v18, %v8655_v54  ;;  %v9083_v48 = vcombine.low %v1276_v13, %v1283_v4 }
 0x114   :  { %v9070_v0 = vpop.xlane.xlu1 %358  ;;  %6477 = vperm.xlu1 %8031, %v4540_v35   ;;  %v9072_v11 = vpop.xlane.xlu0 %355  ;;  %v4557_v26 = vcombine.low %v4549_v52, %v4556_v33  ;;  %v4804_v35 = vrot.slane %v4796_v45, %v8675_v21  ;;  %v4811_v34 = vrot.slane %v4797_v40, %v8675_v21  ;;  %v9087_v63 = vcombine.low %v1234_v37, %v1241_v41 }
 0x115   :  { %6429 = vperm.xlu0 %8030, %v8824_v30   ;;  %v9089_v42 = vcombine.low %v1248_v5, %v1255_v2  ;;  %v5365_v10 = vrot.slane %v5357_v57, %v8675_v21  ;;  %v5372_v12 = vrot.slane %v5358_v1, %v8675_v21  ;;  %v2046_v18 = vrot.slane %v11676_v62, %v8634_v28 }
 0x116   :  { %v2053_v30 = vrot.slane %v11676_v62, %v8637_v29  ;;  %v4821_v40 = vrot.slane %v4813_v22, %v8675_v21  ;;  %v4828_v45 = vrot.slane %v4814_v55, %v8675_v21  ;;  %v2060_v57 = vrot.slane %v11676_v62, %v8652_v53 }
 0x117   :  { %v2067_v1 = vrot.slane %v11676_v62, %v8655_v54  ;;  %v5068_v52 = vcombine.low %v2018_v38, %v2025_v17  ;;  %v5069_v51 = vcombine.low %v2032_v16, %v2039_v56  ;;  %v1318_v13 = vrot.slane %v11677_v49, %v8634_v28 }
 0x118   :  { %v9097_v7 = vpop.xlane.xlu1 %364  ;;  %6480 = vperm.xlu1 %8031, %v4557_v26   ;;  %v9099_v33 = vpop.xlane.xlu0 %361  ;;  %v1325_v4 = vrot.slane %v11677_v49, %v8637_v29  ;;  %v4812_v37 = vcombine.low %v4804_v35, %v4811_v34  ;;  %v4566_v22 = vrot.slane %v9017_v25, %v8675_v21  ;;  %v1332_v55 = vrot.slane %v11677_v49, %v8652_v53 }
 0x119   :  { %v1339_v41 = vrot.slane %v11677_v49, %v8655_v54  ;;  %v1290_v47 = vrot.slane %v11678_v3, %v8634_v28  ;;  %v5373_v6 = vcombine.low %v5365_v10, %v5372_v12  ;;  %v1297_v58 = vrot.slane %v11678_v3, %v8637_v29 }
 0x11a   :  { %v1304_v5 = vrot.slane %v11678_v3, %v8652_v53  ;;  %v1311_v2 = vrot.slane %v11678_v3, %v8655_v54  ;;  %v4829_v17 = vcombine.low %v4821_v40, %v4828_v45  ;;  %v5085_v16 = vcombine.low %v2046_v18, %v2053_v30  ;;  %v11681_v30 = vld [vmem:[#allocation8_spill] sm:$0xff] }
 0x11b   :  { %v5086_v56 = vcombine.low %v2060_v57, %v2067_v1  ;;  %6624 = vperm.xlu0 %8030, %v5373_v6   ;;  %v5076_v26 = vrot.slane %v5068_v52, %v8675_v21  ;;  %v5083_v35 = vrot.slane %v5069_v51, %v8675_v21  ;;  %v2466_v34 = vrot.slane %v9055_v15, %v8634_v28  ;;  %v11682_v51 = vld [vmem:[#allocation9_spill] sm:$0xff] }
 0x11c   :  { %v9125_v25 = vpop.xlane.xlu1 %370  ;;  %6525 = vperm.xlu1 %8031, %v4812_v37   ;;  %v9127_v38 = vpop.xlane.xlu0 %367  ;;  %v2473_v10 = vrot.slane %v9055_v15, %v8637_v29  ;;  %v2480_v12 = vrot.slane %v9055_v15, %v8652_v53  ;;  %v2487_v62 = vrot.slane %v9055_v15, %v8655_v54  ;;  %v9139_v40 = vcombine.low %v1318_v13, %v1325_v4 }
 0x11d   :  { %11679 = vst [vmem:[#allocation34_spill] sm:$0xff] %v9125_v25  ;;  %11680 = vst [vmem:[#allocation6_spill] sm:$0xff] %v9127_v38  ;;  %v9141_v18 = vcombine.low %v1332_v55, %v1339_v41  ;;  %v1374_v45 = vrot.slane %v11681_v30, %v8634_v28  ;;  %v1381_v57 = vrot.slane %v11681_v30, %v8637_v29 }
 0x11e   :  { %v1388_v1 = vrot.slane %v11681_v30, %v8652_v53  ;;  %v1395_v52 = vrot.slane %v11681_v30, %v8655_v54  ;;  %v1346_v49 = vrot.slane %v11682_v51, %v8634_v28  ;;  %v4573_v4 = vrot.slane %v9066_v23, %v8675_v21 }
 0x11f   :  { %v1353_v37 = vrot.slane %v11682_v51, %v8637_v29  ;;  %v1360_v55 = vrot.slane %v11682_v51, %v8652_v53  ;;  %v1367_v41 = vrot.slane %v11682_v51, %v8655_v54  ;;  %v5093_v3 = vrot.slane %v5085_v16, %v8675_v21  ;;  %v11687_v51 = vld [vmem:[#allocation10_spill] sm:$0xff] }
 0x120   :  { %v9153_v15 = vpop.xlane.xlu1 %376  ;;  %6528 = vperm.xlu1 %8031, %v4829_v17   ;;  %v9155_v13 = vpop.xlane.xlu0 %373  ;;  %v5340_v6 = vcombine.low %v2466_v34, %v2473_v10  ;;  %v5341_v30 = vcombine.low %v2480_v12, %v2487_v62  ;;  %v5100_v17 = vrot.slane %v5086_v56, %v8675_v21  ;;  %v9169_v32 = vcombine.low %v1304_v5, %v1311_v2  ;;  %v11692_v62 = vld [vmem:[#allocation11_spill] sm:$0xff] }
 0x121   :  { %11683 = vst [vmem:[#allocation7_spill] sm:$0xff] %v9153_v15  ;;  %11684 = vst [vmem:[#allocation8_spill] sm:$0xff] %v9155_v13  ;;  %v5084_v15 = vcombine.low %v5076_v26, %v5083_v35  ;;  %v9167_v13 = vcombine.low %v1290_v47, %v1297_v58  ;;  %v9171_v23 = vcombine.low %v1374_v45, %v1381_v57 }
 0x122   :  { %v4583_v46 = vrot.slane %v9013_v36, %v8675_v21  ;;  %v9175_v25 = vcombine.low %v1388_v1, %v1395_v52  ;;  %v1430_v20 = vrot.slane %v11687_v51, %v8634_v28  ;;  %v1437_v16 = vrot.slane %v11687_v51, %v8637_v29  ;;  %v11694_v52 = vld [vmem:[#allocation12_spill] sm:$0xff] }
 0x123   :  { %11685 = vst [vmem:[#allocation9_spill] sm:$0xff] %v9171_v23  ;;  %v9185_v58 = vcombine.low %v4566_v22, %v4573_v4  ;;  %v9187_v5 = vcombine.low %v1346_v49, %v1353_v37  ;;  %v9189_v2 = vcombine.low %v1360_v55, %v1367_v41  ;;  %v4590_v36 = vrot.slane %v9015_v27, %v8675_v21 }
 0x124   :  { %11686 = vst [vmem:[#allocation67_spill] sm:$0xff] %v9175_v25  ;;  %v9181_v26 = vpop.xlane.xlu1 %382  ;;  %6573 = vperm.xlu1 %8031, %v5084_v15   ;;  %v9183_v47 = vpop.xlane.xlu0 %379  ;;  %v4600_v56 = vrot.slane %v9087_v63, %v8675_v21  ;;  %v1444_v35 = vrot.slane %v11687_v51, %v8652_v53  ;;  %v5101_v34 = vcombine.low %v5093_v3, %v5100_v17  ;;  %v11697_v3 = vld [vmem:[#allocation13_spill] sm:$0xff] }
 0x125   :  { %11688 = vst [vmem:[#allocation10_spill] sm:$0xff] %v9181_v26  ;;  %11689 = vst [vmem:[#allocation68_spill] sm:$0xff] %v9183_v47  ;;  %v5348_v10 = vrot.slane %v5340_v6, %v8675_v21  ;;  %v5355_v12 = vrot.slane %v5341_v30, %v8675_v21  ;;  %v1451_v22 = vrot.slane %v11687_v51, %v8655_v54 }
 0x126   :  { %11690 = vst [vmem:[#allocation69_spill] sm:$0xff] %v9187_v5  ;;  %11691 = vst [vmem:[#allocation70_spill] sm:$0xff] %v9189_v2  ;;  %v1402_v45 = vrot.slane %v11692_v62, %v8634_v28  ;;  %v1409_v27 = vrot.slane %v11692_v62, %v8637_v29  ;;  %v1416_v63 = vrot.slane %v11692_v62, %v8652_v53 }
 0x127   :  { %v9207_v57 = vcombine.low %v1430_v20, %v1437_v16  ;;  %v1423_v1 = vrot.slane %v11692_v62, %v8655_v54  ;;  %v1486_v49 = vrot.slane %v11694_v52, %v8634_v28  ;;  %v4607_v37 = vrot.slane %v9089_v42, %v8675_v21 }
 0x128   :  { %v9213_v15 = vpop.xlane.xlu1 %388  ;;  %6576 = vperm.xlu1 %8031, %v5101_v34   ;;  %v9215_v4 = vpop.xlane.xlu0 %385  ;;  %v1493_v55 = vrot.slane %v11694_v52, %v8637_v29  ;;  %v1500_v20 = vrot.slane %v11694_v52, %v8652_v53  ;;  %v1507_v41 = vrot.slane %v11694_v52, %v8655_v54  ;;  %v1458_v6 = vrot.slane %v11697_v3, %v8634_v28 }
 0x129   :  { %11693 = vst [vmem:[#allocation11_spill] sm:$0xff] %v9207_v57  ;;  %11695 = vst [vmem:[#allocation12_spill] sm:$0xff] %v9213_v15  ;;  %v1465_v30 = vrot.slane %v11697_v3, %v8637_v29  ;;  %v1472_v17 = vrot.slane %v11697_v3, %v8652_v53  ;;  %v1479_v42 = vrot.slane %v11697_v3, %v8655_v54  ;;  %v11699_v57 = vld [vmem:[#allocation14_spill] sm:$0xff] }
 0x12a   :  { %11696 = vst [vmem:[#allocation71_spill] sm:$0xff] %v9215_v4  ;;  %v5356_v51 = vcombine.low %v5348_v10, %v5355_v12  ;;  %v9233_v16 = vcombine.low %v1444_v35, %v1451_v22  ;;  %v9235_v34 = vcombine.low %v4583_v46, %v4590_v36  ;;  %v4617_v62 = vrot.slane %v9068_v8, %v8675_v21 }
 0x12b   :  { %v4624_v52 = vrot.slane %v9083_v48, %v8675_v21  ;;  %v1542_v25 = vrot.slane %v11699_v57, %v8634_v28  ;;  %v1549_v23 = vrot.slane %v11699_v57, %v8637_v29  ;;  %v1556_v3 = vrot.slane %v11699_v57, %v8652_v53 }
 0x12c   :  { %11698 = vst [vmem:[#allocation13_spill] sm:$0xff] %v9233_v16  ;;  %v1563_v35 = vrot.slane %v11699_v57, %v8655_v54  ;;  %v9249_v46 = vpop.xlane.xlu1 %394  ;;  %6621 = vperm.xlu1 %8031, %v5356_v51   ;;  %v9251_v36 = vpop.xlane.xlu0 %391  ;;  %v9253_v8 = vcombine.low %v1402_v45, %v1409_v27  ;;  %v9255_v48 = vcombine.low %v1416_v63, %v1423_v1  ;;  %v11708_v51 = vld [vmem:[#allocation15_spill] sm:$0xff] }
 0x12d   :  { %11700 = vst [vmem:[#allocation14_spill] sm:$0xff] %v9249_v46  ;;  %11701 = vst [vmem:[#allocation72_spill] sm:$0xff] %v9251_v36  ;;  %v9257_v10 = vcombine.low %v1486_v49, %v1493_v55  ;;  %v9259_v12 = vcombine.low %v1500_v20, %v1507_v41  ;;  %v9261_v22 = vcombine.low %v1458_v6, %v1465_v30 }
 0x12e   :  { %11702 = vst [vmem:[#allocation73_spill] sm:$0xff] %v9253_v8  ;;  %11703 = vst [vmem:[#allocation74_spill] sm:$0xff] %v9255_v48  ;;  %v9263_v16 = vcombine.low %v1472_v17, %v1479_v42  ;;  %v9265_v4 = vcombine.low %v4600_v56, %v4607_v37  ;;  %v4634_v57 = vrot.slane %v9167_v13, %v8675_v21  ;;  %v11722_v8 = vld [vmem:[#allocation21_spill] sm:$0xff] }
 0x12f   :  { %11704 = vst [vmem:[#allocation75_spill] sm:$0xff] %v9257_v10  ;;  %11705 = vst [vmem:[#allocation76_spill] sm:$0xff] %v9259_v12  ;;  %v1514_v46 = vrot.slane %v11708_v51, %v8634_v28  ;;  %v1521_v45 = vrot.slane %v11708_v51, %v8637_v29  ;;  %v1528_v27 = vrot.slane %v11708_v51, %v8652_v53 }
 0x130   :  { %11706 = vst [vmem:[#allocation77_spill] sm:$0xff] %v9261_v22  ;;  %11707 = vst [vmem:[#allocation78_spill] sm:$0xff] %v9263_v16  ;;  %v1535_v63 = vrot.slane %v11708_v51, %v8655_v54  ;;  %v9277_v1 = vcombine.low %v1542_v25, %v1549_v23  ;;  %v9279_v49 = vcombine.low %v1556_v3, %v1563_v35  ;;  %v401_v56 = vpop.xlane.xlu1 %400  ;;  %v398_v37 = vpop.xlane.xlu0 %397 }
 0x131   :  { %v9281_v55 = vcombine.low %v4617_v62, %v4624_v52  ;;  %v4641_v13 = vrot.slane %v9169_v32, %v8675_v21  ;;  %v2942_v20 = vrot.slane %v401_v56, %v8634_v28  ;;  %v2949_v41 = vrot.slane %v401_v56, %v8637_v29 }
 0x132   :  { %11709 = vst [vmem:[#allocation15_spill] sm:$0xff] %v9277_v1  ;;  %11710 = vst [vmem:[#allocation79_spill] sm:$0xff] %v9279_v49  ;;  %v2956_v6 = vrot.slane %v401_v56, %v8652_v53  ;;  %v2963_v30 = vrot.slane %v401_v56, %v8655_v54  ;;  %v2914_v25 = vrot.slane %v398_v37, %v8634_v28 }
 0x133   :  { %11711 = vst [vmem:[#allocation80_spill] sm:$0xff] %v9281_v55  ;;  %v2921_v23 = vrot.slane %v398_v37, %v8637_v29  ;;  %v2928_v17 = vrot.slane %v398_v37, %v8652_v53  ;;  %v2935_v42 = vrot.slane %v398_v37, %v8655_v54  ;;  %v9293_v62 = vcombine.low %v1514_v46, %v1521_v45  ;;  %v11718_v45 = vld [vmem:[#allocation16_spill] sm:$0xff] }
 0x134   :  { %v9295_v52 = vcombine.low %v1528_v27, %v1535_v63  ;;  %v5629_v32 = vcombine.low %v2942_v20, %v2949_v41  ;;  %v5630_v3 = vcombine.low %v2956_v6, %v2963_v30  ;;  %v9297_v49 = vpop.xlane.xlu1 %406  ;;  %v9299_v1 = vpop.xlane.xlu0 %403  ;;  %v9301_v56 = vcombine.low %v4634_v57, %v4641_v13  ;;  %v11719_v20 = vld [vmem:[#allocation17_spill] sm:$0xff]  ;;  %v11720_v6 = vld [vmem:[#allocation18_spill] sm:$0xff] }
 0x135   :  { %11712 = vst [vmem:[#allocation81_spill] sm:$0xff] %v9293_v62  ;;  %v5612_v35 = vcombine.low %v2914_v25, %v2921_v23  ;;  %v5613_v51 = vcombine.low %v2928_v17, %v2935_v42  ;;  %v11715_v12 = vrot.slane %v8820_v59, %v8675_v21  ;;  %v11716_v37 = vrot.slane %v8818_v14, %v8675_v21 }
 0x136   :  { %11713 = vst [vmem:[#allocation82_spill] sm:$0xff] %v9295_v52  ;;  %11714 = vst [vmem:[#allocation83_spill] sm:$0xff] %v9301_v56  ;;  %v1654_v27 = vrot.slane %v11718_v45, %v8634_v28  ;;  %v1661_v63 = vrot.slane %v11718_v45, %v8637_v29  ;;  %v1626_v41 = vrot.slane %v11719_v20, %v8634_v28 }
 0x137   :  { %v9309_v46 = vcombine.low %v11716_v37, %v11715_v12  ;;  %v1633_v57 = vrot.slane %v11719_v20, %v8637_v29  ;;  %v1668_v59 = vrot.slane %v11718_v45, %v8652_v53  ;;  %v1675_v14 = vrot.slane %v11718_v45, %v8655_v54 }
 0x138   :  { %v1640_v12 = vrot.slane %v11719_v20, %v8652_v53  ;;  %v1647_v13 = vrot.slane %v11719_v20, %v8655_v54  ;;  %v1710_v30 = vrot.slane %v11720_v6, %v8634_v28  ;;  %v1717_v25 = vrot.slane %v11720_v6, %v8637_v29  ;;  %v9337_v45 = vpop.xlane.xlu1 %412  ;;  %v9339_v52 = vpop.xlane.xlu0 %409 }
 0x139   :  { %11717 = vst [vmem:[#allocation84_spill] sm:$0xff] %v9309_v46  ;;  %v5637_v23 = vrot.slane %v5629_v32, %v8675_v21  ;;  %v5644_v17 = vrot.slane %v5630_v3, %v8675_v21  ;;  %v1724_v42 = vrot.slane %v11720_v6, %v8652_v53  ;;  %v1731_v37 = vrot.slane %v11720_v6, %v8655_v54  ;;  %v11721_v6 = vld [vmem:[#allocation19_spill] sm:$0xff] }
 0x13a   :  { %v5620_v20 = vrot.slane %v5612_v35, %v8675_v21  ;;  %v5627_v62 = vrot.slane %v5613_v51, %v8675_v21  ;;  %v9343_v10 = vcombine.low %v1654_v27, %v1661_v63  ;;  %v9345_v16 = vcombine.low %v1626_v41, %v1633_v57 }
 0x13b   :  { %v1682_v22 = vrot.slane %v11721_v6, %v8634_v28  ;;  %v1689_v48 = vrot.slane %v11721_v6, %v8637_v29  ;;  %v1696_v35 = vrot.slane %v11721_v6, %v8652_v53  ;;  %v1703_v51 = vrot.slane %v11721_v6, %v8655_v54 }
 0x13c   :  { %v9359_v27 = vcombine.low %v1668_v59, %v1675_v14  ;;  %v9361_v63 = vcombine.low %v1640_v12, %v1647_v13  ;;  %v5645_v41 = vcombine.low %v5637_v23, %v5644_v17  ;;  %v5628_v57 = vcombine.low %v5620_v20, %v5627_v62  ;;  %v446_v47 = vpop.xlane.xlu1 %445  ;;  %v9371_v26 = vpop.xlane.xlu0 %415 }
 0x13d   :  { %v9363_v32 = vcombine.low %v1710_v30, %v1717_v25  ;;  %v9365_v3 = vcombine.low %v1724_v42, %v1731_v37  ;;  %v1766_v36 = vrot.slane %v11722_v8, %v8634_v28  ;;  %v1773_v15 = vrot.slane %v11722_v8, %v8637_v29  ;;  %11723 = vst [vmem:[#allocation16_spill] sm:$0xff] %v9371_v26  ;;  %v11724_v42 = vld [vmem:[#allocation22_spill] sm:$0xff]  ;;  %v11725_v26 = vld [vmem:[#allocation25_spill] sm:$0xff] }
 0x13e   :  { %6672 = vperm.xlu0 %8030, %v5645_v41   ;;  %6669 = vperm.xlu1 %8031, %v5628_v57   ;;  %v3362_v59 = vrot.slane %v446_v47, %v8634_v28  ;;  %v3369_v14 = vrot.slane %v446_v47, %v8637_v29  ;;  %v3376_v62 = vrot.slane %v446_v47, %v8652_v53 }
 0x13f   :  { %v9376_v12 = vcombine.low %v1682_v22, %v1689_v48  ;;  %v9378_v13 = vcombine.low %v1696_v35, %v1703_v51  ;;  %v3383_v30 = vrot.slane %v446_v47, %v8655_v54  ;;  %v1780_v23 = vrot.slane %v11722_v8, %v8652_v53 }
 0x140   :  { %v1787_v17 = vrot.slane %v11722_v8, %v8655_v54  ;;  %v1738_v37 = vrot.slane %v11724_v42, %v8634_v28  ;;  %v5884_v20 = vcombine.low %v3362_v59, %v3369_v14  ;;  %v1745_v48 = vrot.slane %v11724_v42, %v8637_v29  ;;  %v494_v35 = vpop.xlane.xlu1 %493  ;;  %v449_v51 = vpop.xlane.xlu0 %448 }
 0x141   :  { %v1752_v22 = vrot.slane %v11724_v42, %v8652_v53  ;;  %v1759_v47 = vrot.slane %v11724_v42, %v8655_v54  ;;  %v5885_v6 = vcombine.low %v3376_v62, %v3383_v30  ;;  %v9395_v41 = vcombine.low %v1766_v36, %v1773_v15 }
 0x142   :  { %v3810_v8 = vrot.slane %v494_v35, %v8634_v28  ;;  %v3817_v57 = vrot.slane %v494_v35, %v8637_v29  ;;  %v3824_v59 = vrot.slane %v494_v35, %v8652_v53  ;;  %v3831_v14 = vrot.slane %v494_v35, %v8655_v54 }
 0x143   :  { %v3390_v25 = vrot.slane %v449_v51, %v8634_v28  ;;  %v3397_v2 = vrot.slane %v449_v51, %v8637_v29  ;;  %v3404_v5 = vrot.slane %v449_v51, %v8652_v53  ;;  %v3411_v62 = vrot.slane %v449_v51, %v8655_v54 }
 0x144   :  { %v6156_v42 = vcombine.low %v3810_v8, %v3817_v57  ;;  %v5892_v15 = vrot.slane %v5884_v20, %v8675_v21  ;;  %v5899_v36 = vrot.slane %v5885_v6, %v8675_v21  ;;  %v9407_v30 = vcombine.low %v1780_v23, %v1787_v17  ;;  %v452_v35 = vpop.xlane.xlu1 %451  ;;  %v497_v9 = vpop.xlane.xlu0 %496 }
 0x145   :  { %v9409_v46 = vcombine.low %v1738_v37, %v1745_v48  ;;  %v6157_v56 = vcombine.low %v3824_v59, %v3831_v14  ;;  %v5901_v60 = vcombine.low %v3390_v25, %v3397_v2  ;;  %v9411_v61 = vcombine.low %v1752_v22, %v1759_v47  ;;  %v11726_v14 = vld [vmem:[#allocation36_spill] sm:$0xff] }
 0x146   :  { %v1822_v44 = vrot.slane %v11725_v26, %v8634_v28  ;;  %v4845_v51 = vrot.slane %v9361_v63, %v8675_v21  ;;  %v5902_v6 = vcombine.low %v3404_v5, %v3411_v62  ;;  %v3838_v23 = vrot.slane %v497_v9, %v8634_v28 }
 0x147   :  { %v3845_v17 = vrot.slane %v497_v9, %v8637_v29  ;;  %v3852_v2 = vrot.slane %v497_v9, %v8652_v53  ;;  %v1829_v25 = vrot.slane %v11725_v26, %v8637_v29  ;;  %v3859_v37 = vrot.slane %v497_v9, %v8655_v54 }
 0x148   :  { %v5900_v48 = vcombine.low %v5892_v15, %v5899_v36  ;;  %v6164_v22 = vrot.slane %v6156_v42, %v8675_v21  ;;  %v9428_v8 = vpop.xlane.xlu1 %454  ;;  %v6171_v5 = vrot.slane %v6157_v56, %v8675_v21  ;;  %v5909_v57 = vrot.slane %v5901_v60, %v8675_v21 }
 0x149   :  { %v6173_v47 = vcombine.low %v3838_v23, %v3845_v17  ;;  %v2074_v62 = vrot.slane %v11726_v14, %v8634_v28  ;;  %v2081_v9 = vrot.slane %v11726_v14, %v8637_v29  ;;  %v6174_v42 = vcombine.low %v3852_v2, %v3859_v37  ;;  %v11727_v37 = vld [vmem:[#allocation26_spill] sm:$0xff] }
 0x14a   :  { %6717 = vperm.xlu1 %8031, %v5900_v48   ;;  %v2088_v15 = vrot.slane %v11726_v14, %v8652_v53  ;;  %v2095_v36 = vrot.slane %v11726_v14, %v8655_v54  ;;  %v6172_v56 = vcombine.low %v6164_v22, %v6171_v5  ;;  %v5916_v60 = vrot.slane %v5902_v6, %v8675_v21 }
 0x14b   :  { %v2522_v23 = vrot.slane %v9072_v11, %v8634_v28  ;;  %v2529_v17 = vrot.slane %v9072_v11, %v8637_v29  ;;  %v2536_v20 = vrot.slane %v9072_v11, %v8652_v53  ;;  %v2543_v2 = vrot.slane %v9072_v11, %v8655_v54 }
 0x14c   :  { %v5917_v63 = vcombine.low %v5909_v57, %v5916_v60  ;;  %v9453_v14 = vpop.xlane.xlu1 %457  ;;  %v6181_v6 = vrot.slane %v6173_v47, %v8675_v21  ;;  %v6188_v22 = vrot.slane %v6174_v42, %v8675_v21  ;;  %v3418_v5 = vrot.slane %v452_v35, %v8634_v28 }
 0x14d   :  { %v3425_v59 = vrot.slane %v452_v35, %v8637_v29  ;;  %v3432_v38 = vrot.slane %v452_v35, %v8652_v53  ;;  %v3439_v55 = vrot.slane %v452_v35, %v8655_v54  ;;  %v5102_v60 = vcombine.low %v2074_v62, %v2081_v9 }
 0x14e   :  { %6765 = vperm.xlu1 %8031, %v6172_v56   ;;  %6720 = vperm.xlu0 %8030, %v5917_v63   ;;  %v6189_v42 = vcombine.low %v6181_v6, %v6188_v22  ;;  %v5103_v48 = vcombine.low %v2088_v15, %v2095_v36  ;;  %v5374_v39 = vcombine.low %v2522_v23, %v2529_v17  ;;  %v500_v15 = vpop.xlane.xlu0 %499 }
 0x14f   :  { %v5375_v31 = vcombine.low %v2536_v20, %v2543_v2  ;;  %v2970_v43 = vrot.slane %v9299_v1, %v8634_v28  ;;  %v2977_v35 = vrot.slane %v9299_v1, %v8637_v29  ;;  %v2984_v56 = vrot.slane %v9299_v1, %v8652_v53 }
 0x150   :  { %v2991_v57 = vrot.slane %v9299_v1, %v8655_v54  ;;  %v9475_v11 = vpop.xlane.xlu1 %460  ;;  %v9477_v63 = vcombine.low %v1822_v44, %v1829_v25  ;;  %v5918_v62 = vcombine.low %v3418_v5, %v3425_v59  ;;  %v5919_v9 = vcombine.low %v3432_v38, %v3439_v55  ;;  %v11730_v44 = vld [vmem:[#allocation28_spill] sm:$0xff] }
 0x151   :  { %v11729_v20 = vrot.slane %v9345_v16, %v8675_v21  ;;  %v3866_v23 = vrot.slane %v500_v15, %v8634_v28  ;;  %v3873_v17 = vrot.slane %v500_v15, %v8637_v29  ;;  %v3880_v2 = vrot.slane %v500_v15, %v8652_v53 }
 0x152   :  { %11728 = vst [vmem:[#allocation17_spill] sm:$0xff] %v9477_v63  ;;  %6435 = vperm.xlu1 %8031, %v8905_v50   ;;  %v3887_v1 = vrot.slane %v500_v15, %v8655_v54  ;;  %6768 = vperm.xlu0 %8030, %v6189_v42   ;;  %v1878_v25 = vrot.slane %v11730_v44, %v8634_v28 }
 0x153   :  { %v4846_v36 = vcombine.low %v11729_v20, %v4845_v51  ;;  %v5382_v38 = vrot.slane %v5374_v39, %v8675_v21  ;;  %v5389_v50 = vrot.slane %v5375_v31, %v8675_v21  ;;  %v4862_v16 = vrot.slane %v9359_v27, %v8675_v21  ;;  %v11731_v27 = vld [vmem:[#allocation29_spill] sm:$0xff] }
 0x154   :  { %v5646_v55 = vcombine.low %v2970_v43, %v2977_v35  ;;  %v5647_v51 = vcombine.low %v2984_v56, %v2991_v57  ;;  %v9493_v59 = vpop.xlane.xlu1 %463  ;;  %v5110_v6 = vrot.slane %v5102_v60, %v8675_v21  ;;  %v5117_v22 = vrot.slane %v5103_v48, %v8675_v21  ;;  %v11732_v56 = vld [vmem:[#allocation35_spill] sm:$0xff] }
 0x155   :  { %v1885_v5 = vrot.slane %v11730_v44, %v8637_v29  ;;  %v1892_v42 = vrot.slane %v11730_v44, %v8652_v53  ;;  %v5926_v31 = vrot.slane %v5918_v62, %v8675_v21  ;;  %v5933_v39 = vrot.slane %v5919_v9, %v8675_v21 }
 0x156   :  { %6531 = vperm.xlu1 %8031, %v4846_v36   ;;  %v1899_v43 = vrot.slane %v11730_v44, %v8655_v54  ;;  %v1850_v57 = vrot.slane %v11731_v27, %v8634_v28  ;;  %v6190_v60 = vcombine.low %v3866_v23, %v3873_v17  ;;  %v6191_v35 = vcombine.low %v3880_v2, %v3887_v1 }
 0x157   :  { %6483 = vperm.xlu0 %8030, %v9185_v58   ;;  %v1857_v48 = vrot.slane %v11731_v27, %v8637_v29  ;;  %v2102_v15 = vrot.slane %v11732_v56, %v8634_v28  ;;  %v2109_v62 = vrot.slane %v11732_v56, %v8637_v29  ;;  %v5390_v9 = vcombine.low %v5382_v38, %v5389_v50 }
 0x158   :  { %v2116_v20 = vrot.slane %v11732_v56, %v8652_v53  ;;  %v5118_v36 = vcombine.low %v5110_v6, %v5117_v22  ;;  %v9516_v44 = vpop.xlane.xlu1 %418  ;;  %v5654_v23 = vrot.slane %v5646_v55, %v8675_v21  ;;  %v5661_v58 = vrot.slane %v5647_v51, %v8675_v21 }
 0x159   :  { %v2123_v17 = vrot.slane %v11732_v56, %v8655_v54  ;;  %v2550_v2 = vrot.slane %v9070_v0, %v8634_v28  ;;  %v2557_v1 = vrot.slane %v9070_v0, %v8637_v29  ;;  %v5934_v38 = vcombine.low %v5926_v31, %v5933_v39 }
 0x15a   :  { %6627 = vperm.xlu1 %8031, %v5390_v9   ;;  %v2564_v50 = vrot.slane %v9070_v0, %v8652_v53  ;;  %v2571_v6 = vrot.slane %v9070_v0, %v8655_v54  ;;  %v6198_v55 = vrot.slane %v6190_v60, %v8675_v21  ;;  %v6205_v51 = vrot.slane %v6191_v35, %v8675_v21 }
 0x15b   :  { %6579 = vperm.xlu0 %8030, %v5118_v36   ;;  %v11733_v22 = vrot.slane %v11725_v26, %v8655_v54  ;;  %v11734_v56 = vrot.slane %v11725_v26, %v8652_v53  ;;  %v11736_v31 = vrot.slane %v11727_v37, %v8637_v29  ;;  %v11737_v39 = vrot.slane %v11727_v37, %v8634_v28  ;;  %v503_v36 = vpop.xlane.xlu0 %502 }
 0x15c   :  { %v11738_v60 = vrot.slane %v11727_v37, %v8655_v54  ;;  %v11739_v35 = vrot.slane %v11727_v37, %v8652_v53  ;;  %v9566_v63 = vcombine.low %v1892_v42, %v1899_v43  ;;  %v9568_v37 = vcombine.low %v1850_v57, %v1857_v48 }
 0x15d   :  { %v9538_v47 = vcombine.low %v11734_v56, %v11733_v22  ;;  %v9546_v0 = vcombine.low %v11737_v39, %v11736_v31  ;;  %v9558_v22 = vcombine.low %v1878_v25, %v1885_v5  ;;  %v1864_v56 = vrot.slane %v11731_v27, %v8652_v53 }
 0x15e   :  { %v9554_v9 = vcombine.low %v11739_v35, %v11738_v60  ;;  %v1871_v31 = vrot.slane %v11731_v27, %v8655_v54  ;;  %v5662_v39 = vcombine.low %v5654_v23, %v5661_v58  ;;  %11742 = vst [vmem:[#allocation22_spill] sm:$0xff] %v9566_v63  ;;  %11743 = vst [vmem:[#allocation25_spill] sm:$0xff] %v9568_v37  ;;  %6723 = vperm.xlu1 %8031, %v5934_v38   ;;  %v11746_v23 = vld [vmem:[#allocation30_spill] sm:$0xff] }
 0x15f   :  { %11735 = vst [vmem:[#allocation18_spill] sm:$0xff] %v9538_v47  ;;  %11741 = vst [vmem:[#allocation21_spill] sm:$0xff] %v9558_v22  ;;  %v9564_v47 = vpop.xlane.xlu1 %514  ;;  %v5119_v60 = vcombine.low %v2102_v15, %v2109_v62  ;;  %v11744_v35 = vrot.slane %v9343_v10, %v8675_v21  ;;  %v5120_v5 = vcombine.low %v2116_v20, %v2123_v17  ;;  %v9597_v17 = vpop.xlane.xlu0 %505 }
 0x160   :  { %11740 = vst [vmem:[#allocation19_spill] sm:$0xff] %v9554_v9  ;;  %v5391_v26 = vcombine.low %v2550_v2, %v2557_v1  ;;  %v5392_v22 = vcombine.low %v2564_v50, %v2571_v6  ;;  %6675 = vperm.xlu0 %8030, %v5662_v39   ;;  %v6206_v9 = vcombine.low %v6198_v55, %v6205_v51 }
 0x161   :  { %v4863_v25 = vcombine.low %v11744_v35, %v4862_v16  ;;  %v3446_v27 = vrot.slane %v9428_v8, %v8634_v28  ;;  %v3453_v42 = vrot.slane %v9428_v8, %v8637_v29  ;;  %v3460_v43 = vrot.slane %v9428_v8, %v8652_v53 }
 0x162   :  { %v3467_v57 = vrot.slane %v9428_v8, %v8655_v54  ;;  %v2998_v10 = vrot.slane %v9297_v49, %v8634_v28  ;;  %v3005_v16 = vrot.slane %v9297_v49, %v8637_v29  ;;  %v3012_v48 = vrot.slane %v9297_v49, %v8652_v53  ;;  %6438 = vperm.xlu1 %8031, %v8911_v24  }
 0x163   :  { %v3019_v15 = vrot.slane %v9297_v49, %v8655_v54  ;;  %v9589_v62 = vpop.xlane.xlu1 %469  ;;  %v9591_v20 = vcombine.low %v1864_v56, %v1871_v31  ;;  %v1934_v58 = vrot.slane %v11746_v23, %v8634_v28  ;;  %v1941_v8 = vrot.slane %v11746_v23, %v8637_v29 }
 0x164   :  { %v4879_v2 = vrot.slane %v9378_v13, %v8675_v21  ;;  %v3894_v1 = vrot.slane %v503_v36, %v8634_v28  ;;  %v3901_v49 = vrot.slane %v503_v36, %v8637_v29  ;;  %v3908_v38 = vrot.slane %v503_v36, %v8652_v53  ;;  %6771 = vperm.xlu0 %8030, %v6206_v9  }
 0x165   :  { %11745 = vst [vmem:[#allocation36_spill] sm:$0xff] %v9591_v20  ;;  %v3915_v50 = vrot.slane %v503_v36, %v8655_v54  ;;  %v5935_v6 = vcombine.low %v3446_v27, %v3453_v42  ;;  %v5936_v55 = vcombine.low %v3460_v43, %v3467_v57  ;;  %v5399_v51 = vrot.slane %v5391_v26, %v8675_v21  ;;  %v11747_v36 = vld [vmem:[#allocation31_spill] sm:$0xff] }
 0x166   :  { %v5406_v56 = vrot.slane %v5392_v22, %v8675_v21  ;;  %v5663_v31 = vcombine.low %v2998_v10, %v3005_v16  ;;  %v5664_v24 = vcombine.low %v3012_v48, %v3019_v15  ;;  %v5127_v13 = vrot.slane %v5119_v60, %v8675_v21  ;;  %6534 = vperm.xlu1 %8031, %v4863_v25   ;;  %v11748_v43 = vld [vmem:[#allocation39_spill] sm:$0xff]  ;;  %v9627_v10 = vpop.xlane.xlu0 %508 }
 0x167   :  { %v9608_v39 = vpop.xlane.xlu1 %424  ;;  %v5134_v35 = vrot.slane %v5120_v5, %v8675_v21  ;;  %v1948_v63 = vrot.slane %v11746_v23, %v8652_v53  ;;  %v1955_v9 = vrot.slane %v11746_v23, %v8655_v54  ;;  %v1906_v27 = vrot.slane %v11747_v36, %v8634_v28 }
 0x168   :  { %v1913_v26 = vrot.slane %v11747_v36, %v8637_v29  ;;  %v1920_v22 = vrot.slane %v11747_v36, %v8652_v53  ;;  %v1927_v60 = vrot.slane %v11747_v36, %v8655_v54  ;;  %v6207_v5 = vcombine.low %v3894_v1, %v3901_v49  ;;  %6486 = vperm.xlu0 %8030, %v9235_v34  }
 0x169   :  { %v6208_v42 = vcombine.low %v3908_v38, %v3915_v50  ;;  %v2130_v57 = vrot.slane %v11748_v43, %v8634_v28  ;;  %v5407_v16 = vcombine.low %v5399_v51, %v5406_v56  ;;  %v5943_v48 = vrot.slane %v5935_v6, %v8675_v21 }
 0x16a   :  { %v5950_v25 = vrot.slane %v5936_v55, %v8675_v21  ;;  %v2137_v15 = vrot.slane %v11748_v43, %v8637_v29  ;;  %v5135_v23 = vcombine.low %v5127_v13, %v5134_v35  ;;  %v5671_v1 = vrot.slane %v5663_v31, %v8675_v21 }
 0x16b   :  { %v9633_v20 = vpop.xlane.xlu1 %520  ;;  %v5678_v34 = vrot.slane %v5664_v24, %v8675_v21  ;;  %v2144_v49 = vrot.slane %v11748_v43, %v8652_v53  ;;  %v2151_v38 = vrot.slane %v11748_v43, %v8655_v54  ;;  %v2578_v50 = vrot.slane %v9099_v33, %v8634_v28  ;;  %6630 = vperm.xlu1 %8031, %v5407_v16  }
 0x16c   :  { %11749 = vst [vmem:[#allocation26_spill] sm:$0xff] %v9633_v20  ;;  %v2585_v6 = vrot.slane %v9099_v33, %v8637_v29  ;;  %v2592_v55 = vrot.slane %v9099_v33, %v8652_v53  ;;  %v2599_v51 = vrot.slane %v9099_v33, %v8655_v54  ;;  %6582 = vperm.xlu0 %8030, %v5135_v23  }
 0x16d   :  { %v6215_v56 = vrot.slane %v6207_v5, %v8675_v21  ;;  %v6222_v31 = vrot.slane %v6208_v42, %v8675_v21  ;;  %v9651_v24 = vcombine.low %v1934_v58, %v1941_v8  ;;  %v9653_v13 = vcombine.low %v1948_v63, %v1955_v9  ;;  %v11756_v58 = vld [vmem:[#allocation32_spill] sm:$0xff]  ;;  %v9668_v9 = vpop.xlane.xlu0 %511 }
 0x16e   :  { %v5951_v35 = vcombine.low %v5943_v48, %v5950_v25  ;;  %v9657_v43 = vcombine.low %v1906_v27, %v1913_v26  ;;  %v9659_v16 = vcombine.low %v1920_v22, %v1927_v60  ;;  %v5679_v37 = vcombine.low %v5671_v1, %v5678_v34 }
 0x16f   :  { %11750 = vst [vmem:[#allocation28_spill] sm:$0xff] %v9651_v24  ;;  %11751 = vst [vmem:[#allocation29_spill] sm:$0xff] %v9653_v13  ;;  %v9661_v20 = vpop.xlane.xlu1 %475  ;;  %v11755_v33 = vrot.slane %v9376_v12, %v8675_v21  ;;  %v5136_v63 = vcombine.low %v2130_v57, %v2137_v15  ;;  %v5137_v22 = vcombine.low %v2144_v49, %v2151_v38 }
 0x170   :  { %11752 = vst [vmem:[#allocation35_spill] sm:$0xff] %v9657_v43  ;;  %11753 = vst [vmem:[#allocation30_spill] sm:$0xff] %v9659_v16  ;;  %6726 = vperm.xlu1 %8031, %v5951_v35   ;;  %v5408_v60 = vcombine.low %v2578_v50, %v2585_v6  ;;  %v5409_v42 = vcombine.low %v2592_v55, %v2599_v51  ;;  %6678 = vperm.xlu0 %8030, %v5679_v37   ;;  %v11758_v50 = vld [vmem:[#allocation33_spill] sm:$0xff]  ;;  %v11781_v43 = vld [vmem:[#allocation6_spill] sm:$0xff] }
 0x171   :  { %11754 = vst [vmem:[#allocation31_spill] sm:$0xff] %v9661_v20  ;;  %v4880_v5 = vcombine.low %v11755_v33, %v4879_v2  ;;  %v6223_v48 = vcombine.low %v6215_v56, %v6222_v31  ;;  %v3474_v12 = vrot.slane %v9453_v14, %v8634_v28  ;;  %v3481_v2 = vrot.slane %v9453_v14, %v8637_v29  ;;  %v9709_v33 = vpop.xlane.xlu0 %466 }
 0x172   :  { %v3488_v57 = vrot.slane %v9453_v14, %v8652_v53  ;;  %v3495_v25 = vrot.slane %v9453_v14, %v8655_v54  ;;  %v3026_v15 = vrot.slane %v9339_v52, %v8634_v28  ;;  %v3033_v23 = vrot.slane %v9339_v52, %v8637_v29 }
 0x173   :  { %v3040_v37 = vrot.slane %v9339_v52, %v8652_v53  ;;  %v3047_v1 = vrot.slane %v9339_v52, %v8655_v54  ;;  %v9690_v34 = vpop.xlane.xlu1 %430  ;;  %v1997_v49 = vrot.slane %v11756_v58, %v8637_v29  ;;  %v2004_v14 = vrot.slane %v11756_v58, %v8652_v53 }
 0x174   :  { %11757 = vst [vmem:[#allocation39_spill] sm:$0xff] %v9690_v34  ;;  %v2011_v38 = vrot.slane %v11756_v58, %v8655_v54  ;;  %v1962_v6 = vrot.slane %v11758_v50, %v8634_v28  ;;  %6441 = vperm.xlu1 %8031, %v8931_v19   ;;  %v3922_v55 = vrot.slane %v9597_v17, %v8634_v28 }
 0x175   :  { %v3929_v52 = vrot.slane %v9597_v17, %v8637_v29  ;;  %v3936_v51 = vrot.slane %v9597_v17, %v8652_v53  ;;  %v3943_v56 = vrot.slane %v9597_v17, %v8655_v54  ;;  %6774 = vperm.xlu0 %8030, %v6223_v48   ;;  %v5952_v31 = vcombine.low %v3474_v12, %v3481_v2 }
 0x176   :  { %v5953_v35 = vcombine.low %v3488_v57, %v3495_v25  ;;  %v5416_v26 = vrot.slane %v5408_v60, %v8675_v21  ;;  %v5423_v19 = vrot.slane %v5409_v42, %v8675_v21  ;;  %v5680_v36 = vcombine.low %v3026_v15, %v3033_v23  ;;  %v11760_v42 = vld [vmem:[#allocation38_spill] sm:$0xff] }
 0x177   :  { %v5681_v27 = vcombine.low %v3040_v37, %v3047_v1  ;;  %v9713_v8 = vpop.xlane.xlu1 %526  ;;  %v5144_v13 = vrot.slane %v5136_v63, %v8675_v21  ;;  %v5151_v24 = vrot.slane %v5137_v22, %v8675_v21  ;;  %v1969_v17 = vrot.slane %v11758_v50, %v8637_v29 }
 0x178   :  { %11759 = vst [vmem:[#allocation32_spill] sm:$0xff] %v9713_v8  ;;  %v1976_v48 = vrot.slane %v11758_v50, %v8652_v53  ;;  %v1983_v12 = vrot.slane %v11758_v50, %v8655_v54  ;;  %6537 = vperm.xlu1 %8031, %v4880_v5   ;;  %v4913_v60 = vrot.slane %v9411_v61, %v8675_v21 }
 0x179   :  { %v2158_v2 = vrot.slane %v11760_v42, %v8634_v28  ;;  %v2165_v63 = vrot.slane %v11760_v42, %v8637_v29  ;;  %v6224_v22 = vcombine.low %v3922_v55, %v3929_v52  ;;  %v6225_v57 = vcombine.low %v3936_v51, %v3943_v56  ;;  %6489 = vperm.xlu0 %8030, %v9265_v4   ;;  %v9748_v56 = vpop.xlane.xlu0 %421 }
 0x17a   :  { %v2172_v25 = vrot.slane %v11760_v42, %v8652_v53  ;;  %v5424_v15 = vcombine.low %v5416_v26, %v5423_v19  ;;  %v5960_v23 = vrot.slane %v5952_v31, %v8675_v21  ;;  %v5967_v5 = vrot.slane %v5953_v35, %v8675_v21 }
 0x17b   :  { %v2179_v61 = vrot.slane %v11760_v42, %v8655_v54  ;;  %v5152_v37 = vcombine.low %v5144_v13, %v5151_v24  ;;  %v9736_v1 = vpop.xlane.xlu1 %481  ;;  %v5688_v50 = vrot.slane %v5680_v36, %v8675_v21  ;;  %v5695_v55 = vrot.slane %v5681_v27, %v8675_v21 }
 0x17c   :  { %11761 = vst [vmem:[#allocation33_spill] sm:$0xff] %v9736_v1  ;;  %v2606_v4 = vrot.slane %v9097_v7, %v8634_v28  ;;  %v2613_v26 = vrot.slane %v9097_v7, %v8637_v29  ;;  %v2620_v52 = vrot.slane %v9097_v7, %v8652_v53  ;;  %v2627_v51 = vrot.slane %v9097_v7, %v8655_v54 }
 0x17d   :  { %6633 = vperm.xlu1 %8031, %v5424_v15   ;;  %v11762_v24 = vrot.slane %v11756_v58, %v8634_v28  ;;  %v9755_v36 = vcombine.low %v2004_v14, %v2011_v38  ;;  %6585 = vperm.xlu0 %8030, %v5152_v37   ;;  %v6232_v27 = vrot.slane %v6224_v22, %v8675_v21  ;;  %v11771_v37 = vld [vmem:[#allocation40_spill] sm:$0xff] }
 0x17e   :  { %v6239_v31 = vrot.slane %v6225_v57, %v8675_v21  ;;  %v9759_v35 = vcombine.low %v1962_v6, %v1969_v17  ;;  %v9761_v19 = vcombine.low %v1976_v48, %v1983_v12  ;;  %v5968_v7 = vcombine.low %v5960_v23, %v5967_v5 }
 0x17f   :  { %v9753_v13 = vcombine.low %v11762_v24, %v1997_v49  ;;  %11764 = vst [vmem:[#allocation85_spill] sm:$0xff] %v9755_v36  ;;  %v11767_v42 = vrot.slane %v9365_v3, %v8675_v21  ;;  %v11768_v58 = vrot.slane %v9363_v32, %v8675_v21  ;;  %v5153_v15 = vcombine.low %v2158_v2, %v2165_v63  ;;  %v9769_v38 = vpop.xlane.xlu1 %436 }
 0x180   :  { %11765 = vst [vmem:[#allocation86_spill] sm:$0xff] %v9759_v35  ;;  %11766 = vst [vmem:[#allocation87_spill] sm:$0xff] %v9761_v19  ;;  %v5696_v14 = vcombine.low %v5688_v50, %v5695_v55  ;;  %v11770_v22 = vrot.slane %v9409_v46, %v8675_v21  ;;  %v5154_v17 = vcombine.low %v2172_v25, %v2179_v61  ;;  %v9794_v61 = vpop.xlane.xlu0 %517 }
 0x181   :  { %11763 = vst [vmem:[#allocation38_spill] sm:$0xff] %v9753_v13  ;;  %v4897_v49 = vcombine.low %v11768_v58, %v11767_v42  ;;  %11769 = vst [vmem:[#allocation88_spill] sm:$0xff] %v9769_v38  ;;  %v5425_v48 = vcombine.low %v2606_v4, %v2613_v26  ;;  %v5426_v12 = vcombine.low %v2620_v52, %v2627_v51  ;;  %6729 = vperm.xlu1 %8031, %v5968_v7   ;;  %v11776_v42 = vld [vmem:[#allocation62_spill] sm:$0xff] }
 0x182   :  { %v9774_v57 = vcombine.low %v11770_v22, %v4913_v60  ;;  %v3054_v3 = vrot.slane %v9337_v45, %v8634_v28  ;;  %v3061_v32 = vrot.slane %v9337_v45, %v8637_v29  ;;  %v3068_v2 = vrot.slane %v9337_v45, %v8652_v53  ;;  %6681 = vperm.xlu0 %8030, %v5696_v14  }
 0x183   :  { %v3075_v46 = vrot.slane %v9337_v45, %v8655_v54  ;;  %v6240_v60 = vcombine.low %v6232_v27, %v6239_v31  ;;  %v3502_v63 = vrot.slane %v9475_v11, %v8634_v28  ;;  %v3509_v25 = vrot.slane %v9475_v11, %v8637_v29  ;;  %v9800_v55 = vpop.xlane.xlu1 %532  ;;  %v11775_v27 = vld [vmem:[#allocation41_spill] sm:$0xff] }
 0x184   :  { %v3516_v23 = vrot.slane %v9475_v11, %v8652_v53  ;;  %v3523_v5 = vrot.slane %v9475_v11, %v8655_v54  ;;  %v2214_v50 = vrot.slane %v11771_v37, %v8634_v28  ;;  %v2221_v45 = vrot.slane %v11771_v37, %v8637_v29  ;;  %11772 = vst [vmem:[#allocation40_spill] sm:$0xff] %v9800_v55 }
 0x185   :  { %v11773_v26 = vrot.slane %v9141_v18, %v8675_v21  ;;  %v11774_v52 = vrot.slane %v9139_v40, %v8675_v21  ;;  %v2228_v51 = vrot.slane %v11771_v37, %v8652_v53  ;;  %v2235_v24 = vrot.slane %v11771_v37, %v8655_v54  ;;  %6444 = vperm.xlu1 %8031, %v11776_v42  }
 0x186   :  { %v2186_v31 = vrot.slane %v11775_v27, %v8634_v28  ;;  %v2193_v7 = vrot.slane %v11775_v27, %v8637_v29  ;;  %6777 = vperm.xlu0 %8030, %v6240_v60   ;;  %v5433_v18 = vrot.slane %v5425_v48, %v8675_v21  ;;  %v5440_v40 = vrot.slane %v5426_v12, %v8675_v21 }
 0x187   :  { %v9810_v11 = vcombine.low %v11774_v52, %v11773_v26  ;;  %v5161_v58 = vrot.slane %v5153_v15, %v8675_v21  ;;  %v5168_v14 = vrot.slane %v5154_v17, %v8675_v21  ;;  %v5697_v22 = vcombine.low %v3054_v3, %v3061_v32  ;;  %v9833_v12 = vpop.xlane.xlu1 %487  ;;  %v11778_v3 = vld [vmem:[#allocation50_spill] sm:$0xff] }
 0x188   :  { %v5698_v26 = vcombine.low %v3068_v2, %v3075_v46  ;;  %v5969_v37 = vcombine.low %v3502_v63, %v3509_v25  ;;  %v5970_v52 = vcombine.low %v3516_v23, %v3523_v5  ;;  %v3950_v6 = vrot.slane %v9627_v10, %v8634_v28  ;;  %11777 = vst [vmem:[#allocation41_spill] sm:$0xff] %v9833_v12  ;;  %v9843_v46 = vpop.xlane.xlu0 %472  ;;  %v11779_v25 = vld [vmem:[#allocation51_spill] sm:$0xff] }
 0x189   :  { %v3957_v4 = vrot.slane %v9627_v10, %v8637_v29  ;;  %v3964_v60 = vrot.slane %v9627_v10, %v8652_v53  ;;  %v3971_v48 = vrot.slane %v9627_v10, %v8655_v54  ;;  %v2200_v15 = vrot.slane %v11775_v27, %v8652_v53  ;;  %6540 = vperm.xlu1 %8031, %v4897_v49  }
 0x18a   :  { %v2207_v17 = vrot.slane %v11775_v27, %v8655_v54  ;;  %v2270_v32 = vrot.slane %v11778_v3, %v8634_v28  ;;  %v2277_v2 = vrot.slane %v11778_v3, %v8637_v29  ;;  %v2284_v10 = vrot.slane %v11778_v3, %v8652_v53  ;;  %v11780_v27 = vld [vmem:[#allocation80_spill] sm:$0xff] }
 0x18b   :  { %v2291_v63 = vrot.slane %v11778_v3, %v8655_v54  ;;  %v2242_v23 = vrot.slane %v11779_v25, %v8634_v28  ;;  %v2249_v5 = vrot.slane %v11779_v25, %v8637_v29  ;;  %6492 = vperm.xlu0 %8030, %v11780_v27   ;;  %v5441_v42 = vcombine.low %v5433_v18, %v5440_v40 }
 0x18c   :  { %v5169_v36 = vcombine.low %v5161_v58, %v5168_v14  ;;  %v5977_v13 = vrot.slane %v5969_v37, %v8675_v21  ;;  %v5984_v49 = vrot.slane %v5970_v52, %v8675_v21  ;;  %v6241_v19 = vcombine.low %v3950_v6, %v3957_v4  ;;  %v9882_v52 = vpop.xlane.xlu0 %427 }
 0x18d   :  { %v6242_v35 = vcombine.low %v3964_v60, %v3971_v48  ;;  %v5705_v16 = vrot.slane %v5697_v22, %v8675_v21  ;;  %v5712_v3 = vrot.slane %v5698_v26, %v8675_v21  ;;  %v2634_v12 = vrot.slane %v11781_v43, %v8634_v28  ;;  %6636 = vperm.xlu1 %8031, %v5441_v42   ;;  %v9874_v22 = vpop.xlane.xlu1 %442  ;;  %v11787_v42 = vld [vmem:[#allocation56_spill] sm:$0xff] }
 0x18e   :  { %v2641_v55 = vrot.slane %v11781_v43, %v8637_v29  ;;  %v2648_v18 = vrot.slane %v11781_v43, %v8652_v53  ;;  %v2655_v40 = vrot.slane %v11781_v43, %v8655_v54  ;;  %v9866_v58 = vcombine.low %v2214_v50, %v2221_v45  ;;  %11782 = vst [vmem:[#allocation62_spill] sm:$0xff] %v9874_v22 }
 0x18f   :  { %v9868_v6 = vcombine.low %v2228_v51, %v2235_v24  ;;  %v9870_v4 = vcombine.low %v2186_v31, %v2193_v7  ;;  %v9872_v14 = vcombine.low %v2200_v15, %v2207_v17  ;;  %6588 = vperm.xlu0 %8030, %v5169_v36   ;;  %v9876_v26 = vcombine.low %v2270_v32, %v2277_v2  ;;  %v11784_v7 = vld [vmem:[#allocation55_spill] sm:$0xff]  ;;  %v11785_v17 = vld [vmem:[#allocation16_spill] sm:$0xff] }
 0x190   :  { %11783 = vst [vmem:[#allocation50_spill] sm:$0xff] %v9882_v52  ;;  %v5985_v50 = vcombine.low %v5977_v13, %v5984_v49  ;;  %v9884_v45 = vcombine.low %v2284_v10, %v2291_v63  ;;  %v5713_v51 = vcombine.low %v5705_v16, %v5712_v3  ;;  %v6249_v24 = vrot.slane %v6241_v19, %v8675_v21 }
 0x191   :  { %v6256_v36 = vrot.slane %v6242_v35, %v8675_v21  ;;  %v9888_v31 = vcombine.low %v2242_v23, %v2249_v5  ;;  %v5442_v48 = vcombine.low %v2634_v12, %v2641_v55  ;;  %v5443_v15 = vcombine.low %v2648_v18, %v2655_v40  ;;  %v9914_v5 = vpop.xlane.xlu1 %538  ;;  %v9924_v40 = vpop.xlane.xlu0 %523 }
 0x192   :  { %6732 = vperm.xlu1 %8031, %v5985_v50   ;;  %v3082_v32 = vrot.slane %v11785_v17, %v8634_v28  ;;  %v3089_v13 = vrot.slane %v11785_v17, %v8637_v29  ;;  %v3096_v16 = vrot.slane %v11785_v17, %v8652_v53  ;;  %v3103_v35 = vrot.slane %v11785_v17, %v8655_v54  ;;  %v11789_v50 = vld [vmem:[#allocation64_spill] sm:$0xff] }
 0x193   :  { %6684 = vperm.xlu0 %8030, %v5713_v51   ;;  %v3530_v19 = vrot.slane %v9493_v59, %v8634_v28  ;;  %v3537_v55 = vrot.slane %v9493_v59, %v8637_v29  ;;  %v3544_v12 = vrot.slane %v9493_v59, %v8652_v53  ;;  %v3551_v2 = vrot.slane %v9493_v59, %v8655_v54 }
 0x194   :  { %v2333_v10 = vrot.slane %v11784_v7, %v8637_v29  ;;  %v2340_v63 = vrot.slane %v11784_v7, %v8652_v53  ;;  %v2347_v23 = vrot.slane %v11784_v7, %v8655_v54  ;;  %11786 = vst [vmem:[#allocation51_spill] sm:$0xff] %v9914_v5  ;;  %v6257_v27 = vcombine.low %v6249_v24, %v6256_v36 }
 0x195   :  { %v2298_v49 = vrot.slane %v11787_v42, %v8634_v28  ;;  %v2305_v3 = vrot.slane %v11787_v42, %v8637_v29  ;;  %v2312_v59 = vrot.slane %v11787_v42, %v8652_v53  ;;  %v2319_v18 = vrot.slane %v11787_v42, %v8655_v54  ;;  %11788 = vst [vmem:[#allocation80_spill] sm:$0xff] %v9924_v40  ;;  %v9961_v22 = vpop.xlane.xlu0 %478 }
 0x196   :  { %6447 = vperm.xlu1 %8031, %v11789_v50   ;;  %v5450_v51 = vrot.slane %v5442_v48, %v8675_v21  ;;  %v5457_v24 = vrot.slane %v5443_v15, %v8675_v21  ;;  %v5178_v36 = vrot.slane %v9870_v4, %v8675_v21  ;;  %v5185_v17 = vrot.slane %v9872_v14, %v8675_v21  ;;  %v11790_v4 = vld [vmem:[#allocation59_spill] sm:$0xff] }
 0x197   :  { %6780 = vperm.xlu0 %8030, %v6257_v27   ;;  %v5714_v60 = vcombine.low %v3082_v32, %v3089_v13  ;;  %v5715_v37 = vcombine.low %v3096_v16, %v3103_v35  ;;  %v5986_v43 = vcombine.low %v3530_v19, %v3537_v55  ;;  %v5987_v5 = vcombine.low %v3544_v12, %v3551_v2  ;;  %v11791_v16 = vld [vmem:[#allocation60_spill] sm:$0xff]  ;;  %v9958_v12 = vpop.permute.xlu1 %6432  ;;  %v11792_v2 = vld [vmem:[#allocation83_spill] sm:$0xff] }
 0x198   :  { %v3978_v42 = vrot.slane %v9668_v9, %v8634_v28  ;;  %v3985_v27 = vrot.slane %v9668_v9, %v8637_v29  ;;  %v3992_v48 = vrot.slane %v9668_v9, %v8652_v53  ;;  %v3999_v15 = vrot.slane %v9668_v9, %v8655_v54 }
 0x199   :  { %v2382_v50 = vrot.slane %v11790_v4, %v8634_v28  ;;  %v2389_v14 = vrot.slane %v11790_v4, %v8637_v29  ;;  %v2396_v32 = vrot.slane %v11790_v4, %v8652_v53  ;;  %v2403_v13 = vrot.slane %v11790_v4, %v8655_v54 }
 0x19a   :  { %6543 = vperm.xlu1 %8031, %v9774_v57   ;;  %v2354_v35 = vrot.slane %v11791_v16, %v8634_v28  ;;  %v2361_v9 = vrot.slane %v11791_v16, %v8637_v29  ;;  %v2368_v19 = vrot.slane %v11791_v16, %v8652_v53  ;;  %v2375_v55 = vrot.slane %v11791_v16, %v8655_v54  ;;  %v11793_v16 = vld [vmem:[#allocation34_spill] sm:$0xff] }
 0x19b   :  { %6495 = vperm.xlu0 %8030, %v11792_v2   ;;  %v5458_v4 = vcombine.low %v5450_v51, %v5457_v24  ;;  %v5186_v57 = vcombine.low %v5178_v36, %v5185_v17  ;;  %v5994_v38 = vrot.slane %v5986_v43, %v8675_v21  ;;  %v6001_v1 = vrot.slane %v5987_v5, %v8675_v21 }
 0x19c   :  { %v6258_v8 = vcombine.low %v3978_v42, %v3985_v27  ;;  %v6259_v40 = vcombine.low %v3992_v48, %v3999_v15  ;;  %v5722_v34 = vrot.slane %v5714_v60, %v8675_v21  ;;  %v5729_v52 = vrot.slane %v5715_v37, %v8675_v21 }
 0x19d   :  { %v2662_v20 = vrot.slane %v11793_v16, %v8634_v28  ;;  %v2669_v2 = vrot.slane %v11793_v16, %v8637_v29  ;;  %v2676_v51 = vrot.slane %v11793_v16, %v8652_v53  ;;  %v2683_v43 = vrot.slane %v11793_v16, %v8655_v54  ;;  %v10000_v16 = vpop.permute.xlu1 %6477 }
 0x19e   :  { %6639 = vperm.xlu1 %8031, %v5458_v4   ;;  %v11794_v5 = vrot.slane %v11779_v25, %v8655_v54  ;;  %v11795_v60 = vrot.slane %v11779_v25, %v8652_v53  ;;  %v11796_v24 = vrot.slane %v11784_v7, %v8634_v28  ;;  %v9988_v17 = vcombine.low %v2340_v63, %v2347_v23 }
 0x19f   :  { %v9990_v42 = vcombine.low %v2298_v49, %v2305_v3  ;;  %6591 = vperm.xlu0 %8030, %v5186_v57   ;;  %v9992_v27 = vcombine.low %v2312_v59, %v2319_v18  ;;  %v9994_v48 = vcombine.low %v2382_v50, %v2389_v14  ;;  %v9996_v15 = vcombine.low %v2396_v32, %v2403_v13  ;;  %v10006_v3 = vpop.xlane.xlu0 %433  ;;  %v11803_v50 = vld [vmem:[#allocation65_spill] sm:$0xff]  ;;  %v11805_v57 = vld [vmem:[#allocation84_spill] sm:$0xff] }
 0x1a0   :  { %v9981_v37 = vcombine.low %v11795_v60, %v11794_v5  ;;  %v9986_v36 = vcombine.low %v11796_v24, %v2333_v10  ;;  %v6002_v4 = vcombine.low %v5994_v38, %v6001_v1  ;;  %v9998_v25 = vcombine.low %v2354_v35, %v2361_v9  ;;  %v11804_v9 = vld [vmem:[#allocation66_spill] sm:$0xff] }
 0x1a1   :  { %11797 = vst [vmem:[#allocation6_spill] sm:$0xff] %v9994_v48  ;;  %11798 = vst [vmem:[#allocation55_spill] sm:$0xff] %v9996_v15  ;;  %v5730_v5 = vcombine.low %v5722_v34, %v5729_v52  ;;  %v6266_v7 = vrot.slane %v6258_v8, %v8675_v21  ;;  %v6273_v10 = vrot.slane %v6259_v40, %v8675_v21 }
 0x1a2   :  { %11799 = vst [vmem:[#allocation16_spill] sm:$0xff] %v9998_v25  ;;  %v10004_v63 = vcombine.low %v2368_v19, %v2375_v55  ;;  %v5459_v23 = vcombine.low %v2662_v20, %v2669_v2  ;;  %v5460_v49 = vcombine.low %v2676_v51, %v2683_v43  ;;  %6735 = vperm.xlu1 %8031, %v6002_v4   ;;  %v10045_v2 = vpop.permute.xlu1 %6480 }
 0x1a3   :  { %v11801_v59 = vrot.slane %v9407_v30, %v8675_v21  ;;  %v11802_v1 = vrot.slane %v9395_v41, %v8675_v21  ;;  %v3110_v34 = vrot.slane %v9516_v44, %v8634_v28  ;;  %v3117_v8 = vrot.slane %v9516_v44, %v8637_v29  ;;  %6687 = vperm.xlu0 %8030, %v5730_v5  }
 0x1a4   :  { %11800 = vst [vmem:[#allocation56_spill] sm:$0xff] %v10004_v63  ;;  %v3124_v20 = vrot.slane %v9516_v44, %v8652_v53  ;;  %v3131_v52 = vrot.slane %v9516_v44, %v8655_v54  ;;  %v3558_v30 = vrot.slane %v9709_v33, %v8634_v28  ;;  %v3565_v41 = vrot.slane %v9709_v33, %v8637_v29 }
 0x1a5   :  { %v4931_v38 = vcombine.low %v11802_v1, %v11801_v59  ;;  %v3572_v18 = vrot.slane %v9709_v33, %v8652_v53  ;;  %v3579_v40 = vrot.slane %v9709_v33, %v8655_v54  ;;  %v2438_v14 = vrot.slane %v11803_v50, %v8634_v28  ;;  %v10053_v59 = vpop.xlane.xlu0 %529 }
 0x1a6   :  { %v2445_v32 = vrot.slane %v11803_v50, %v8637_v29  ;;  %v2452_v44 = vrot.slane %v11803_v50, %v8652_v53  ;;  %v6274_v13 = vcombine.low %v6266_v7, %v6273_v10  ;;  %v2459_v35 = vrot.slane %v11803_v50, %v8655_v54  ;;  %6450 = vperm.xlu1 %8031, %v11805_v57  }
 0x1a7   :  { %v2410_v19 = vrot.slane %v11804_v9, %v8634_v28  ;;  %v2417_v55 = vrot.slane %v11804_v9, %v8637_v29  ;;  %v2424_v33 = vrot.slane %v11804_v9, %v8652_v53  ;;  %v5467_v51 = vrot.slane %v5459_v23, %v8675_v21 }
 0x1a8   :  { %6783 = vperm.xlu0 %8030, %v6274_v13   ;;  %v5474_v43 = vrot.slane %v5460_v49, %v8675_v21  ;;  %v5195_v60 = vrot.slane %v9866_v58, %v8675_v21  ;;  %v5202_v24 = vrot.slane %v9868_v6, %v8675_v21  ;;  %v5731_v4 = vcombine.low %v3110_v34, %v3117_v8  ;;  %v11808_v8 = vld [vmem:[#allocation44_spill] sm:$0xff] }
 0x1a9   :  { %v5732_v5 = vcombine.low %v3124_v20, %v3131_v52  ;;  %v6003_v7 = vcombine.low %v3558_v30, %v3565_v41  ;;  %v6004_v10 = vcombine.low %v3572_v18, %v3579_v40  ;;  %v4006_v1 = vrot.slane %v9564_v47, %v8634_v28  ;;  %v11809_v52 = vld [vmem:[#allocation7_spill] sm:$0xff]  ;;  %v11810_v18 = vld [vmem:[#allocation8_spill] sm:$0xff] }
 0x1aa   :  { %v4013_v23 = vrot.slane %v9564_v47, %v8637_v29  ;;  %v4020_v49 = vrot.slane %v9564_v47, %v8652_v53  ;;  %v4027_v58 = vrot.slane %v9564_v47, %v8655_v54  ;;  %v10063_v50 = vcombine.low %v2438_v14, %v2445_v32  ;;  %6546 = vperm.xlu1 %8031, %v4931_v38  }
 0x1ab   :  { %v10065_v6 = vcombine.low %v2452_v44, %v2459_v35  ;;  %v2431_v34 = vrot.slane %v11804_v9, %v8655_v54  ;;  %v4403_v20 = vrot.slane %v11808_v8, %v8675_v21  ;;  %v2718_v30 = vrot.slane %v11809_v52, %v8634_v28  ;;  %v10082_v9 = vpop.permute.xlu1 %6525 }
 0x1ac   :  { %11806 = vst [vmem:[#allocation64_spill] sm:$0xff] %v10063_v50  ;;  %v2725_v41 = vrot.slane %v11809_v52, %v8637_v29  ;;  %v2690_v47 = vrot.slane %v11810_v18, %v8634_v28  ;;  %6498 = vperm.xlu0 %8030, %v9810_v11   ;;  %v5203_v40 = vcombine.low %v5195_v60, %v5202_v24  ;;  %v10090_v60 = vpop.xlane.xlu0 %484  ;;  %v11813_v24 = vlaneseq }
 0x1ad   :  { %11807 = vst [vmem:[#allocation59_spill] sm:$0xff] %v10065_v6  ;;  %v2697_v14 = vrot.slane %v11810_v18, %v8637_v29  ;;  %v5475_v32 = vcombine.low %v5467_v51, %v5474_v43  ;;  %v6011_v38 = vrot.slane %v6003_v7, %v8675_v21  ;;  %v6018_v44 = vrot.slane %v6004_v10, %v8675_v21  ;;  %v11814_v43 = vld [vmem:[#allocation43_spill] sm:$0xff] }
 0x1ae   :  { %v6275_v13 = vcombine.low %v4006_v1, %v4013_v23  ;;  %v6276_v35 = vcombine.low %v4020_v49, %v4027_v58  ;;  %v5739_v57 = vrot.slane %v5731_v4, %v8675_v21  ;;  %v5746_v8 = vrot.slane %v5732_v5, %v8675_v21 }
 0x1af   :  { %v10086_v6 = vcombine.low %v2410_v19, %v2417_v55  ;;  %v10088_v11 = vcombine.low %v2424_v33, %v2431_v34  ;;  %v10093_v51 = vand.u32 127, %v11813_v24  ;;  %6642 = vperm.xlu1 %8031, %v5475_v32   ;;  %v11815_v7 = vrot.slane %v11814_v43, %v8675_v21  ;;  %v11816_v55 = vld [vmem:[#allocation69_spill] sm:$0xff] }
 0x1b0   :  { %v2732_v1 = vrot.slane %v11809_v52, %v8652_v53  ;;  %v2739_v4 = vrot.slane %v11809_v52, %v8655_v54  ;;  %v2704_v19 = vrot.slane %v11810_v18, %v8652_v53  ;;  %6594 = vperm.xlu0 %8030, %v5203_v40   ;;  %v4668_v33 = vrot.slane %v11816_v55, %v8675_v21  ;;  %v11817_v52 = vld [vmem:[#allocation70_spill] sm:$0xff] }
 0x1b1   :  { %11811 = vst [vmem:[#allocation60_spill] sm:$0xff] %v10086_v6  ;;  %11812 = vst [vmem:[#allocation83_spill] sm:$0xff] %v10088_v11  ;;  %v4404_v10 = vcombine.low %v11815_v7, %v4403_v20  ;;  %v10106_v5 = vcombine.low %v2718_v30, %v2725_v41  ;;  %v2711_v23 = vrot.slane %v11810_v18, %v8655_v54  ;;  %v11819_v7 = vld [vmem:[#allocation19_spill] sm:$0xff] }
 0x1b2   :  { %v5476_v49 = vcombine.low %v2690_v47, %v2697_v14  ;;  %v6019_v58 = vcombine.low %v6011_v38, %v6018_v44  ;;  %v5747_v34 = vcombine.low %v5739_v57, %v5746_v8  ;;  %v6283_v20 = vrot.slane %v6275_v13, %v8675_v21  ;;  %v10130_v13 = vpop.permute.xlu1 %6528  ;;  %v11818_v57 = vld [vmem:[#allocation10_spill] sm:$0xff]  ;;  %v10134_v8 = vpop.xlane.xlu0 %439 }
 0x1b3   :  { %v6290_v32 = vrot.slane %v6276_v35, %v8675_v21  ;;  %v4675_v24 = vrot.slane %v11817_v52, %v8675_v21  ;;  %v3586_v40 = vrot.slane %v9589_v62, %v8634_v28  ;;  %v3593_v30 = vrot.slane %v9589_v62, %v8637_v29 }
 0x1b4   :  { %v3600_v41 = vrot.slane %v9589_v62, %v8652_v53  ;;  %v3607_v18 = vrot.slane %v9589_v62, %v8655_v54  ;;  %6738 = vperm.xlu1 %8031, %v6019_v58   ;;  %v3138_v47 = vrot.slane %v9748_v56, %v8634_v28  ;;  %v3145_v14 = vrot.slane %v9748_v56, %v8637_v29 }
 0x1b5   :  { %v3152_v38 = vrot.slane %v9748_v56, %v8652_v53  ;;  %v3159_v44 = vrot.slane %v9748_v56, %v8655_v54  ;;  %6690 = vperm.xlu0 %8030, %v5747_v34   ;;  %v5477_v35 = vcombine.low %v2704_v19, %v2711_v23  ;;  %v2774_v62 = vrot.slane %v11818_v57, %v8634_v28  ;;  %v11820_v34 = vld [vmem:[#allocation68_spill] sm:$0xff] }
 0x1b6   :  { %v4940_v43 = vrot.slane %v9546_v0, %v8675_v21  ;;  %v4947_v55 = vrot.slane %v11819_v7, %v8675_v21  ;;  %v2781_v58 = vrot.slane %v11818_v57, %v8637_v29  ;;  %v2788_v56 = vrot.slane %v11818_v57, %v8652_v53 }
 0x1b7   :  { %v2795_v19 = vrot.slane %v11818_v57, %v8655_v54  ;;  %v6291_v23 = vcombine.low %v6283_v20, %v6290_v32  ;;  %v2746_v52 = vrot.slane %v11820_v34, %v8634_v28  ;;  %v2753_v50 = vrot.slane %v11820_v34, %v8637_v29 }
 0x1b8   :  { %v6020_v0 = vcombine.low %v3586_v40, %v3593_v30  ;;  %6453 = vperm.xlu1 %8031, %v4404_v10   ;;  %v4676_v11 = vcombine.low %v4668_v33, %v4675_v24  ;;  %v6021_v7 = vcombine.low %v3600_v41, %v3607_v18  ;;  %v5748_v6 = vcombine.low %v3138_v47, %v3145_v14  ;;  %v10160_v33 = vpop.permute.xlu1 %6573  ;;  %v10174_v14 = vpop.xlane.xlu0 %535 }
 0x1b9   :  { %v5749_v15 = vcombine.low %v3152_v38, %v3159_v44  ;;  %v4034_v48 = vrot.slane %v9794_v61, %v8634_v28  ;;  %6786 = vperm.xlu0 %8030, %v6291_v23   ;;  %v4041_v57 = vrot.slane %v9794_v61, %v8637_v29  ;;  %v4948_v20 = vcombine.low %v4940_v43, %v4947_v55 }
 0x1ba   :  { %v5484_v32 = vrot.slane %v5476_v49, %v8675_v21  ;;  %v5491_v63 = vrot.slane %v5477_v35, %v8675_v21  ;;  %v4048_v40 = vrot.slane %v9794_v61, %v8652_v53  ;;  %v4055_v10 = vrot.slane %v9794_v61, %v8655_v54  ;;  %11821 = vst [vmem:[#allocation34_spill] sm:$0xff] %v10160_v33 }
 0x1bb   :  { %v5212_v24 = vrot.slane %v9888_v31, %v8675_v21  ;;  %v5219_v30 = vrot.slane %v9981_v37, %v8675_v21  ;;  %v10166_v41 = vcombine.low %v2732_v1, %v2739_v4  ;;  %v10168_v18 = vcombine.low %v2774_v62, %v2781_v58  ;;  %11822 = vst [vmem:[#allocation65_spill] sm:$0xff] %v10174_v14  ;;  %v11823_v31 = vld [vmem:[#allocation12_spill] sm:$0xff] }
 0x1bc   :  { %v2760_v49 = vrot.slane %v11820_v34, %v8652_v53  ;;  %v2767_v47 = vrot.slane %v11820_v34, %v8655_v54  ;;  %6549 = vperm.xlu1 %8031, %v4948_v20   ;;  %v10176_v61 = vcombine.low %v2788_v56, %v2795_v19  ;;  %v10178_v38 = vcombine.low %v2746_v52, %v2753_v50 }
 0x1bd   :  { %v2830_v37 = vrot.slane %v11823_v31, %v8634_v28  ;;  %v2837_v1 = vrot.slane %v11823_v31, %v8637_v29  ;;  %6501 = vperm.xlu0 %8030, %v4676_v11   ;;  %v6292_v4 = vcombine.low %v4034_v48, %v4041_v57  ;;  %v5492_v44 = vcombine.low %v5484_v32, %v5491_v63  ;;  %v11824_v63 = vld [vmem:[#allocation71_spill] sm:$0xff]  ;;  %v10209_v57 = vpop.xlane.xlu0 %490  ;;  %v11827_v32 = vld [vmem:[#allocation37_spill] sm:$0xff] }
 0x1be   :  { %v6028_v35 = vrot.slane %v6020_v0, %v8675_v21  ;;  %v6035_v62 = vrot.slane %v6021_v7, %v8675_v21  ;;  %v6293_v43 = vcombine.low %v4048_v40, %v4055_v10  ;;  %v5220_v55 = vcombine.low %v5212_v24, %v5219_v30  ;;  %v10205_v0 = vpop.permute.xlu1 %6576  ;;  %11826 = vst [vmem:[#allocation66_spill] sm:$0xff] %v10209_v57  ;;  %v11828_v10 = vld [vmem:[#allocation42_spill] sm:$0xff]  ;;  %v11834_v57 = vld [vmem:[#allocation9_spill] sm:$0xff] }
 0x1bf   :  { %v5756_v58 = vrot.slane %v5748_v6, %v8675_v21  ;;  %v5763_v50 = vrot.slane %v5749_v15, %v8675_v21  ;;  %v10188_v56 = vcombine.low %v2760_v49, %v2767_v47  ;;  %v2844_v19 = vrot.slane %v11823_v31, %v8652_v53  ;;  %v11825_v6 = vld [vmem:[#allocation20_spill] sm:$0xff] }
 0x1c0   :  { %v2851_v11 = vrot.slane %v11823_v31, %v8655_v54  ;;  %v6818_v48 = vadd.s32 4294967288, %v10093_v51  ;;  %6645 = vperm.xlu1 %8031, %v5492_v44   ;;  %v2802_v23 = vrot.slane %v11824_v63, %v8634_v28  ;;  %v2809_v34 = vrot.slane %v11824_v63, %v8637_v29 }
 0x1c1   :  { %v2816_v15 = vrot.slane %v11824_v63, %v8652_v53  ;;  %v10203_v52 = vsub.s32 %v10093_v51, %v11825_v6  ;;  %6597 = vperm.xlu0 %8030, %v5220_v55   ;;  %v2823_v7 = vrot.slane %v11824_v63, %v8655_v54  ;;  %v6036_v20 = vcombine.low %v6028_v35, %v6035_v62 }
 0x1c2   :  { %v4413_v40 = vrot.slane %v11827_v32, %v8675_v21  ;;  %v4420_v24 = vrot.slane %v11828_v10, %v8675_v21  ;;  %v10215_v30 = vcombine.low %v2830_v37, %v2837_v1  ;;  %v5764_v49 = vcombine.low %v5756_v58, %v5763_v50  ;;  %v10244_v32 = vpop.permute.xlu1 %6621 }
 0x1c3   :  { %v6300_v47 = vrot.slane %v6292_v4, %v8675_v21  ;;  %v6307_v31 = vrot.slane %v6293_v43, %v8675_v21  ;;  %v10219_v44 = vcombine.low %v2844_v19, %v2851_v11  ;;  %v3166_v55 = vrot.slane %v9608_v39, %v8634_v28  ;;  %v11831_v19 = vld [vmem:[#allocation17_spill] sm:$0xff]  ;;  %11833 = vst [vmem:[#allocation7_spill] sm:$0xff] %v10244_v32 }
 0x1c4   :  { %11829 = vst [vmem:[#allocation84_spill] sm:$0xff] %v10215_v30  ;;  %v3173_v35 = vrot.slane %v9608_v39, %v8637_v29  ;;  %v10226_v62 = vsub.s32 %v6818_v48, %v11825_v6  ;;  %6741 = vperm.xlu1 %8031, %v6036_v20   ;;  %v3180_v37 = vrot.slane %v9608_v39, %v8652_v53  ;;  %v11832_v48 = vld [vmem:[#allocation18_spill] sm:$0xff]  ;;  %v10256_v30 = vpop.permute.xlu0 %6429 }
 0x1c5   :  { %11830 = vst [vmem:[#allocation44_spill] sm:$0xff] %v10219_v44  ;;  %v3614_v1 = vrot.slane %v9843_v46, %v8634_v28  ;;  %v3621_v4 = vrot.slane %v9843_v46, %v8637_v29  ;;  %v3628_v43 = vrot.slane %v9843_v46, %v8652_v53  ;;  %6693 = vperm.xlu0 %8030, %v5764_v49   ;;  %v11835_v49 = vld [vmem:[#allocation67_spill] sm:$0xff] }
 0x1c6   :  { %v3635_v58 = vrot.slane %v9843_v46, %v8655_v54  ;;  %v4421_v50 = vcombine.low %v4413_v40, %v4420_v24  ;;  %v4957_v11 = vrot.slane %v11831_v19, %v8675_v21  ;;  %v4964_v63 = vrot.slane %v11832_v48, %v8675_v21  ;;  %v11836_v19 = vld [vmem:[#allocation26_spill] sm:$0xff] }
 0x1c7   :  { %v3187_v20 = vrot.slane %v9608_v39, %v8655_v54  ;;  %v6308_v10 = vcombine.low %v6300_v47, %v6307_v31  ;;  %v4685_v14 = vrot.slane %v11834_v57, %v8675_v21  ;;  %v4692_v44 = vrot.slane %v11835_v49, %v8675_v21 }
 0x1c8   :  { %v10250_v46 = vcombine.low %v2802_v23, %v2809_v34  ;;  %v10252_v40 = vcombine.low %v2816_v15, %v2823_v7  ;;  %v5765_v24 = vcombine.low %v3166_v55, %v3173_v35  ;;  %v4062_v48 = vrot.slane %v11836_v19, %v8634_v28  ;;  %6456 = vperm.xlu1 %8031, %v4421_v50   ;;  %v10268_v35 = vpop.permute.xlu1 %6669 }
 0x1c9   :  { %v4069_v39 = vrot.slane %v11836_v19, %v8637_v29  ;;  %v4076_v57 = vrot.slane %v11836_v19, %v8652_v53  ;;  %v4083_v47 = vrot.slane %v11836_v19, %v8655_v54  ;;  %v6037_v23 = vcombine.low %v3614_v1, %v3621_v4  ;;  %6789 = vperm.xlu0 %8030, %v6308_v10   ;;  %v11838_v1 = vld [vmem:[#allocation72_spill] sm:$0xff] }
 0x1ca   :  { %v6038_v34 = vcombine.low %v3628_v43, %v3635_v58  ;;  %v4965_v15 = vcombine.low %v4957_v11, %v4964_v63  ;;  %v5501_v7 = vrot.slane %v10106_v5, %v8675_v21  ;;  %v5508_v31 = vrot.slane %v10166_v41, %v8675_v21  ;;  %11837 = vst [vmem:[#allocation8_spill] sm:$0xff] %v10268_v35 }
 0x1cb   :  { %v5766_v55 = vcombine.low %v3180_v37, %v3187_v20  ;;  %v4693_v50 = vcombine.low %v4685_v14, %v4692_v44  ;;  %v5229_v49 = vrot.slane %v9876_v26, %v8675_v21  ;;  %v5236_v19 = vrot.slane %v9884_v45, %v8675_v21  ;;  %v10282_v37 = vpop.permute.xlu0 %6624  ;;  %v11839_v44 = vld [vmem:[#allocation31_spill] sm:$0xff] }
 0x1cc   :  { %v2858_v4 = vrot.slane %v11838_v1, %v8634_v28  ;;  %v2865_v43 = vrot.slane %v11838_v1, %v8637_v29  ;;  %v2872_v5 = vrot.slane %v11838_v1, %v8652_v53  ;;  %v2879_v41 = vrot.slane %v11838_v1, %v8655_v54  ;;  %6552 = vperm.xlu1 %8031, %v4965_v15  }
 0x1cd   :  { %v6309_v14 = vcombine.low %v4062_v48, %v4069_v39  ;;  %v6310_v26 = vcombine.low %v4076_v57, %v4083_v47  ;;  %v3642_v45 = vrot.slane %v11839_v44, %v8634_v28  ;;  %v3649_v58 = vrot.slane %v11839_v44, %v8637_v29  ;;  %6504 = vperm.xlu0 %8030, %v4693_v50   ;;  %v10294_v48 = vpop.permute.xlu1 %6717 }
 0x1ce   :  { %v3656_v11 = vrot.slane %v11839_v44, %v8652_v53  ;;  %v5509_v63 = vcombine.low %v5501_v7, %v5508_v31  ;;  %v6045_v20 = vrot.slane %v6037_v23, %v8675_v21  ;;  %v6052_v10 = vrot.slane %v6038_v34, %v8675_v21  ;;  %11840 = vst [vmem:[#allocation43_spill] sm:$0xff] %v10294_v48 }
 0x1cf   :  { %v3663_v15 = vrot.slane %v11839_v44, %v8655_v54  ;;  %v5237_v39 = vcombine.low %v5229_v49, %v5236_v19  ;;  %v5773_v57 = vrot.slane %v5765_v24, %v8675_v21  ;;  %v5780_v47 = vrot.slane %v5766_v55, %v8675_v21  ;;  %v10306_v31 = vpop.permute.xlu0 %6672  ;;  %v11845_v24 = vld [vmem:[#allocation50_spill] sm:$0xff] }
 0x1d0   :  { %v10304_v34 = vcombine.low %v2858_v4, %v2865_v43  ;;  %11843 = vst [vmem:[#allocation70_spill] sm:$0xff] %v10306_v31  ;;  %6648 = vperm.xlu1 %8031, %v5509_v63   ;;  %v10308_v44 = vcombine.low %v2872_v5, %v2879_v41  ;;  %v3194_v49 = vrot.slane %v11845_v24, %v8634_v28  ;;  %v11846_v4 = vld [vmem:[#allocation47_spill] sm:$0xff]  ;;  %v11847_v63 = vld [vmem:[#allocation48_spill] sm:$0xff] }
 0x1d1   :  { %v3201_v55 = vrot.slane %v11845_v24, %v8637_v29  ;;  %v3208_v19 = vrot.slane %v11845_v24, %v8652_v53  ;;  %6600 = vperm.xlu0 %8030, %v5237_v39   ;;  %v10316_v1 = vcombine.low %v3642_v45, %v3649_v58  ;;  %v6053_v23 = vcombine.low %v6045_v20, %v6052_v10  ;;  %v10324_v7 = vpop.permute.xlu1 %6765  ;;  %v11849_v39 = vld [vmem:[#allocation39_spill] sm:$0xff]  ;;  %v11853_v31 = vld [vmem:[#allocation36_spill] sm:$0xff] }
 0x1d2   :  { %11842 = vst [vmem:[#allocation69_spill] sm:$0xff] %v10304_v34  ;;  %11844 = vst [vmem:[#allocation10_spill] sm:$0xff] %v10308_v44  ;;  %v4430_v43 = vrot.slane %v11846_v4, %v8675_v21  ;;  %v4437_v5 = vrot.slane %v11847_v63, %v8675_v21  ;;  %v10322_v41 = vcombine.low %v3656_v11, %v3663_v15  ;;  %v11852_v63 = vld [vmem:[#allocation25_spill] sm:$0xff] }
 0x1d3   :  { %11848 = vst [vmem:[#allocation19_spill] sm:$0xff] %v10324_v7  ;;  %v5781_v50 = vcombine.low %v5773_v57, %v5780_v47  ;;  %v6317_v44 = vrot.slane %v6309_v14, %v8675_v21  ;;  %v6324_v34 = vrot.slane %v6310_v26, %v8675_v21  ;;  %v3222_v45 = vrot.slane %v11849_v39, %v8634_v28  ;;  %v10336_v10 = vpop.permute.xlu0 %6720  ;;  %v11851_v26 = vld [vmem:[#allocation80_spill] sm:$0xff] }
 0x1d4   :  { %v3229_v58 = vrot.slane %v11849_v39, %v8637_v29  ;;  %v3236_v20 = vrot.slane %v11849_v39, %v8652_v53  ;;  %v3215_v11 = vrot.slane %v11845_v24, %v8655_v54  ;;  %11850 = vst [vmem:[#allocation68_spill] sm:$0xff] %v10336_v10  ;;  %6744 = vperm.xlu1 %8031, %v6053_v23   ;;  %v11854_v10 = vld [vmem:[#allocation73_spill] sm:$0xff] }
 0x1d5   :  { %v3243_v14 = vrot.slane %v11849_v39, %v8655_v54  ;;  %v4090_v15 = vrot.slane %v11851_v26, %v8634_v28  ;;  %v4097_v57 = vrot.slane %v11851_v26, %v8637_v29  ;;  %v4104_v47 = vrot.slane %v11851_v26, %v8652_v53  ;;  %6696 = vperm.xlu0 %8030, %v5781_v50   ;;  %v10354_v7 = vpop.permute.xlu1 %6435  ;;  %v11855_v50 = vld [vmem:[#allocation74_spill] sm:$0xff] }
 0x1d6   :  { %v4111_v4 = vrot.slane %v11851_v26, %v8655_v54  ;;  %v4438_v24 = vcombine.low %v4430_v43, %v4437_v5  ;;  %v4974_v23 = vrot.slane %v11852_v63, %v8675_v21  ;;  %v4981_v39 = vrot.slane %v11853_v31, %v8675_v21  ;;  %v11856_v5 = vld [vmem:[#allocation32_spill] sm:$0xff] }
 0x1d7   :  { %v10352_v35 = vcombine.low %v3194_v49, %v3201_v55  ;;  %v6325_v48 = vcombine.low %v6317_v44, %v6324_v34  ;;  %v4702_v32 = vrot.slane %v11854_v10, %v8675_v21  ;;  %v4709_v25 = vrot.slane %v11855_v50, %v8675_v21  ;;  %v10366_v49 = vpop.permute.xlu0 %6768 }
 0x1d8   :  { %v10360_v33 = vcombine.low %v3222_v45, %v3229_v58  ;;  %v5783_v43 = vcombine.low %v3208_v19, %v3215_v11  ;;  %v4118_v26 = vrot.slane %v11856_v5, %v8634_v28  ;;  %v4125_v31 = vrot.slane %v11856_v5, %v8637_v29  ;;  %6459 = vperm.xlu1 %8031, %v4438_v24  }
 0x1d9   :  { %v10368_v55 = vcombine.low %v3236_v20, %v3243_v14  ;;  %v4132_v34 = vrot.slane %v11856_v5, %v8652_v53  ;;  %v4139_v44 = vrot.slane %v11856_v5, %v8655_v54  ;;  %v10374_v45 = vcombine.low %v4090_v15, %v4097_v57  ;;  %6792 = vperm.xlu0 %8030, %v6325_v48   ;;  %v10384_v14 = vpop.permute.xlu1 %6531 }
 0x1da   :  { %v10376_v19 = vcombine.low %v4104_v47, %v4111_v4  ;;  %v4982_v58 = vcombine.low %v4974_v23, %v4981_v39  ;;  %v5518_v11 = vrot.slane %v10178_v38, %v8675_v21  ;;  %v5525_v10 = vrot.slane %v10188_v56, %v8675_v21  ;;  %11857 = vst [vmem:[#allocation12_spill] sm:$0xff] %v10384_v14 }
 0x1db   :  { %v3670_v20 = vrot.slane %v9961_v22, %v8634_v28  ;;  %v4710_v24 = vcombine.low %v4702_v32, %v4709_v25  ;;  %v5246_v15 = vrot.slane %v9990_v42, %v8675_v21  ;;  %v5253_v48 = vrot.slane %v9992_v27, %v8675_v21  ;;  %v10398_v4 = vpop.permute.xlu0 %6483  ;;  %v11859_v25 = vld [vmem:[#allocation33_spill] sm:$0xff] }
 0x1dc   :  { %v10390_v57 = vcombine.low %v4118_v26, %v4125_v31  ;;  %v3677_v38 = vrot.slane %v9961_v22, %v8637_v29  ;;  %v3684_v56 = vrot.slane %v9961_v22, %v8652_v53  ;;  %v3691_v47 = vrot.slane %v9961_v22, %v8655_v54  ;;  %11858 = vst [vmem:[#allocation71_spill] sm:$0xff] %v10398_v4 }
 0x1dd   :  { %6555 = vperm.xlu1 %8031, %v4982_v58   ;;  %v3698_v42 = vrot.slane %v11859_v25, %v8634_v28  ;;  %v3705_v27 = vrot.slane %v11859_v25, %v8637_v29  ;;  %v3712_v32 = vrot.slane %v11859_v25, %v8652_v53  ;;  %v3719_v63 = vrot.slane %v11859_v25, %v8655_v54  ;;  %v10416_v26 = vpop.permute.xlu1 %6627 }
 0x1de   :  { %6507 = vperm.xlu0 %8030, %v4710_v24   ;;  %v3250_v23 = vrot.slane %v10006_v3, %v8634_v28  ;;  %v5526_v22 = vcombine.low %v5518_v11, %v5525_v10  ;;  %v6062_v39 = vrot.slane %v10316_v1, %v8675_v21  ;;  %v6069_v50 = vrot.slane %v10322_v41, %v8675_v21 }
 0x1df   :  { %v3257_v5 = vrot.slane %v10006_v3, %v8637_v29  ;;  %11860 = vst [vmem:[#allocation20_spill] sm:$0xff] %v10416_v26  ;;  %v5254_v31 = vcombine.low %v5246_v15, %v5253_v48  ;;  %v5790_v58 = vrot.slane %v10352_v35, %v8675_v21  ;;  %v5797_v24 = vrot.slane %v5783_v43, %v8675_v21  ;;  %v10429_v41 = vpop.permute.xlu0 %6579  ;;  %v11862_v15 = vld [vmem:[#allocation88_spill] sm:$0xff] }
 0x1e0   :  { %v10421_v25 = vcombine.low %v4132_v34, %v4139_v44  ;;  %v10423_v11 = vcombine.low %v3670_v20, %v3677_v38  ;;  %v10425_v10 = vcombine.low %v3684_v56, %v3691_v47  ;;  %v3264_v1 = vrot.slane %v10006_v3, %v8652_v53  ;;  %11861 = vst [vmem:[#allocation37_spill] sm:$0xff] %v10429_v41  ;;  %v11863_v20 = vld [vmem:[#allocation45_spill] sm:$0xff]  ;;  %v11864_v56 = vld [vmem:[#allocation46_spill] sm:$0xff] }
 0x1e1   :  { %6651 = vperm.xlu1 %8031, %v5526_v22   ;;  %v10431_v4 = vcombine.low %v3698_v42, %v3705_v27  ;;  %v3278_v48 = vrot.slane %v11862_v15, %v8634_v28  ;;  %v3285_v35 = vrot.slane %v11862_v15, %v8637_v29  ;;  %v3271_v43 = vrot.slane %v10006_v3, %v8655_v54  ;;  %v10447_v27 = vpop.permute.xlu1 %6723 }
 0x1e2   :  { %6603 = vperm.xlu0 %8030, %v5254_v31   ;;  %v10439_v34 = vcombine.low %v3712_v32, %v3719_v63  ;;  %v6070_v44 = vcombine.low %v6062_v39, %v6069_v50  ;;  %v4447_v38 = vrot.slane %v11863_v20, %v8675_v21  ;;  %v4454_v47 = vrot.slane %v11864_v56, %v8675_v21  ;;  %v11867_v20 = vld [vmem:[#allocation21_spill] sm:$0xff] }
 0x1e3   :  { %v10445_v42 = vcombine.low %v3250_v23, %v3257_v5  ;;  %v5798_v22 = vcombine.low %v5790_v58, %v5797_v24  ;;  %v6334_v41 = vrot.slane %v10374_v45, %v8675_v21  ;;  %v6341_v3 = vrot.slane %v10376_v19, %v8675_v21  ;;  %v10461_v50 = vpop.permute.xlu0 %6675  ;;  %v11866_v58 = vld [vmem:[#allocation40_spill] sm:$0xff] }
 0x1e4   :  { %v3292_v32 = vrot.slane %v11862_v15, %v8652_v53  ;;  %v3299_v63 = vrot.slane %v11862_v15, %v8655_v54  ;;  %v4146_v39 = vrot.slane %v10053_v59, %v8634_v28  ;;  %v4153_v23 = vrot.slane %v10053_v59, %v8637_v29  ;;  %11865 = vst [vmem:[#allocation42_spill] sm:$0xff] %v10461_v50  ;;  %v11870_v50 = vld [vmem:[#allocation11_spill] sm:$0xff] }
 0x1e5   :  { %6747 = vperm.xlu1 %8031, %v6070_v44   ;;  %v10463_v5 = vcombine.low %v3278_v48, %v3285_v35  ;;  %v10465_v45 = vcombine.low %v3264_v1, %v3271_v43  ;;  %v4160_v19 = vrot.slane %v10053_v59, %v8652_v53  ;;  %v4167_v31 = vrot.slane %v10053_v59, %v8655_v54  ;;  %v11868_v44 = vld [vmem:[#allocation22_spill] sm:$0xff]  ;;  %v10479_v35 = vpop.permute.xlu1 %6438 }
 0x1e6   :  { %6699 = vperm.xlu0 %8030, %v5798_v22   ;;  %v4174_v24 = vrot.slane %v11866_v58, %v8634_v28  ;;  %v4455_v15 = vcombine.low %v4447_v38, %v4454_v47  ;;  %v4991_v56 = vrot.slane %v11867_v20, %v8675_v21  ;;  %v4998_v48 = vrot.slane %v11868_v44, %v8675_v21  ;;  %v11871_v22 = vld [vmem:[#allocation13_spill] sm:$0xff] }
 0x1e7   :  { %v4181_v1 = vrot.slane %v11866_v58, %v8637_v29  ;;  %11869 = vst [vmem:[#allocation17_spill] sm:$0xff] %v10479_v35  ;;  %v6342_v43 = vcombine.low %v6334_v41, %v6341_v3  ;;  %v4719_v59 = vrot.slane %v11870_v50, %v8675_v21  ;;  %v4726_v26 = vrot.slane %v11871_v22, %v8675_v21  ;;  %v10493_v44 = vpop.permute.xlu0 %6771 }
 0x1e8   :  { %v10485_v14 = vcombine.low %v3292_v32, %v3299_v63  ;;  %v4188_v38 = vrot.slane %v11866_v58, %v8652_v53  ;;  %v4195_v47 = vrot.slane %v11866_v58, %v8655_v54  ;;  %v10491_v20 = vcombine.low %v4146_v39, %v4153_v23  ;;  %11872 = vst [vmem:[#allocation18_spill] sm:$0xff] %v10493_v44 }
 0x1e9   :  { %6462 = vperm.xlu1 %8031, %v4455_v15   ;;  %v3726_v41 = vrot.slane %v10090_v60, %v8634_v28  ;;  %v3733_v3 = vrot.slane %v10090_v60, %v8637_v29  ;;  %v3740_v32 = vrot.slane %v10090_v60, %v8652_v53  ;;  %v3747_v63 = vrot.slane %v10090_v60, %v8655_v54  ;;  %v10511_v22 = vpop.permute.xlu1 %6534 }
 0x1ea   :  { %6795 = vperm.xlu0 %8030, %v6342_v43   ;;  %v10503_v50 = vcombine.low %v4160_v19, %v4167_v31  ;;  %v4999_v39 = vcombine.low %v4991_v56, %v4998_v48  ;;  %v5535_v23 = vrot.slane %v10168_v18, %v8675_v21  ;;  %v5542_v58 = vrot.slane %v10176_v61, %v8675_v21  ;;  %v11873_v19 = vld [vmem:[#allocation41_spill] sm:$0xff]  ;;  %v11890_v48 = vld [vmem:[#allocation75_spill] sm:$0xff] }
 0x1eb   :  { %v10509_v15 = vcombine.low %v4174_v24, %v4181_v1  ;;  %v4727_v44 = vcombine.low %v4719_v59, %v4726_v26  ;;  %v5263_v35 = vrot.slane %v9986_v36, %v8675_v21  ;;  %v5270_v60 = vrot.slane %v9988_v17, %v8675_v21  ;;  %v10525_v56 = vpop.permute.xlu0 %6486 }
 0x1ec   :  { %v3754_v31 = vrot.slane %v11873_v19, %v8634_v28  ;;  %v3761_v18 = vrot.slane %v11873_v19, %v8637_v29  ;;  %v3768_v61 = vrot.slane %v11873_v19, %v8652_v53  ;;  %v3775_v24 = vrot.slane %v11873_v19, %v8655_v54 }
 0x1ed   :  { %6558 = vperm.xlu1 %8031, %v4999_v39   ;;  %v10527_v26 = vcombine.low %v4188_v38, %v4195_v47  ;;  %v10529_v36 = vcombine.low %v3726_v41, %v3733_v3  ;;  %v10531_v17 = vcombine.low %v3740_v32, %v3747_v63  ;;  %v5543_v43 = vcombine.low %v5535_v23, %v5542_v58  ;;  %v10543_v47 = vpop.permute.xlu1 %6630 }
 0x1ee   :  { %6510 = vperm.xlu0 %8030, %v4727_v44   ;;  %v6079_v59 = vrot.slane %v10423_v11, %v8675_v21  ;;  %v6086_v39 = vrot.slane %v10425_v10, %v8675_v21  ;;  %v5271_v41 = vcombine.low %v5263_v35, %v5270_v60  ;;  %v5807_v3 = vrot.slane %v10360_v33, %v8675_v21 }
 0x1ef   :  { %v5814_v44 = vrot.slane %v10368_v55, %v8675_v21  ;;  %v10549_v32 = vcombine.low %v3754_v31, %v3761_v18  ;;  %v10551_v63 = vcombine.low %v3768_v61, %v3775_v24  ;;  %v6822_v11 = vrot.slane %v9958_v12, %v10226_v62  ;;  %v10557_v23 = vpop.permute.xlu0 %6582  ;;  %v11877_v31 = vld [vmem:[#allocation54_spill] sm:$0xff] }
 0x1f0   :  { %v6926_v10 = vrot.slane %v10000_v16, %v10203_v52  ;;  %v6817_v35 = vrot.slane %v10256_v30, %v10203_v52  ;;  %v6930_v33 = vrot.slane %v10045_v2, %v10226_v62  ;;  %v6825_v55 = vadd.s32 4294967280, %v10093_v51  ;;  %v11876_v16 = vld [vmem:[#allocation53_spill] sm:$0xff] }
 0x1f1   :  { %11874 = vst [vmem:[#allocation9_spill] sm:$0xff] %v10549_v32  ;;  %11875 = vst [vmem:[#allocation67_spill] sm:$0xff] %v10551_v63  ;;  %6654 = vperm.xlu1 %8031, %v5543_v43   ;;  %v6832_v58 = vadd.s32 4294967272, %v10093_v51  ;;  %v7009_v12 = vrot.slane %v10130_v13, %v10226_v62  ;;  %v6087_v60 = vcombine.low %v6079_v59, %v6086_v39  ;;  %v10571_v61 = vpop.permute.xlu1 %6726  ;;  %v6839_v2 = vadd.s32 4294967264, %v10093_v51  ;;  %v11878_v13 = vld [vmem:[#allocation35_spill] sm:$0xff]  ;;  %v11879_v39 = vld [vmem:[#allocation30_spill] sm:$0xff] }
 0x1f2   :  { %6606 = vperm.xlu0 %8030, %v5271_v41   ;;  %v4464_v19 = vrot.slane %v11876_v16, %v8675_v21  ;;  %v4471_v18 = vrot.slane %v11877_v31, %v8675_v21  ;;  %v5815_v30 = vcombine.low %v5807_v3, %v5814_v44  ;;  %v6351_v24 = vrot.slane %v10390_v57, %v8675_v21  ;;  %v11880_v31 = vld [vmem:[#allocation77_spill] sm:$0xff]  ;;  %v11881_v44 = vld [vmem:[#allocation78_spill] sm:$0xff] }
 0x1f3   :  { %v6358_v43 = vrot.slane %v10421_v25, %v8675_v21  ;;  %v10578_v41 = vpop.permute.xlu0 %6678  ;;  %v5008_v59 = vrot.slane %v11878_v13, %v8675_v21  ;;  %v5015_v16 = vrot.slane %v11879_v39, %v8675_v21  ;;  %v4736_v3 = vrot.slane %v11880_v31, %v8675_v21 }
 0x1f4   :  { %v4743_v38 = vrot.slane %v11881_v44, %v8675_v21  ;;  %v10589_v57 = vsel %vm6823_vm1, %v6822_v11, %v6817_v35  ;;  %v10592_v25 = vsel %vm6823_vm1, %v6930_v33, %v6926_v10  ;;  %v10597_v13 = vsub.s32 %v6825_v55, %v11825_v6 }
 0x1f5   :  { %6750 = vperm.xlu1 %8031, %v6087_v60   ;;  %v7005_v60 = vrot.slane %v10082_v9, %v10203_v52  ;;  %v7088_v39 = vrot.slane %v10205_v0, %v10226_v62  ;;  %v4472_v31 = vcombine.low %v4464_v19, %v4471_v18  ;;  %v5552_v44 = vrot.slane %v10250_v46, %v8675_v21  ;;  %v10613_v33 = vpop.permute.xlu1 %6441  ;;  %v11882_v0 = vld [vmem:[#allocation34_spill] sm:$0xff] }
 0x1f6   :  { %6702 = vperm.xlu0 %8030, %v5815_v30   ;;  %v5559_v11 = vrot.slane %v10252_v40, %v8675_v21  ;;  %v7167_v10 = vrot.slane %v10282_v37, %v10226_v62  ;;  %v10611_v9 = vsub.s32 %v6832_v58, %v11825_v6  ;;  %v6359_v55 = vcombine.low %v6351_v24, %v6358_v43  ;;  %v11884_v58 = vld [vmem:[#allocation56_spill] sm:$0xff] }
 0x1f7   :  { %v10608_v35 = vsel %vm6823_vm1, %v7009_v12, %v7005_v60  ;;  %v7084_v19 = vrot.slane %v11882_v0, %v10203_v52  ;;  %v10618_v46 = vsub.s32 %v6839_v2, %v11825_v6  ;;  %v10620_v18 = vpop.permute.xlu0 %6774  ;;  %v5016_v40 = vcombine.low %v5008_v59, %v5015_v16  ;;  %v11883_v12 = vld [vmem:[#allocation16_spill] sm:$0xff]  ;;  %v11885_v16 = vld [vmem:[#allocation7_spill] sm:$0xff] }
 0x1f8   :  { %v4744_v37 = vcombine.low %v4736_v3, %v4743_v38  ;;  %v5280_v30 = vrot.slane %v11883_v12, %v8675_v21  ;;  %v5287_v60 = vrot.slane %v11884_v58, %v8675_v21  ;;  %v6096_v24 = vrot.slane %v10431_v4, %v8675_v21  ;;  %v11889_v58 = vld [vmem:[#allocation29_spill] sm:$0xff] }
 0x1f9   :  { %6465 = vperm.xlu1 %8031, %v4472_v31   ;;  %v6103_v43 = vrot.slane %v10439_v34, %v8675_v21  ;;  %v10631_v2 = vsel %vm6823_vm1, %v7088_v39, %v7084_v19  ;;  %v5560_v0 = vcombine.low %v5552_v44, %v5559_v11  ;;  %v5824_v38 = vrot.slane %v10445_v42, %v8675_v21  ;;  %v10639_v31 = vpop.permute.xlu1 %6537  ;;  %v11886_v34 = vld [vmem:[#allocation49_spill] sm:$0xff]  ;;  %v11887_v39 = vld [vmem:[#allocation52_spill] sm:$0xff] }
 0x1fa   :  { %6798 = vperm.xlu0 %8030, %v6359_v55   ;;  %v5831_v59 = vrot.slane %v10465_v45, %v8675_v21  ;;  %v7163_v3 = vrot.slane %v11885_v16, %v10203_v52  ;;  %v6846_v4 = vadd.s32 4294967256, %v10093_v51  ;;  %v4481_v55 = vrot.slane %v11886_v34, %v8675_v21  ;;  %v11888_v19 = vld [vmem:[#allocation28_spill] sm:$0xff] }
 0x1fb   :  { %v4488_v44 = vrot.slane %v11887_v39, %v8675_v21  ;;  %v10646_v11 = vpop.permute.xlu0 %6489  ;;  %v6368_v42 = vrot.slane %v10491_v20, %v8675_v21  ;;  %v6375_v45 = vrot.slane %v10503_v50, %v8675_v21  ;;  %v5025_v12 = vrot.slane %v11888_v19, %v8675_v21  ;;  %v11892_v20 = vld [vmem:[#allocation84_spill] sm:$0xff]  ;;  %v11894_v19 = vld [vmem:[#allocation6_spill] sm:$0xff] }
 0x1fc   :  { %v5032_v16 = vrot.slane %v11889_v58, %v8675_v21  ;;  %v5288_v34 = vcombine.low %v5280_v30, %v5287_v60  ;;  %v6104_v39 = vcombine.low %v6096_v24, %v6103_v43  ;;  %v4753_v1 = vrot.slane %v11890_v48, %v8675_v21  ;;  %v11893_v50 = vld [vmem:[#allocation44_spill] sm:$0xff]  ;;  %v11895_v58 = vld [vmem:[#allocation55_spill] sm:$0xff] }
 0x1fd   :  { %6561 = vperm.xlu1 %8031, %v5016_v40   ;;  %v11891_v40 = vld [vmem:[#allocation76_spill] sm:$0xff]  ;;  %v5569_v32 = vrot.slane %v11892_v20, %v8675_v21  ;;  %v5576_v53 = vrot.slane %v11893_v50, %v8675_v21  ;;  %v5297_v28 = vrot.slane %v11894_v19, %v8675_v21  ;;  %v10669_v30 = vsel %vm6823_vm1, %v7167_v10, %v7163_v3  ;;  %v10673_v24 = vpop.permute.xlu1 %6633  ;;  %v11897_v3 = vld [vmem:[#allocation43_spill] sm:$0xff] }
 0x1fe   :  { %6513 = vperm.xlu0 %8030, %v4744_v37   ;;  %v4760_v63 = vrot.slane %v11891_v40, %v8675_v21  ;;  %v5304_v37 = vrot.slane %v11895_v58, %v8675_v21  ;;  %v11896_v48 = vld [vmem:[#allocation68_spill] sm:$0xff]  ;;  %v5832_v43 = vcombine.low %v5824_v38, %v5831_v59  ;;  %v10676_v40 = vsub.s32 %v6846_v4, %v11825_v6 }
 0x1ff   :  { %v7325_v60 = vrot.slane %v11896_v48, %v10226_v62  ;;  %v7330_v20 = vrot.slane %v10447_v27, %v10597_v13  ;;  %v10680_v50 = vpop.permute.xlu0 %6585  ;;  %v4489_v19 = vcombine.low %v4481_v55, %v4488_v44  ;;  %v6376_v58 = vcombine.low %v6368_v42, %v6375_v45  ;;  %v11900_v45 = vld [vmem:[#allocation18_spill] sm:$0xff] }
 0x200   :  { %v5033_v10 = vcombine.low %v5025_v12, %v5032_v16  ;;  %v7321_v29 = vrot.slane %v11897_v3, %v10203_v52  ;;  %v7335_v48 = vrot.slane %v10571_v61, %v10611_v9  ;;  %v4761_v38 = vcombine.low %v4753_v1, %v4760_v63 }
 0x201   :  { %6657 = vperm.xlu1 %8031, %v5560_v0   ;;  %v6113_v59 = vrot.slane %v10529_v36, %v8675_v21  ;;  %v10688_v4 = vcombine.low %v5569_v32, %v5576_v53  ;;  %v10690_v27 = vcombine.low %v5297_v28, %v5304_v37  ;;  %v6120_v0 = vrot.slane %v10531_v17, %v8675_v21  ;;  %v6730_v63 = vpop.permute.xlu1 %6729  ;;  %v11898_v36 = vld [vmem:[#allocation17_spill] sm:$0xff]  ;;  %v11901_v37 = vld [vmem:[#allocation12_spill] sm:$0xff] }
 0x202   :  { %6609 = vperm.xlu0 %8030, %v5288_v34   ;;  %v5841_v55 = vrot.slane %v10463_v5, %v8675_v21  ;;  %v7326_v44 = vsel %vm6823_vm1, %v7325_v60, %v7321_v29  ;;  %v6829_v61 = vrot.slane %v10354_v7, %v10597_v13  ;;  %v7404_v1 = vrot.slane %v10366_v49, %v10226_v62  ;;  %v11899_v7 = vld [vmem:[#allocation19_spill] sm:$0xff] }
 0x203   :  { %v5848_v53 = vrot.slane %v10485_v14, %v8675_v21  ;;  %v7331_v28 = vsel %vm6830_vm2, %v7330_v20, %v7326_v44  ;;  %v6836_v17 = vrot.slane %v11898_v36, %v10611_v9  ;;  %v7340_v32 = vrot.slane %v6730_v63, %v10618_v46  ;;  %v10707_v42 = vpop.permute.xlu0 %6681  ;;  %v11902_v63 = vld [vmem:[#allocation71_spill] sm:$0xff] }
 0x204   :  { %v10710_v29 = vadd.s32 4294967248, %v10093_v51  ;;  %v7400_v49 = vrot.slane %v11899_v7, %v10203_v52  ;;  %v7409_v12 = vrot.slane %v11900_v45, %v10597_v13  ;;  %v7336_v16 = vsel %vm6837_vm3, %v7335_v48, %v7331_v28  ;;  %v11903_v28 = vld [vmem:[#allocation61_spill] sm:$0xff] }
 0x205   :  { %6753 = vperm.xlu1 %8031, %v6104_v39   ;;  %v6843_v34 = vrot.slane %v10613_v33, %v10618_v46  ;;  %v7014_v60 = vrot.slane %v11901_v37, %v10597_v13  ;;  %v7414_v39 = vrot.slane %v10620_v18, %v10611_v9  ;;  %v10724_v20 = vsel %vm6844_vm4, %v7340_v32, %v7336_v16  ;;  %v11905_v16 = vld [vmem:[#allocation37_spill] sm:$0xff] }
 0x206   :  { %6705 = vperm.xlu0 %8030, %v5832_v43   ;;  %v10726_v3 = vcombine.low %v6113_v59, %v6120_v0  ;;  %v6831_v44 = vsel %vm6830_vm2, %v6829_v61, %v10589_v57  ;;  %v7405_v48 = vsel %vm6823_vm1, %v7404_v1, %v7400_v49  ;;  %v6935_v33 = vrot.slane %v11902_v63, %v10597_v13  ;;  %v6445_v43 = vpop.permute.xlu1 %6444 }
 0x207   :  { %v4498_v36 = vrot.slane %v11903_v28, %v8675_v21  ;;  %v6838_v7 = vsel %vm6837_vm3, %v6836_v17, %v6831_v44  ;;  %v7019_v18 = vrot.slane %v10511_v22, %v10611_v9  ;;  %v6940_v59 = vrot.slane %v10525_v56, %v10611_v9  ;;  %v6778_v57 = vpop.permute.xlu0 %6777  ;;  %v11912_v28 = vld [vmem:[#allocation81_spill] sm:$0xff] }
 0x208   :  { %v6850_v0 = vrot.slane %v6445_v43, %v10676_v40  ;;  %v7410_v61 = vsel %vm6830_vm2, %v7409_v12, %v7405_v48  ;;  %v6845_v1 = vsel %vm6844_vm4, %v6843_v34, %v6838_v7  ;;  %v7024_v32 = vrot.slane %v10639_v31, %v10618_v46  ;;  %v11904_v12 = vld [vmem:[#allocation20_spill] sm:$0xff] }
 0x209   :  { %6468 = vperm.xlu1 %8031, %v4489_v19   ;;  %v7419_v49 = vrot.slane %v6778_v57, %v10618_v46  ;;  %v7015_v22 = vsel %vm6830_vm2, %v7014_v60, %v10608_v35  ;;  %v7415_v17 = vsel %vm6837_vm3, %v7414_v39, %v7410_v61  ;;  %v6945_v56 = vrot.slane %v10646_v11, %v10618_v46 }
 0x20a   :  { %6801 = vperm.xlu0 %8030, %v6376_v58   ;;  %v10752_v19 = vsel %vm6851_vm5, %v6850_v0, %v6845_v1  ;;  %v6936_v45 = vsel %vm6830_vm2, %v6935_v33, %v10592_v25  ;;  %v7172_v31 = vrot.slane %v11904_v12, %v10597_v13  ;;  %v7093_v58 = vrot.slane %v11905_v16, %v10597_v13  ;;  %v6541_v35 = vpop.permute.xlu1 %6540  ;;  %v11908_v0 = vld [vmem:[#allocation70_spill] sm:$0xff] }
 0x20b   :  { %v10761_v34 = vsel %vm6844_vm4, %v7419_v49, %v7415_v17  ;;  %v7020_v37 = vsel %vm6837_vm3, %v7019_v18, %v7015_v22  ;;  %v6941_v11 = vsel %vm6837_vm3, %v6940_v59, %v6936_v45  ;;  %v7177_v60 = vrot.slane %v10543_v47, %v10611_v9  ;;  %v6493_v25 = vpop.permute.xlu0 %6492  ;;  %v11909_v1 = vld [vmem:[#allocation42_spill] sm:$0xff] }
 0x20c   :  { %v7029_v39 = vrot.slane %v6541_v35, %v10676_v40  ;;  %v7098_v44 = vrot.slane %v10557_v23, %v10611_v9  ;;  %v7025_v48 = vsel %vm6844_vm4, %v7024_v32, %v7020_v37  ;;  %v7182_v63 = vrot.slane %v10673_v24, %v10618_v46  ;;  %v11907_v23 = vld [vmem:[#allocation8_spill] sm:$0xff]  ;;  %v11911_v35 = vld [vmem:[#allocation87_spill] sm:$0xff] }
 0x20d   :  { %6564 = vperm.xlu1 %8031, %v5033_v10   ;;  %v6950_v33 = vrot.slane %v6493_v25, %v10676_v40  ;;  %v6946_v43 = vsel %vm6844_vm4, %v6945_v56, %v6941_v11  ;;  %v7103_v47 = vrot.slane %v10680_v50, %v10618_v46  ;;  %v11906_v10 = vld [vmem:[#allocation63_spill] sm:$0xff]  ;;  %v7242_v59 = vrot.slane %v11907_v23, %v10203_v52  ;;  %v11913_v25 = vld [vmem:[#allocation82_spill] sm:$0xff]  ;;  %v11920_v23 = vld [vmem:[#allocation65_spill] sm:$0xff] }
 0x20e   :  { %6516 = vperm.xlu0 %8030, %v4761_v38   ;;  %v10778_v7 = vsel %vm6851_vm5, %v7029_v39, %v7025_v48  ;;  %v4505_v18 = vrot.slane %v11906_v10, %v8675_v21  ;;  %v7246_v24 = vrot.slane %v11908_v0, %v10226_v62  ;;  %v7173_v38 = vsel %vm6830_vm2, %v7172_v31, %v10669_v30  ;;  %v6637_v61 = vpop.permute.xlu1 %6636 }
 0x20f   :  { %v10789_v57 = vsel %vm6851_vm5, %v6950_v33, %v6946_v43  ;;  %v7094_v50 = vsel %vm6830_vm2, %v7093_v58, %v10631_v2  ;;  %v7251_v32 = vrot.slane %v11909_v1, %v10597_v13  ;;  %v7178_v49 = vsel %vm6837_vm3, %v7177_v60, %v7173_v38  ;;  %v6589_v22 = vpop.permute.xlu0 %6588 }
 0x210   :  { %v7187_v52 = vrot.slane %v6637_v61, %v10676_v40  ;;  %v7099_v62 = vsel %vm6837_vm3, %v7098_v44, %v7094_v50  ;;  %v7256_v30 = vrot.slane %v10578_v41, %v10611_v9  ;;  %v7183_v17 = vsel %vm6844_vm4, %v7182_v63, %v7178_v49  ;;  %v11916_v63 = vld [vmem:[#allocation23_spill] sm:$0xff]  ;;  %v11921_v49 = vld [vmem:[#allocation69_spill] sm:$0xff] }
 0x211   :  { %6660 = vperm.xlu1 %8031, %v10688_v4   ;;  %v7108_v56 = vrot.slane %v6589_v22, %v10676_v40  ;;  %v7104_v13 = vsel %vm6844_vm4, %v7103_v47, %v7099_v62  ;;  %v7261_v2 = vrot.slane %v10707_v42, %v10618_v46  ;;  %v5849_v41 = vcombine.low %v5841_v55, %v5848_v53  ;;  %v11918_v47 = vld [vmem:[#allocation27_spill] sm:$0xff]  ;;  %v11922_v22 = vld [vmem:[#allocation10_spill] sm:$0xff] }
 0x212   :  { %6612 = vperm.xlu0 %8030, %v10690_v27   ;;  %v10808_v45 = vsel %vm6851_vm5, %v7187_v52, %v7183_v17  ;;  %v7247_v9 = vsel %vm6823_vm1, %v7246_v24, %v7242_v59  ;;  %v6733_v27 = vpop.permute.xlu1 %6732  ;;  %v6385_v12 = vrot.slane %v10509_v15, %v8675_v21  ;;  %v6392_v46 = vrot.slane %v10527_v26, %v8675_v21 }
 0x213   :  { %v10818_v4 = vsel %vm6851_vm5, %v7108_v56, %v7104_v13  ;;  %v3327_v42 = vrot.slane %v10134_v8, %v8655_v54  ;;  %v7252_v14 = vsel %vm6830_vm2, %v7251_v32, %v7247_v9  ;;  %v7345_v5 = vrot.slane %v6733_v27, %v10676_v40  ;;  %v6685_v55 = vpop.permute.xlu0 %6684 }
 0x214   :  { %v10831_v53 = vsub.s32 %v10710_v29, %v11825_v6  ;;  %v7257_v31 = vsel %vm6837_vm3, %v7256_v30, %v7252_v14  ;;  %v7266_v15 = vrot.slane %v6685_v55, %v10676_v40  ;;  %v4506_v26 = vcombine.low %v4498_v36, %v4505_v18 }
 0x215   :  { %6756 = vperm.xlu1 %8031, %v10726_v3   ;;  %v7262_v16 = vsel %vm6844_vm4, %v7261_v2, %v7257_v31  ;;  %v10841_v58 = vsel %vm6851_vm5, %v7345_v5, %v10724_v20  ;;  %v11910_v3 = vld [vmem:[#allocation86_spill] sm:$0xff]  ;;  %v5049_v37 = vrot.slane %v11911_v35, %v8675_v21  ;;  %v6393_v39 = vcombine.low %v6385_v12, %v6392_v46  ;;  %v11914_v20 = vld [vmem:[#allocation24_spill] sm:$0xff]  ;;  %v11924_v2 = vld [vmem:[#allocation83_spill] sm:$0xff] }
 0x216   :  { %6708 = vperm.xlu0 %8030, %v5849_v41   ;;  %v5042_v29 = vrot.slane %v11910_v3, %v8675_v21  ;;  %v10848_v11 = vsel %vm6851_vm5, %v7266_v15, %v7262_v16  ;;  %v6448_v60 = vpop.permute.xlu1 %6447  ;;  %v4770_v36 = vrot.slane %v11912_v28, %v8675_v21  ;;  %v4777_v44 = vrot.slane %v11913_v25, %v8675_v21  ;;  %v11925_v41 = vld [vmem:[#allocation14_spill] sm:$0xff] }
 0x217   :  { %v11915_v48 = vrot.slane %v10134_v8, %v11914_v20  ;;  %v11917_v33 = vrot.slane %v10134_v8, %v11916_v63  ;;  %v11919_v10 = vrot.slane %v10134_v8, %v11918_v47  ;;  %v4202_v59 = vrot.slane %v11920_v23, %v11916_v63  ;;  %v6781_v24 = vpop.permute.xlu0 %6780 }
 0x218   :  { %v6857_v0 = vrot.slane %v6448_v60, %v10831_v53  ;;  %v4209_v38 = vrot.slane %v11920_v23, %v11914_v20  ;;  %v4216_v61 = vrot.slane %v11920_v23, %v11918_v47  ;;  %v4223_v50 = vrot.slane %v11920_v23, %v8655_v54 }
 0x219   :  { %v5850_v43 = vcombine.low %v11917_v33, %v11915_v48  ;;  %v5851_v18 = vcombine.low %v11919_v10, %v3327_v42  ;;  %6471 = vperm.xlu1 %8031, %v4506_v26   ;;  %v7424_v1 = vrot.slane %v6781_v24, %v10676_v40  ;;  %v5050_v32 = vcombine.low %v5042_v29, %v5049_v37  ;;  %v11923_v40 = vld [vmem:[#allocation60_spill] sm:$0xff]  ;;  %v11929_v29 = vld [vmem:[#allocation9_spill] sm:$0xff]  ;;  %v11930_v37 = vld [vmem:[#allocation67_spill] sm:$0xff] }
 0x21a   :  { %6804 = vperm.xlu0 %8030, %v6393_v39   ;;  %v10875_v8 = vsel %vm6858_vm6, %v6857_v0, %v10752_v19  ;;  %v5586_v52 = vrot.slane %v11921_v49, %v8675_v21  ;;  %v5593_v62 = vrot.slane %v11922_v22, %v8675_v21  ;;  %v6544_v17 = vpop.permute.xlu1 %6543  ;;  %v4778_v56 = vcombine.low %v4770_v36, %v4777_v44 }
 0x21b   :  { %v10883_v30 = vsel %vm6851_vm5, %v7424_v1, %v10761_v34  ;;  %v5314_v13 = vrot.slane %v11923_v40, %v8675_v21  ;;  %v5321_v19 = vrot.slane %v11924_v2, %v8675_v21  ;;  %v2907_v9 = vrot.slane %v11925_v41, %v8655_v54  ;;  %v11928_v34 = vld [vmem:[#allocation62_spill] sm:$0xff]  ;;  %v6496_v5 = vpop.permute.xlu0 %6495 }
 0x21c   :  { %v11926_v27 = vrot.slane %v11925_v41, %v11914_v20  ;;  %v11927_v12 = vrot.slane %v11925_v41, %v11916_v63  ;;  %v3334_v42 = vrot.slane %v11928_v34, %v11916_v63  ;;  %v7034_v14 = vrot.slane %v6544_v17, %v10831_v53 }
 0x21d   :  { %6567 = vperm.xlu1 %8031, %v5050_v32   ;;  %v3341_v55 = vrot.slane %v11928_v34, %v11914_v20  ;;  %v6394_v31 = vcombine.low %v4202_v59, %v4209_v38  ;;  %v6395_v15 = vcombine.low %v4216_v61, %v4223_v50  ;;  %v6955_v26 = vrot.slane %v6496_v5, %v10831_v53  ;;  %v11933_v50 = vld [vmem:[#allocation57_spill] sm:$0xff]  ;;  %v11934_v32 = vld [vmem:[#allocation58_spill] sm:$0xff] }
 0x21e   :  { %v10897_v46 = vcombine.low %v11927_v12, %v11926_v27  ;;  %6519 = vperm.xlu0 %8030, %v4778_v56   ;;  %v10907_v16 = vsel %vm6858_vm6, %v7034_v14, %v10778_v7  ;;  %v5594_v3 = vcombine.low %v5586_v52, %v5593_v62  ;;  %v6130_v35 = vrot.slane %v11929_v29, %v8675_v21  ;;  %v6640_v28 = vpop.permute.xlu1 %6639  ;;  %v11937_v14 = vld [vmem:[#allocation85_spill] sm:$0xff]  ;;  %v11939_v29 = vld [vmem:[#allocation79_spill] sm:$0xff] }
 0x21f   :  { %v6137_v60 = vrot.slane %v11930_v37, %v8675_v21  ;;  %v10915_v39 = vsel %vm6858_vm6, %v6955_v26, %v10789_v57  ;;  %v5322_v36 = vcombine.low %v5314_v13, %v5321_v19  ;;  %v5858_v25 = vrot.slane %v5850_v43, %v8675_v21  ;;  %v6592_v23 = vpop.permute.xlu0 %6591  ;;  %v11938_v26 = vld [vmem:[#allocation15_spill] sm:$0xff] }
 0x220   :  { %v5865_v44 = vrot.slane %v5851_v18, %v8675_v21  ;;  %v11931_v7 = vrot.slane %v11925_v41, %v11918_v47  ;;  %v3348_v33 = vrot.slane %v11928_v34, %v11918_v47  ;;  %v7192_v10 = vrot.slane %v6640_v28, %v10831_v53  ;;  %v11932_v18 = vld [vmem:[#allocation51_spill] sm:$0xff] }
 0x221   :  { %6663 = vperm.xlu1 %8031, %v5594_v3   ;;  %v6860_v57 = vadd.s32 4294967240, %v10093_v51  ;;  %v3355_v59 = vrot.slane %v11928_v34, %v8655_v54  ;;  %v10930_v43 = vcombine.low %v3334_v42, %v3341_v55  ;;  %v4230_v0 = vrot.slane %v11932_v18, %v11916_v63  ;;  %v11936_v34 = vld [vmem:[#allocation38_spill] sm:$0xff] }
 0x222   :  { %v10922_v48 = vcombine.low %v11931_v7, %v2907_v9  ;;  %v7113_v24 = vrot.slane %v6592_v23, %v10831_v53  ;;  %6615 = vperm.xlu0 %8030, %v5322_v36   ;;  %v10937_v38 = vsel %vm6858_vm6, %v7192_v10, %v10808_v45  ;;  %v6138_v61 = vcombine.low %v6130_v35, %v6137_v60  ;;  %v6736_v22 = vpop.permute.xlu1 %6735  ;;  %v11935_v45 = vld [vmem:[#allocation66_spill] sm:$0xff] }
 0x223   :  { %v4515_v1 = vrot.slane %v11933_v50, %v8675_v21  ;;  %v4522_v49 = vrot.slane %v11934_v32, %v8675_v21  ;;  %v5866_v62 = vcombine.low %v5858_v25, %v5865_v44  ;;  %v6402_v17 = vrot.slane %v6394_v31, %v8675_v21  ;;  %v6688_v19 = vpop.permute.xlu0 %6687 }
 0x224   :  { %v10945_v52 = vsel %vm6858_vm6, %v7113_v24, %v10818_v4  ;;  %v6409_v56 = vrot.slane %v6395_v15, %v8675_v21  ;;  %v3782_v40 = vrot.slane %v11935_v45, %v11916_v63  ;;  %v3789_v13 = vrot.slane %v11935_v45, %v11914_v20  ;;  %v7522_v24 = vld [vmem:[%s11534_s1 + $0x80] sm:$0xff] }
 0x225   :  { %v7350_v2 = vrot.slane %v6736_v22, %v10831_v53  ;;  %6759 = vperm.xlu1 %8031, %v6138_v61   ;;  %v10955_v41 = vsub.s32 %v6860_v57, %v11825_v6  ;;  %v3796_v4 = vrot.slane %v11935_v45, %v11918_v47  ;;  %v3803_v9 = vrot.slane %v11935_v45, %v8655_v54  ;;  %v7554_v22 = vld [vmem:[%s11534_s1 + $0x180] sm:$0xff] }
 0x226   :  { %v7271_v27 = vrot.slane %v6688_v19, %v10831_v53  ;;  %6711 = vperm.xlu0 %8030, %v5866_v62   ;;  %v4523_v12 = vcombine.low %v4515_v1, %v4522_v49  ;;  %v5059_v42 = vrot.slane %v11936_v34, %v8675_v21  ;;  %v5066_v5 = vrot.slane %v11937_v14, %v8675_v21  ;;  %v6451_v31 = vpop.permute.xlu1 %6450  ;;  %v7507_v49 = vld [vmem:[%s11534_s1 + $0x8] sm:$0xff] }
 0x227   :  { %v10964_v63 = vsel %vm6858_vm6, %v7350_v2, %v10841_v58  ;;  %v6410_v15 = vcombine.low %v6402_v17, %v6409_v56  ;;  %v4787_v3 = vrot.slane %v11938_v26, %v8675_v21  ;;  %v4794_v58 = vrot.slane %v11939_v29, %v8675_v21  ;;  %v6784_v28 = vpop.permute.xlu0 %6783  ;;  %v7509_v26 = vld [vmem:[%s11534_s1 + $0x18] sm:$0xff] }
 0x228   :  { %v10972_v55 = vsel %vm6858_vm6, %v7271_v27, %v10848_v11  ;;  %v4237_v35 = vrot.slane %v11932_v18, %v11914_v20  ;;  %v4244_v37 = vrot.slane %v11932_v18, %v11918_v47  ;;  %v4251_v60 = vrot.slane %v11932_v18, %v8655_v54  ;;  %v11941_v18 = vld [vmem:[#allocation59_spill] sm:$0xff] }
 0x229   :  { %v6864_v11 = vrot.slane %v6451_v31, %v10955_v41  ;;  %6474 = vperm.xlu1 %8031, %v4523_v12   ;;  %v10985_v36 = vcombine.low %v3348_v33, %v3355_v59  ;;  %v6139_v25 = vcombine.low %v3782_v40, %v3789_v13  ;;  %v6140_v44 = vcombine.low %v3796_v4, %v3803_v9  ;;  %v7525_v31 = vld [vmem:[%s11534_s1 + $0x98] sm:$0xff] }
 0x22a   :  { %v7429_v7 = vrot.slane %v6784_v28, %v10831_v53  ;;  %6807 = vperm.xlu0 %8030, %v6410_v15   ;;  %v5067_v10 = vcombine.low %v5059_v42, %v5066_v5  ;;  %v5603_v47 = vrot.slane %v10897_v46, %v8675_v21  ;;  %v5610_v54 = vrot.slane %v10922_v48, %v8675_v21  ;;  %v6547_v23 = vpop.permute.xlu1 %6546  ;;  %v11940_v53 = vld [vmem:[#allocation64_spill] sm:$0xff]  ;;  %v7523_v46 = vld [vmem:[%s11534_s1 + $0x88] sm:$0xff] }
 0x22b   :  { %v10990_v20 = vsel %vm6865_vm7, %v6864_v11, %v10875_v8  ;;  %v4795_v57 = vcombine.low %v4787_v3, %v4794_v58  ;;  %v5331_v59 = vrot.slane %v11940_v53, %v8675_v21  ;;  %v5338_v8 = vrot.slane %v11941_v18, %v8675_v21  ;;  %v6499_v1 = vpop.permute.xlu0 %6498  ;;  %v7508_v15 = vld [vmem:[%s11534_s1 + $0x10] sm:$0xff]  ;;  %v7510_v18 = vld [vmem:[%s11534_s1 + $0x20] sm:$0xff] }
 0x22c   :  { %v10998_v33 = vsel %vm6858_vm6, %v7429_v7, %v10883_v30  ;;  %v7506_v30 = vld [vmem:[%s11534_s1] sm:$0xff]  ;;  %v11013_v48 = vcombine.low %v4230_v0, %v4237_v35  ;;  %v11015_v61 = vcombine.low %v4244_v37, %v4251_v60  ;;  %v7039_v50 = vrot.slane %v6547_v23, %v10955_v41  ;;  %v7555_v0 = vld [vmem:[%s11534_s1 + $0x188] sm:$0xff]  ;;  %v7556_v35 = vld [vmem:[%s11534_s1 + $0x190] sm:$0xff] }
 0x22d   :  { %6570 = vperm.xlu1 %8031, %v5067_v10   ;;  %v7944_v32 = vpack.c.bf16 %v7523_v46, %v7522_v24  ;;  %v6960_v62 = vrot.slane %v6499_v1, %v10955_v41  ;;  %v6147_v17 = vrot.slane %v6139_v25, %v8675_v21  ;;  %v7946_v56 = vpack.c.bf16 %v7507_v49, %v7506_v30  ;;  %v7557_v37 = vld [vmem:[%s11534_s1 + $0x198] sm:$0xff] }
 0x22e   :  { %6522 = vperm.xlu0 %8030, %v4795_v57   ;;  %v7976_v45 = vpack.c.bf16 %v7555_v0, %v7554_v22  ;;  %v11031_v40 = vsel %vm6865_vm7, %v7039_v50, %v10907_v16  ;;  %v5611_v13 = vcombine.low %v5603_v47, %v5610_v54  ;;  %v6154_v2 = vrot.slane %v6140_v44, %v8675_v21  ;;  %v6643_v9 = vpop.permute.xlu1 %6642  ;;  %v7538_v16 = vld [vmem:[%s11534_s1 + $0x100] sm:$0xff]  ;;  %v7541_v47 = vld [vmem:[%s11534_s1 + $0x118] sm:$0xff] }
 0x22f   :  { %v5875_v19 = vrot.slane %v10930_v43, %v8675_v21  ;;  %7945 = vmatprep.subr.bf16.mxu0 %v7944_v32  ;;  %v11038_v4 = vsel %vm6865_vm7, %v6960_v62, %v10915_v39  ;;  %v5339_v27 = vcombine.low %v5331_v59, %v5338_v8  ;;  %v5882_v12 = vrot.slane %v10985_v36, %v8675_v21  ;;  %v7539_v43 = vld [vmem:[%s11534_s1 + $0x108] sm:$0xff]  ;;  %v7524_v39 = vld [vmem:[%s11534_s1 + $0x90] sm:$0xff]  ;;  %v6595_v42 = vpop.permute.xlu0 %6594 }
 0x230   :  { %7947 = vmatpush3.bf16.msra.mxu0 %v7946_v56  ;;  %7977 = vmatprep.subr.bf16.mxu1 %v7976_v45  ;;  %v7197_v34 = vrot.slane %v6643_v9, %v10955_v41  ;;  %v6867_v14 = vadd.s32 4294967232, %v10093_v51  ;;  %v7978_v5 = vpack.c.bf16 %v7539_v43, %v7538_v16  ;;  %v7118_v3 = vrot.slane %v6595_v42, %v10955_v41  ;;  %v7527_v59 = vld [vmem:[%s11534_s1 + $0xa8] sm:$0xff]  ;;  %v7528_v56 = vld [vmem:[%s11534_s1 + $0xb0] sm:$0xff]  ;;  %v7561_v43 = vld [vmem:[%s11534_s1 + $0x1b8] sm:$0xff] }
 0x231   :  { %6666 = vperm.xlu1 %8031, %v5611_v13   ;;  %v7948_v29 = vpack.c.bf16 %v7525_v31, %v7524_v39  ;;  %v7950_v58 = vpack.c.bf16 %v7509_v26, %v7508_v15  ;;  %v6155_v11 = vcombine.low %v6147_v17, %v6154_v2  ;;  %v7980_v28 = vpack.c.bf16 %v7557_v37, %v7556_v35  ;;  %v7511_v8 = vld [vmem:[%s11534_s1 + $0x28] sm:$0xff]  ;;  %v7512_v2 = vld [vmem:[%s11534_s1 + $0x30] sm:$0xff]  ;;  %v7530_v31 = vld [vmem:[%s11534_s1 + $0xc0] sm:$0xff] }
 0x232   :  { %6618 = vperm.xlu0 %8030, %v5339_v27   ;;  %v11071_v60 = vsel %vm6865_vm7, %v7197_v34, %v10937_v38  ;;  %7979 = vmatpush3.bf16.msra.mxu1 %v7978_v5  ;;  %v11075_v36 = vsel %vm6865_vm7, %v7118_v3, %v10945_v52  ;;  %v5883_v44 = vcombine.low %v5875_v19, %v5882_v12  ;;  %v7540_v38 = vld [vmem:[%s11534_s1 + $0x110] sm:$0xff]  ;;  %v7526_v52 = vld [vmem:[%s11534_s1 + $0xa0] sm:$0xff]  ;;  %v7513_v19 = vld [vmem:[%s11534_s1 + $0x38] sm:$0xff]  ;;  %vm7476_vm1 = vcmask 1041409  }
 0x233   :  { %v6739_v25 = vpop.permute.xlu1 %6738  ;;  %v6419_v7 = vrot.slane %v11013_v48, %v8675_v21  ;;  %v6426_v10 = vrot.slane %v11015_v61, %v8675_v21  ;;  %7949 = vmatprep.subr.bf16.mxu0 %v7948_v29  ;;  %v11092_v57 = vsub.s32 %v6867_v14, %v11825_v6  ;;  %v7982_v53 = vpack.c.bf16 %v7541_v47, %v7540_v38  ;;  %v7558_v48 = vld [vmem:[%s11534_s1 + $0x1a0] sm:$0xff]  ;;  %v7559_v61 = vld [vmem:[%s11534_s1 + $0x1a8] sm:$0xff]  ;;  %v7560_v16 = vld [vmem:[%s11534_s1 + $0x1b0] sm:$0xff] }
 0x234   :  { %v7355_v54 = vrot.slane %v6739_v25, %v10955_v41  ;;  %v6691_v23 = vpop.permute.xlu0 %6690  ;;  %7951 = vmatpush3.bf16.msra.mxu0 %v7950_v58  ;;  %7981 = vmatprep.subr.bf16.mxu1 %v7980_v28  ;;  %v7952_v46 = vpack.c.bf16 %v7527_v59, %v7526_v52  ;;  %v7954_v30 = vpack.c.bf16 %v7511_v8, %v7510_v18  ;;  %v7545_v5 = vld [vmem:[%s11534_s1 + $0x138] sm:$0xff]  ;;  %v7531_v3 = vld [vmem:[%s11534_s1 + $0xc8] sm:$0xff]  ;;  %v7514_v29 = vld [vmem:[%s11534_s1 + $0x40] sm:$0xff]  ;;  %vm8063_vm2 = vmmov 0  }
 0x235   :  { %6762 = vperm.xlu1 %8031, %v6155_v11   ;;  %v7276_v24 = vrot.slane %v6691_v23, %v10955_v41  ;;  %v7984_v1 = vpack.c.bf16 %v7559_v61, %v7558_v48  ;;  %v6427_v22 = vcombine.low %v6419_v7, %v6426_v10  ;;  %v7958_v12 = vpack.c.bf16 %v7513_v19, %v7512_v2  ;;  %v7515_v58 = vld [vmem:[%s11534_s1 + $0x48] sm:$0xff]  ;;  %v7562_v28 = vld [vmem:[%s11534_s1 + $0x1c0] sm:$0xff]  ;;  %v7532_v52 = vld [vmem:[%s11534_s1 + $0xd0] sm:$0xff] }
 0x236   :  { %6714 = vperm.xlu0 %8030, %v5883_v44   ;;  %v11112_v50 = vsel %vm6865_vm7, %v7355_v54, %v10964_v63  ;;  %7983 = vmatpush3.bf16.msra.mxu1 %v7982_v53  ;;  %v7542_v63 = vld [vmem:[%s11534_s1 + $0x120] sm:$0xff]  ;;  %v7988_v42 = vpack.c.bf16 %v7561_v43, %v7560_v16  ;;  %v7960_v37 = vpack.c.bf16 %v7531_v3, %v7530_v31  ;;  %v7563_v25 = vld [vmem:[%s11534_s1 + $0x1c8] sm:$0xff]  ;;  %v7533_v54 = vld [vmem:[%s11534_s1 + $0xd8] sm:$0xff] }
 0x237   :  { %v11116_v32 = vsel %vm6865_vm7, %v7276_v24, %v10972_v55  ;;  %v6454_v49 = vpop.permute.xlu1 %6453  ;;  %7953 = vmatprep.subr.bf16.mxu0 %v7952_v46  ;;  %7985 = vmatprep.subr.bf16.mxu1 %v7984_v1  ;;  %v7543_v55 = vld [vmem:[%s11534_s1 + $0x128] sm:$0xff]  ;;  %v7962_v11 = vpack.c.bf16 %v7515_v58, %v7514_v29  ;;  %v7546_v44 = vld [vmem:[%s11534_s1 + $0x140] sm:$0xff]  ;;  %v7992_v38 = vpack.c.bf16 %v7563_v25, %v7562_v28  ;;  %v7516_v18 = vld [vmem:[%s11534_s1 + $0x50] sm:$0xff] }
 0x238   :  { %v6871_v0 = vrot.slane %v6454_v49, %v11092_v57  ;;  %v6787_v62 = vpop.permute.xlu0 %6786  ;;  %7955 = vmatpush3.bf16.msra.mxu0 %v7954_v30  ;;  %v7986_v13 = vpack.c.bf16 %v7543_v55, %v7542_v63  ;;  %v7547_v47 = vld [vmem:[%s11534_s1 + $0x148] sm:$0xff]  ;;  %v7964_v59 = vpack.c.bf16 %v7533_v54, %v7532_v52  ;;  %v7517_v8 = vld [vmem:[%s11534_s1 + $0x58] sm:$0xff]  ;;  %v7564_v24 = vld [vmem:[%s11534_s1 + $0x1d0] sm:$0xff] }
 0x239   :  { %v7434_v17 = vrot.slane %v6787_v62, %v10955_v41  ;;  %v7529_v41 = vld [vmem:[%s11534_s1 + $0xb8] sm:$0xff]  ;;  %v7994_v53 = vpack.c.bf16 %v7547_v47, %v7546_v44  ;;  %v7966_v30 = vpack.c.bf16 %v7517_v8, %v7516_v18  ;;  %v7548_v61 = vld [vmem:[%s11534_s1 + $0x150] sm:$0xff]  ;;  %v7535_v62 = vld [vmem:[%s11534_s1 + $0xe8] sm:$0xff] }
 0x23a   :  { %6810 = vperm.xlu0 %8030, %v6427_v22   ;;  %v11131_v45 = vsel %vm6872_vm8, %v6871_v0, %v10990_v20  ;;  %v7956_v20 = vpack.c.bf16 %v7529_v41, %v7528_v56  ;;  %7987 = vmatpush3.bf16.msra.mxu1 %v7986_v13  ;;  %v7565_v48 = vld [vmem:[%s11534_s1 + $0x1d8] sm:$0xff]  ;;  %v7534_v0 = vld [vmem:[%s11534_s1 + $0xe0] sm:$0xff]  ;;  %v7519_v41 = vld [vmem:[%s11534_s1 + $0x68] sm:$0xff] }
 0x23b   :  { %v11144_v9 = vsel %vm6865_vm7, %v7434_v17, %v10998_v33  ;;  %v6550_v27 = vpop.permute.xlu1 %6549  ;;  %v7544_v33 = vld [vmem:[%s11534_s1 + $0x130] sm:$0xff]  ;;  %7989 = vmatprep.subr.bf16.mxu1 %v7988_v42  ;;  %v7549_v1 = vld [vmem:[%s11534_s1 + $0x158] sm:$0xff]  ;;  %v7996_v22 = vpack.c.bf16 %v7565_v48, %v7564_v24  ;;  %v7518_v17 = vld [vmem:[%s11534_s1 + $0x60] sm:$0xff]  ;;  %v7968_v13 = vpack.c.bf16 %v7535_v62, %v7534_v0 }
 0x23c   :  { %v7044_v39 = vrot.slane %v6550_v27, %v11092_v57  ;;  %v6502_v34 = vpop.permute.xlu0 %6501  ;;  %7957 = vmatprep.subr.bf16.mxu0 %v7956_v20  ;;  %v7990_v26 = vpack.c.bf16 %v7545_v5, %v7544_v33  ;;  %v7998_v56 = vpack.c.bf16 %v7549_v1, %v7548_v61  ;;  %v7566_v2 = vld [vmem:[%s11534_s1 + $0x1e0] sm:$0xff]  ;;  %v7567_v19 = vld [vmem:[%s11534_s1 + $0x1e8] sm:$0xff]  ;;  %v7536_v43 = vld [vmem:[%s11534_s1 + $0xf0] sm:$0xff] }
 0x23d   :  { %v6965_v14 = vrot.slane %v6502_v34, %v11092_v57  ;;  %7959 = vmatpush3.bf16.msra.mxu0 %v7958_v12  ;;  %v8000_v20 = vpack.c.bf16 %v7567_v19, %v7566_v2  ;;  %v7550_v12 = vld [vmem:[%s11534_s1 + $0x160] sm:$0xff]  ;;  %v7551_v16 = vld [vmem:[%s11534_s1 + $0x168] sm:$0xff]  ;;  %v7970_v34 = vpack.c.bf16 %v7519_v41, %v7518_v17  ;;  %v7537_v42 = vld [vmem:[%s11534_s1 + $0xf8] sm:$0xff] }
 0x23e   :  { %v11165_v15 = vsel %vm6872_vm8, %v7044_v39, %v11031_v40  ;;  %7991 = vmatpush3.bf16.msra.mxu1 %v7990_v26  ;;  %7961 = vmatprep.subr.bf16.mxu0 %v7960_v37  ;;  %v7972_v31 = vpack.c.bf16 %v7537_v42, %v7536_v43  ;;  %v7568_v26 = vld [vmem:[%s11534_s1 + $0x1f0] sm:$0xff]  ;;  %v7569_v3 = vld [vmem:[%s11534_s1 + $0x1f8] sm:$0xff] }
 0x23f   :  { %v11178_v35 = vsel %vm6872_vm8, %v6965_v14, %v11038_v4  ;;  %v6646_v40 = vpop.permute.xlu1 %6645  ;;  %v6874_v4 = vadd.s32 4294967224, %v10093_v51  ;;  %7993 = vmatprep.subr.bf16.mxu1 %v7992_v38  ;;  %v7520_v14 = vld [vmem:[%s11534_s1 + $0x70] sm:$0xff]  ;;  %v8004_v37 = vpack.c.bf16 %v7569_v3, %v7568_v26  ;;  %v7553_v28 = vld [vmem:[%s11534_s1 + $0x178] sm:$0xff] }
 0x240   :  { %v7202_v7 = vrot.slane %v6646_v40, %v11092_v57  ;;  %v6598_v10 = vpop.permute.xlu0 %6597 }
 0x241   :  { %v7123_v23 = vrot.slane %v6598_v10, %v11092_v57  ;;  %7963 = vmatpush3.bf16.msra.mxu0 %v7962_v11  ;;  %v7552_v11 = vld [vmem:[%s11534_s1 + $0x170] sm:$0xff] }
 0x242   :  { %v11212_v46 = vsel %vm6872_vm8, %v7202_v7, %v11071_v60  ;;  %7965 = vmatprep.subr.bf16.mxu0 %v7964_v59  ;;  %7995 = vmatpush3.bf16.msra.mxu1 %v7994_v53  ;;  %v8006_v38 = vpack.c.bf16 %v7553_v28, %v7552_v11  ;;  %v6881_v59 = vadd.s32 4294967216, %v10093_v51 }
 0x243   :  { %v11225_v49 = vsel %vm6872_vm8, %v7123_v23, %v11075_v36  ;;  %v6742_v60 = vpop.permute.xlu1 %6741  ;;  %v11238_v36 = vsub.s32 %v6874_v4, %v11825_v6  ;;  %7997 = vmatprep.subr.bf16.mxu1 %v7996_v22  ;;  %v8062_v23 = vmov 0.0|0.0  }
 0x244   :  { %v7360_v63 = vrot.slane %v6742_v60, %v11092_v57  ;;  %v6694_v55 = vpop.permute.xlu0 %6693  ;;  %v6884_v48 = vsub.s32 %v6881_v59, %v11825_v6 }
 0x245   :  { %v7281_v27 = vrot.slane %v6694_v55, %v11092_v57  ;;  %7967 = vmatpush3.bf16.msra.mxu0 %v7966_v30 }
 0x246   :  { %v7361_v39 = vsel %vm6872_vm8, %v7360_v63, %v11112_v50  ;;  %7969 = vmatprep.subr.bf16.mxu0 %v7968_v13  ;;  %v7521_v50 = vld [vmem:[%s11534_s1 + $0x78] sm:$0xff]  ;;  %7999 = vmatpush3.bf16.msra.mxu1 %v7998_v56 }
 0x247   :  { %v7282_v33 = vsel %vm6872_vm8, %v7281_v27, %v11116_v32  ;;  %v6457_v5 = vpop.permute.xlu1 %6456  ;;  %v8002_v32 = vpack.c.bf16 %v7551_v16, %v7550_v12  ;;  %8001 = vmatprep.subr.bf16.mxu1 %v8000_v20  ;;  %v7974_v44 = vpack.c.bf16 %v7521_v50, %v7520_v14  ;;  %v6888_v12 = vadd.s32 4294967208, %v10093_v51 }
 0x248   :  { %v6878_v29 = vrot.slane %v6457_v5, %v11238_v36  ;;  %v6790_v58 = vpop.permute.xlu0 %6789 }
 0x249   :  { %v7439_v40 = vrot.slane %v6790_v58, %v11092_v57  ;;  %7971 = vmatpush3.bf16.msra.mxu0 %v7970_v34  ;;  %v11318_v14 = vsub.s32 %v6888_v12, %v11825_v6  ;;  %v6909_v12 = vadd.s32 4294967184, %v10093_v51 }
 0x24a   :  { %v6880_v25 = vsel %vm6879_vm9, %v6878_v29, %v11131_v45  ;;  %7973 = vmatprep.subr.bf16.mxu0 %v7972_v31  ;;  %8003 = vmatpush3.bf16.msra.mxu1 %v8002_v32 }
 0x24b   :  { %v7440_v7 = vsel %vm6872_vm8, %v7439_v40, %v11144_v9  ;;  %v6553_v10 = vpop.permute.xlu1 %6552  ;;  %8005 = vmatprep.subr.bf16.mxu1 %v8004_v37 }
 0x24c   :  { %v7049_v57 = vrot.slane %v6553_v10, %v11238_v36  ;;  %v6505_v4 = vpop.permute.xlu0 %6504 }
 0x24d   :  { %v6970_v47 = vrot.slane %v6505_v4, %v11238_v36  ;;  %7975 = vmatpush3.bf16.msra.mxu0 %v7974_v44 }
 0x24e   :  { %v7050_v52 = vsel %vm6879_vm9, %v7049_v57, %v11165_v15  ;;  %8008 = vmatprep.subr.bf16.mxu0 %v8062_v23  ;;  %8007 = vmatpush3.bf16.msra.mxu1 %v8006_v38 }
 0x24f   :  { %v6971_v45 = vsel %vm6879_vm9, %v6970_v47, %v11178_v35  ;;  %v6649_v54 = vpop.permute.xlu1 %6648 }
 0x250   :  { %v7207_v9 = vrot.slane %v6649_v54, %v11238_v36  ;;  %v6601_v53 = vpop.permute.xlu0 %6600 }
 0x251   :  { %v7128_v18 = vrot.slane %v6601_v53, %v11238_v36 }
 0x252   :  { %v7208_v8 = vsel %vm6879_vm9, %v7207_v9, %v11212_v46 }
 0x253   :  { %v7129_v15 = vsel %vm6879_vm9, %v7128_v18, %v11225_v49  ;;  %v6745_v24 = vpop.permute.xlu1 %6744 }
 0x254   :  { %v7365_v35 = vrot.slane %v6745_v24, %v11238_v36  ;;  %v6697_v30 = vpop.permute.xlu0 %6696 }
 0x255   :  { %v7286_v61 = vrot.slane %v6697_v30, %v11238_v36 }
 0x256   :  { %v7366_v1 = vsel %vm6879_vm9, %v7365_v35, %v7361_v39 }
 0x257   :  { %v7287_v60 = vsel %vm6879_vm9, %v7286_v61, %v7282_v33  ;;  %v6460_v22 = vpop.permute.xlu1 %6459 }
 0x258   :  { %v6885_v0 = vrot.slane %v6460_v22, %v6884_v48  ;;  %v6793_v62 = vpop.permute.xlu0 %6792 }
 0x259   :  { %v7444_v46 = vrot.slane %v6793_v62, %v11238_v36 }
 0x25a   :  { %v6887_v49 = vsel %vm6886_vm10, %v6885_v0, %v6880_v25 }
 0x25b   :  { %v7445_v17 = vsel %vm6879_vm9, %v7444_v46, %v7440_v7 }
 0x25c   :  { %v6556_v63 = vpop.permute.xlu1 %6555 }
 0x25d   :  { %v7054_v55 = vrot.slane %v6556_v63, %v6884_v48  ;;  %v6508_v56 = vpop.permute.xlu0 %6507 }
 0x25e   :  { %v6975_v13 = vrot.slane %v6508_v56, %v6884_v48  ;;  %v6895_v56 = vadd.s32 4294967200, %v10093_v51 }
 0x25f   :  { %v7055_v41 = vsel %vm6886_vm10, %v7054_v55, %v7050_v52 }
 0x260   :  { %v6976_v2 = vsel %vm6886_vm10, %v6975_v13, %v6971_v45  ;;  %v6652_v19 = vpop.permute.xlu1 %6651 }
 0x261   :  { %v7212_v27 = vrot.slane %v6652_v19, %v6884_v48  ;;  %v6604_v20 = vpop.permute.xlu0 %6603  ;;  %v6902_v19 = vadd.s32 4294967192, %v10093_v51 }
 0x262   :  { %v7133_v16 = vrot.slane %v6604_v20, %v6884_v48 }
 0x263   :  { %v7213_v36 = vsel %vm6886_vm10, %v7212_v27, %v7208_v8 }
 0x264   :  { %v7134_v43 = vsel %vm6886_vm10, %v7133_v16, %v7129_v15  ;;  %v6748_v39 = vpop.permute.xlu1 %6747  ;;  %v6916_v16 = vadd.s32 4294967176, %v10093_v51 }
 0x265   :  { %v7370_v34 = vrot.slane %v6748_v39, %v6884_v48  ;;  %v6700_v42 = vpop.permute.xlu0 %6699  ;;  %v11383_v39 = vsub.s32 %v6902_v19, %v11825_v6 }
 0x266   :  { %v7291_v33 = vrot.slane %v6700_v42, %v6884_v48 }
 0x267   :  { %v11321_v5 = vsel %vm6886_vm10, %v7370_v34, %v7366_v1 }
 0x268   :  { %v7292_v31 = vsel %vm6886_vm10, %v7291_v33, %v7287_v60  ;;  %v6463_v50 = vpop.permute.xlu1 %6462 }
 0x269   :  { %v6892_v26 = vrot.slane %v6463_v50, %v11318_v14  ;;  %v6796_v3 = vpop.permute.xlu0 %6795 }
 0x26a   :  { %v7449_v29 = vrot.slane %v6796_v3, %v6884_v48  ;;  %v11395_v3 = vsub.s32 %v6916_v16, %v11825_v6 }
 0x26b   :  { %v11326_v58 = vsel %vm6893_vm11, %v6892_v26, %v6887_v49  ;;  %v11392_v26 = vsub.s32 %v6909_v12, %v11825_v6 }
 0x26c   :  { %v11329_v32 = vsel %vm6886_vm10, %v7449_v29, %v7445_v17  ;;  %v6559_v40 = vpop.permute.xlu1 %6558 }
 0x26d   :  { %v7059_v37 = vrot.slane %v6559_v40, %v11318_v14  ;;  %v6511_v11 = vpop.permute.xlu0 %6510 }
 0x26e   :  { %v6980_v28 = vrot.slane %v6511_v11, %v11318_v14 }
 0x26f   :  { %v11334_v25 = vsel %vm6893_vm11, %v7059_v37, %v7055_v41 }
 0x270   :  { %v11337_v44 = vsel %vm6893_vm11, %v6980_v28, %v6976_v2  ;;  %v6655_v7 = vpop.permute.xlu1 %6654  ;;  %v11371_v2 = vsub.s32 %v6895_v56, %v11825_v6 }
 0x271   :  { %v7217_v10 = vrot.slane %v6655_v7, %v11318_v14  ;;  %v6607_v57 = vpop.permute.xlu0 %6606 }
 0x272   :  { %v7138_v4 = vrot.slane %v6607_v57, %v11318_v14 }
 0x273   :  { %v11342_v38 = vsel %vm6893_vm11, %v7217_v10, %v7213_v36 }
 0x274   :  { %v11345_v47 = vsel %vm6893_vm11, %v7138_v4, %v7134_v43  ;;  %v6751_v52 = vpop.permute.xlu1 %6750 }
 0x275   :  { %v6703_v45 = vpop.permute.xlu0 %6702  ;;  %v7375_v36 = vrot.slane %v6751_v52, %v11318_v14 }
 0x276   :  { %v7296_v54 = vrot.slane %v6703_v45, %v11318_v14 }
 0x277   :  { %v7376_v29 = vsel %vm6893_vm11, %v7375_v36, %v11321_v5 }
 0x278   :  { %v11349_v9 = vsel %vm6893_vm11, %v7296_v54, %v7292_v31  ;;  %v6466_v53 = vpop.permute.xlu1 %6465 }
 0x279   :  { %v6799_v59 = vpop.permute.xlu0 %6798  ;;  %v6899_v43 = vrot.slane %v6466_v53, %v11371_v2 }
 0x27a   :  { %v7454_v42 = vrot.slane %v6799_v59, %v11318_v14 }
 0x27b   :  { %v6901_v37 = vsel %vm6900_vm12, %v6899_v43, %v11326_v58 }
 0x27c   :  { %v6562_v18 = vpop.permute.xlu1 %6561  ;;  %v7455_v10 = vsel %vm6893_vm11, %v7454_v42, %v11329_v32 }
 0x27d   :  { %v6514_v8 = vpop.permute.xlu0 %6513  ;;  %v7064_v33 = vrot.slane %v6562_v18, %v11371_v2 }
 0x27e   :  { %v6985_v31 = vrot.slane %v6514_v8, %v11371_v2 }
 0x27f   :  { %v7065_v5 = vsel %vm6900_vm12, %v7064_v33, %v11334_v25 }
 0x280   :  { %v6658_v15 = vpop.permute.xlu1 %6657  ;;  %v6986_v57 = vsel %vm6900_vm12, %v6985_v31, %v11337_v44 }
 0x281   :  { %v11351_v24 = vpop.permute.xlu0 %6609  ;;  %v7222_v51 = vrot.slane %v6658_v15, %v11371_v2 }
 0x282   :  { %v7143_v45 = vrot.slane %v11351_v24, %v11371_v2 }
 0x283   :  { %v7223_v58 = vsel %vm6900_vm12, %v7222_v51, %v11342_v38 }
 0x284   :  { %v6754_v35 = vpop.permute.xlu1 %6753 }
 0x285   :  { %v6706_v30 = vpop.permute.xlu0 %6705  ;;  %v7380_v14 = vrot.slane %v6754_v35, %v11371_v2 }
 0x286   :  { %v7301_v40 = vrot.slane %v6706_v30, %v11371_v2 }
 0x287   :  { %v7381_v32 = vsel %vm6900_vm12, %v7380_v14, %v7376_v29 }
 0x288   :  { %v6469_v48 = vpop.permute.xlu1 %6468  ;;  %v7302_v25 = vsel %vm6900_vm12, %v7301_v40, %v11349_v9 }
 0x289   :  { %v11353_v61 = vpop.permute.xlu0 %6801  ;;  %v6906_v11 = vrot.slane %v6469_v48, %v11383_v39 }
 0x28a   :  { %v7459_v44 = vrot.slane %v11353_v61, %v11371_v2 }
 0x28b   :  { %v6908_v18 = vsel %vm6907_vm13, %v6906_v11, %v6901_v37  ;;  %v7144_v37 = vsel %vm6900_vm12, %v7143_v45, %v11345_v47 }
 0x28c   :  { %v6565_v1 = vpop.permute.xlu1 %6564  ;;  %v7460_v11 = vsel %vm6900_vm12, %v7459_v44, %v7455_v10 }
 0x28d   :  { %v6517_v60 = vpop.permute.xlu0 %6516  ;;  %v7069_v28 = vrot.slane %v6565_v1, %v11383_v39 }
 0x28e   :  { %v6990_v7 = vrot.slane %v6517_v60, %v11383_v39 }
 0x28f   :  { %v7070_v38 = vsel %vm6907_vm13, %v7069_v28, %v7065_v5 }
 0x290   :  { %v6661_v22 = vpop.permute.xlu1 %6660  ;;  %v6991_v8 = vsel %vm6907_vm13, %v6990_v7, %v6986_v57 }
 0x291   :  { %v11355_v0 = vpop.permute.xlu0 %6612  ;;  %v7227_v4 = vrot.slane %v6661_v22, %v11383_v39 }
 0x293   :  { %v7228_v35 = vsel %vm6907_vm13, %v7227_v4, %v7223_v58 }
 0x294   :  { %v11357_v62 = vpop.permute.xlu1 %6756 }
 0x295   :  { %v11359_v46 = vpop.permute.xlu0 %6708  ;;  %v7385_v15 = vrot.slane %v11357_v62, %v11383_v39 }
 0x296   :  { %v7306_v9 = vrot.slane %v11359_v46, %v11383_v39 }
 0x297   :  { %v7386_v2 = vsel %vm6907_vm13, %v7385_v15, %v7381_v32  ;;  %v7742_v15 = vld [vmem:[%s11536_s3 + $0x10] sm:$0xff] }
 0x298   :  { %v6472_v49 = vpop.permute.xlu1 %6471 }
 0x299   :  { %v11361_v17 = vpop.permute.xlu0 %6804  ;;  %v6913_v54 = vrot.slane %v6472_v49, %v11392_v26 }
 0x29b   :  { %v6915_v1 = vsel %vm6914_vm14, %v6913_v54, %v6908_v18 }
 0x29c   :  { %v11363_v63 = vpop.permute.xlu1 %6567 }
 0x29d   :  { %v11365_v55 = vpop.permute.xlu0 %6519  ;;  %v7074_v30 = vrot.slane %v11363_v63, %v11392_v26 }
 0x29e   :  { %v6995_v60 = vrot.slane %v11365_v55, %v11392_v26 }
 0x29f   :  { %v7075_v16 = vsel %vm6914_vm14, %v7074_v30, %v7070_v38  ;;  %v7745_v30 = vld [vmem:[%s11536_s3 + $0x28] sm:$0xff] }
 0x2a0   :  { %v6664_v13 = vpop.permute.xlu1 %6663 }
 0x2a1   :  { %v11368_v41 = vpop.permute.xlu0 %6615  ;;  %v7232_v53 = vrot.slane %v6664_v13, %v11392_v26  ;;  %v7148_v13 = vrot.slane %v11355_v0, %v11383_v39 }
 0x2a2   :  { %v7153_v0 = vrot.slane %v11368_v41, %v11392_v26 }
 0x2a3   :  { %v7233_v22 = vsel %vm6914_vm14, %v7232_v53, %v7228_v35 }
 0x2a4   :  { %v11374_v27 = vpop.permute.xlu1 %6759 }
 0x2a5   :  { %v11376_v20 = vpop.permute.xlu0 %6711  ;;  %v7390_v62 = vrot.slane %v11374_v27, %v11392_v26  ;;  %v7307_v27 = vsel %vm6907_vm13, %v7306_v9, %v7302_v25  ;;  %v7741_v25 = vld [vmem:[%s11536_s3 + $0x8] sm:$0xff] }
 0x2a6   :  { %v7311_v49 = vrot.slane %v11376_v20, %v11392_v26  ;;  %v7464_v20 = vrot.slane %v11361_v17, %v11383_v39 }
 0x2a7   :  { %v7391_v42 = vsel %vm6914_vm14, %v7390_v62, %v7386_v2 }
 0x2a8   :  { %v6475_v34 = vpop.permute.xlu1 %6474  ;;  %v7312_v31 = vsel %vm6914_vm14, %v7311_v49, %v7307_v27  ;;  %v7465_v7 = vsel %vm6907_vm13, %v7464_v20, %v7460_v11  ;;  %v7843_v49 = vld [vmem:[%s11535_s2] ss:$0 sm:$0xff]  ;;  %s8032_s2 = scalar_lea.vmem %s7836_s15, 32 }
 0x2a9   :  { %v11388_v50 = vpop.permute.xlu0 %6807  ;;  %v6920_v59 = vrot.slane %v6475_v34, %v11395_v3  ;;  %v6996_v34 = vsel %vm6914_vm14, %v6995_v60, %v6991_v8  ;;  %v8064_v60 = vmov 0.0   ;;  %p8033_p0 = scmp.ne.s32.totalorder %s7836_s15, %s8032_s2  ;;  %p8038_p2 = scmp.lt.s32.totalorder %s8032_s2, %s8032_s2 }
 0x2aa   :  { %v7469_v51 = vrot.slane %v11388_v50, %v11392_v26  ;;  %v7149_v26 = vsel %vm6907_vm13, %v7148_v13, %v7144_v37 }
 0x2ab   :  { %v6922_v46 = vsel %vm6921_vm15, %v6920_v59, %v6915_v1  ;;  %v7154_v57 = vsel %vm6914_vm14, %v7153_v0, %v7149_v26  ;;  %v7747_v1 = vld [vmem:[%s11536_s3 + $0x38] sm:$0xff]  ;;  %p8039_p3 = por %p8038_p2, %p8037_p1 }
 0x2ac   :  { %v6571_v6 = vpop.permute.xlu1 %6570  ;;  %v7470_v4 = vsel %vm6914_vm14, %v7469_v51, %v7465_v7 }
 0x2ad   :  { %v6523_v52 = vpop.permute.xlu0 %6522  ;;  %v7079_v63 = vrot.slane %v6571_v6, %v11395_v3  ;;  %p8040_p4 = pnand %p8039_p3, %p8033_p0 }
 0x2ae   :  { %v7000_v55 = vrot.slane %v6523_v52, %v11395_v3 }
 0x2af   :  { %v7080_v17 = vsel %vm6921_vm15, %v7079_v63, %v7075_v16 }
 0x2b0   :  { %v6667_v24 = vpop.permute.xlu1 %6666  ;;  %v7001_v29 = vsel %vm6921_vm15, %v7000_v55, %v6996_v34 }
 0x2b1   :  { %v7237_v48 = vrot.slane %v6667_v24, %v11395_v3  ;;  %v6619_v61 = vpop.permute.xlu0 %6618  ;;  %v7743_v24 = vld [vmem:[%s11536_s3 + $0x18] sm:$0xff] }
 0x2b2   :  { %v7158_v14 = vrot.slane %v6619_v61, %v11395_v3  ;;  %v8012_v9 = vpack.c.bf16 %v7743_v24, %v7742_v15 }
 0x2b3   :  { %v7238_v56 = vsel %vm6921_vm15, %v7237_v48, %v7233_v22  ;;  %v7746_v48 = vld [vmem:[%s11536_s3 + $0x30] sm:$0xff] }
 0x2b4   :  { %v7477_v19 = vsel %vm7476_vm1, %v7238_v56, %v6922_v46  ;;  %v6763_v12 = vpop.permute.xlu1 %6762  ;;  %v7159_v52 = vsel %vm6921_vm15, %v7158_v14, %v7154_v57  ;;  %v8018_v22 = vpack.c.bf16 %v7747_v1, %v7746_v48 }
 0x2b5   :  { %v7395_v36 = vrot.slane %v6763_v12, %v11395_v3  ;;  %v6715_v43 = vpop.permute.xlu0 %6714 }
 0x2b6   :  { %v7316_v33 = vrot.slane %v6715_v43, %v11395_v3 }
 0x2b7   :  { %v7396_v39 = vsel %vm6921_vm15, %v7395_v36, %v7391_v42 }
 0x2b8   :  { %v7479_v40 = vsel %vm7476_vm1, %v7396_v39, %v7080_v17  ;;  %v7317_v41 = vsel %vm6921_vm15, %v7316_v33, %v7312_v31 }
 0x2b9   :  { %v7478_v28 = vsel %vm7476_vm1, %v7317_v41, %v7001_v29  ;;  %v6811_v50 = vpop.permute.xlu0 %6810 }
 0x2ba   :  { %v7481_v6 = vcombine.low %v7477_v19, %v7478_v28  ;;  %v7474_v5 = vrot.slane %v6811_v50, %v11395_v3  ;;  %v7740_v3 = vld [vmem:[%s11536_s3] sm:$0xff] }
 0x2bb   :  { %v8009_v8 = vpack.c.bf16 %v7741_v25, %v7740_v3 }
 0x2bc   :  { %v7475_v47 = vsel %vm6921_vm15, %v7474_v5, %v7470_v4  ;;  %v7489_v45 = vrot.slane %v7481_v6, %v8675_v21 }
 0x2bd   :  { %v7480_v10 = vsel %vm7476_vm1, %v7475_v47, %v7159_v52 }
 0x2be   :  { %v7482_v58 = vcombine.low %v7479_v40, %v7480_v10 }
 0x2c0   :  { %v7496_v54 = vrot.slane %v7482_v58, %v8675_v21 }
 0x2c2   :  { %v7497_v53 = vcombine.low %v7489_v45, %v7496_v54 }
 0x2c4   :  { %v7505_v32 = vmul.f32 0.015625, %v7497_v53 }
 0x2c6   :  { %v7585_v44 = vrot.slane %v7505_v32, %v8675_v21  ;;  %v7578_v59 = vcombine.high %v7505_v32, %v7505_v32 }
 0x2c8   :  { %v7593_v18 = vcombine.high %v7585_v44, %v7585_v44  ;;  %v7592_v38 = vrot.slane %v7578_v59, %v8675_v21  ;;  %v7744_v21 = vld [vmem:[%s11536_s3 + $0x20] sm:$0xff] }
 0x2c9   :  { %v8015_v61 = vpack.c.bf16 %v7745_v30, %v7744_v21 }
 0x2ca   :  { %7663 = vmatprep.mubr.f32.mxu0 %v7593_v18  ;;  %v7594_v35 = vcombine.high %v7592_v38, %v7592_v38 }
 0x2cb   :  { %7664 = vmatmul.mubr.f32.vlgmr.msra.gmra.mrb[0].mxu0 %v7585_v44 }
 0x2cc   :  { %7733 = vmatprep.mubr.f32.mxu1 %v7594_v35  ;;  %8010 = vmatpush3.bf16.msra.mxu0 %v8009_v8 }
 0x2cd   :  { %7734 = vmatmul.mubr.f32.vlgmr.msra.gmra.mrb[0].mxu1 %v7592_v38  ;;  %8011 = vmatprep.subr.bf16.mxu0 %v8062_v23 }
 0x2ce   :  { %7941 = vmatprep.mubr.msk.f32.mxu0 %vm8063_vm2, %v8064_v60 }
 0x2d0   :  { %8013 = vmatpush3.bf16.msra.mxu0 %v8012_v9 }
 0x2d1   :  { %8014 = vmatprep.subr.bf16.mxu0 %v8062_v23 }
 0x2d4   :  { %8016 = vmatpush3.bf16.msra.mxu0 %v8015_v61 }
 0x2d5   :  { %8017 = vmatprep.subr.bf16.mxu0 %v8062_v23  ;;  %v7844_v23 = vld [vmem:[%s11537_s4] ss:$0 sm:$0xff] }
 0x2d8   :  { %8019 = vmatpush3.bf16.msra.mxu0 %v8018_v22 }
 0x39e   :  { %v7878_v62 = vpop.f32.mrb[0].mxu0 }
 0x39f   :  { %v7879_v46 = vpop.f32.mrb[1].mxu0 }
 0x3a0   :  { %v7880_v63 = vadd.f32 %v7879_v46, %v7878_v62  ;;  %v7913_v56 = vpop.f32.mrb[0].mxu1 }
 0x3a1   :  { %v7914_v13 = vpop.f32.mrb[1].mxu1 }
 0x3a2   :  { %v7666_v2 = vadd.f32 %v7880_v63, %v7843_v49  ;;  %v7915_v55 = vadd.f32 %v7914_v13, %v7913_v56 }
 0x3a4   :  { %v7736_v19 = vadd.f32 %v7915_v55, %v7666_v2 }
 0x3a6   :  { %v7739_v12 = vmax.f32 %v7736_v19, 0.0 }
 0x3a8   :  { %7942 = vmatmul.mubr.msk.f32.vlgmr.msra.gmra.mrb[2].mxu0 %vm155_vm0, %v7739_v12 }
 0x47b   :  { %v7824_v27 = vpop.f32.mrb[2].mxu0 }
 0x47c   :  { %v7825_v20 = vadd.f32 %v7844_v23, %v7824_v27  ;;  %v7943_v16 = vpop.f32.mrb[3].mxu0 }
 0x47e   :  { %7828 = vst [vmem:[#allocation3] sm:$0x3] %v7825_v20 }
 0x47f   :  { %8043 = shalt.err (!%p8040_p4)
}
 0x480   :  { %s8044_s18 = scalar_lea.hbm %s11538_s5, 32 }
 0x481   :  { %p8045_p5 = scmp.ne.s32.totalorder %s11538_s5, %s8044_s18  ;;  %p8048_p6 = scmp.lt.u32.totalorder %s8044_s18, %s11538_s5 }
 0x483   :  { %p8050_p7 = pnand %p8048_p6, %p8045_p5 }
 0x485   :  { %8053 = shalt.err (!%p8050_p7)
}
 0x486   :  { %7838 = dma.vmem_to_hbm [thread:$0]  %s7836_s15, 32, %s11538_s5, [#allocation4]  }
 0x487   :  { %8054 = dma.done.wait [#allocation4], 32  }
 0x488   :  { %8055 = vsyncadd [#allocation4], 4294967264 }
 0x489   :  { %7842 = vsyncpa [#allocation4], 1 }

</bundles_post_ra>
